<compile_context>
chip_gen: v6e
topology: v6e:2x2x1
jax: 0.10.0
libtpu: 0.0.40
codegen_flags: <defaults>
</compile_context>

<pallas_src>
import functools

import jax
import jax.numpy as jnp
from jax.experimental import pallas as pl
from jax.experimental.pallas import tpu as pltpu


# Scoped-VMEM limit: above the 16/32 MiB defaults, below v7x's 64 MiB physical.
_VMEM_LIMIT_BYTES = 48 * 1024 * 1024
# Per-generation note: tm=256 keeps (2 x bf16 x-tile + f32 out-tile + resident
# weights) well under a few MiB for every layer here; re-derive (larger) for
# v5e/v6e's 128 MiB VMEM if K grows.
_DEFAULT_TM = 256


def _round_up(v, m):
    return (v + m - 1) // m * m


# ----------------------------------------------------------------------------
# Pallas kernel: tiled matmul + bias (+ input ReLU) (+ residual) (+ output ReLU)
# ----------------------------------------------------------------------------
def _mm_kernel(*refs, relu_in, relu_out, has_residual):
    if has_residual:
        x_ref, w_ref, b_ref, r_ref, o_ref = refs
    else:
        x_ref, w_ref, b_ref, o_ref = refs
        r_ref = None
    x = x_ref[...]                                   # (tm, K) bf16
    if relu_in:
        x = jnp.maximum(x, 0.0)                      # ReLU fused on the cols tile
    y = jnp.dot(x, w_ref[...], preferred_element_type=jnp.float32)
    y = y + b_ref[...]                               # f32 epilogue
    if r_ref is not None:
        y = y + r_ref[...]                           # fused residual add (f32)
    if relu_out:
        y = jnp.maximum(y, 0.0)
    o_ref[...] = y.astype(o_ref.dtype)


def matmul_bias(x, w, b, *, relu_in=False, relu_out=False, residual=None,
                tm=_DEFAULT_TM):
    """x:(M,K) @ w:(K,N) + b (+res) -> (M,N) f32.  M-tiled, bf16 MXU operands."""
    M, K = x.shape
    Kw, N = w.shape
    assert K == Kw
    tm = min(tm, _round_up(M, 8))          # tile is a multiple of 8 sublanes
    Mp = _round_up(M, tm)                  # pad M so every block is full/aligned

    xp = x.astype(jnp.bfloat16)
    if Mp != M:
        xp = jnp.pad(xp, ((0, Mp - M), (0, 0)))
    wp = w.astype(jnp.bfloat16)
    bp = b.reshape(1, N).astype(jnp.float32)

    in_specs = [
        pl.BlockSpec((tm, K), lambda i: (i, 0)),     # x tile streams over M
        pl.BlockSpec((K, N), lambda i: (0, 0)),      # weights resident
        pl.BlockSpec((1, N), lambda i: (0, 0)),      # bias resident
    ]
    args = [xp, wp, bp]
    if residual is not None:
        rp = residual.astype(jnp.float32)
        if Mp != M:
            rp = jnp.pad(rp, ((0, Mp - M), (0, 0)))
        in_specs.append(pl.BlockSpec((tm, N), lambda i: (i, 0)))
        args.append(rp)

    kernel = functools.partial(_mm_kernel, relu_in=relu_in, relu_out=relu_out,
                               has_residual=residual is not None)
    out = pl.pallas_call(
        kernel,
        out_shape=jax.ShapeDtypeStruct((Mp, N), jnp.float32),
        grid=(Mp // tm,),
        in_specs=in_specs,
        out_specs=pl.BlockSpec((tm, N), lambda i: (i, 0)),
        compiler_params=pltpu.CompilerParams(
            dimension_semantics=("parallel",),        # dual-TC on v7x
            vmem_limit_bytes=_VMEM_LIMIT_BYTES),
    )(*args)
    return out[:M] if Mp != M else out


# ----------------------------------------------------------------------------
# Pallas kernel: fused actor_fc + critic_fc + heads + softmax stats + sampling
# ----------------------------------------------------------------------------
def _head_kernel(af_ref, cf_ref, wfa_ref, bfa_ref, wfc_ref, bfc_ref,
                 wa_ref, ba_ref, wc_ref, bc_ref, g_ref, out_ref):
    # tower-final ReLU (torch: relu -> flatten -> fc -> relu) fused here
    a_in = jnp.maximum(af_ref[...], 0.0).astype(jnp.bfloat16)     # (B, F)
    c_in = jnp.maximum(cf_ref[...], 0.0).astype(jnp.bfloat16)

    a_feat = jnp.dot(a_in, wfa_ref[...],
                     preferred_element_type=jnp.float32) + bfa_ref[...]
    a_feat = jnp.maximum(a_feat, 0.0)                              # (B, 256)
    c_feat = jnp.dot(c_in, wfc_ref[...],
                     preferred_element_type=jnp.float32) + bfc_ref[...]
    c_feat = jnp.maximum(c_feat, 0.0)

    logits = jnp.dot(a_feat.astype(jnp.bfloat16), wa_ref[...],
                     preferred_element_type=jnp.float32) + ba_ref[...]   # (B, A)
    value = jnp.dot(c_feat.astype(jnp.bfloat16), wc_ref[...],
                    preferred_element_type=jnp.float32) + bc_ref[...]    # (B, 1)

    # numerically stable log-softmax; reciprocal goes to the (idle) EUP slot
    m = jnp.max(logits, axis=-1, keepdims=True)
    z = logits - m
    ez = jnp.exp(z)
    se = jnp.sum(ez, axis=-1, keepdims=True)
    logp_all = z - jnp.log(se)                                    # (B, A)
    p = ez * pl.reciprocal(se, approx=True)                       # (B, A)
    ent = -jnp.sum(p * logp_all, axis=-1, keepdims=True)          # (B, 1)

    # Gumbel-max categorical sample (lowest index on ties)
    A = logits.shape[-1]
    pert = logits + g_ref[...]
    pmax = jnp.max(pert, axis=-1, keepdims=True)
    iota = jax.lax.broadcasted_iota(jnp.int32, pert.shape, 1)
    action = jnp.min(jnp.where(pert >= pmax, iota, A),
                     axis=-1, keepdims=True)                      # (B, 1) int32
    onehot = (iota == action).astype(jnp.float32)
    logp = jnp.sum(onehot * logp_all, axis=-1, keepdims=True)     # (B, 1)

    # pack the four (B,1) results into one lane-dense (B,128) slab
    col = jax.lax.broadcasted_iota(jnp.int32, out_ref.shape, 1)
    slab = jnp.where(col == 0, action.astype(jnp.float32),
           jnp.where(col == 1, logp,
           jnp.where(col == 2, value,
           jnp.where(col == 3, ent, 0.0))))
    out_ref[...] = slab


def head_call(a_flat, c_flat, params, gumbel):
    B, F = a_flat.shape
    Hd = params["actor_tower"]["fc_w"].shape[1]
    A = params["actor_w"].shape[1]
    assert params["actor_tower"]["fc_w"].shape[0] == F
    bf16, f32 = jnp.bfloat16, jnp.float32
    args = (
        a_flat.astype(f32), c_flat.astype(f32),
        params["actor_tower"]["fc_w"].astype(bf16),
        params["actor_tower"]["fc_b"].reshape(1, Hd).astype(f32),
        params["critic_tower"]["fc_w"].astype(bf16),
        params["critic_tower"]["fc_b"].reshape(1, Hd).astype(f32),
        params["actor_w"].astype(bf16),
        params["actor_b"].reshape(1, A).astype(f32),
        params["critic_w"].astype(bf16),
        params["critic_b"].reshape(1, 1).astype(f32),
        gumbel.astype(f32),
    )
    in_specs = [pl.BlockSpec(a.shape, lambda i: (0, 0)) for a in args]
    return pl.pallas_call(
        _head_kernel,
        out_shape=jax.ShapeDtypeStruct((B, 128), jnp.float32),
        grid=(1,),
        in_specs=in_specs,
        out_specs=pl.BlockSpec((B, 128), lambda i: (0, 0)),
        compiler_params=pltpu.CompilerParams(
            dimension_semantics=("arbitrary",),
            vmem_limit_bytes=_VMEM_LIMIT_BYTES),
    )(*args)


# ----------------------------------------------------------------------------
# JAX glue: patch extraction (fused XLA op) and max-pool
# ----------------------------------------------------------------------------
def _patches_3x3(x_nhwc):
    """(N,H,W,C) -> (N,H,W,9C) im2col patches of a 3x3 / stride-1 / pad-1 conv."""
    return jax.lax.conv_general_dilated_patches(
        x_nhwc, filter_shape=(3, 3), window_strides=(1, 1),
        padding=((1, 1), (1, 1)),
        dimension_numbers=("NHWC", "HWIO", "NHWC"))


def maxpool_3x3_s2_p1(x_nhwc):
    # TODO(synk): kept as lax.reduce_window glue rather than a Pallas kernel.
    return jax.lax.reduce_window(
        x_nhwc, jnp.array(-jnp.inf, dtype=x_nhwc.dtype), jax.lax.max,
        window_dimensions=(1, 3, 3, 1),
        window_strides=(1, 2, 2, 1),
        padding=((0, 0), (1, 1), (1, 1), (0, 0)))


def conv3x3(x_nhwc, w, b, *, relu_in=False, residual=None):
    """3x3/s1/p1 conv (+pre-ReLU, +residual) via patches + fused Pallas matmul."""
    N, H, W, Cin = x_nhwc.shape
    Cout = w.shape[1]
    cols = _patches_3x3(x_nhwc).reshape(N * H * W, 9 * Cin)
    res2d = None if residual is None else residual.reshape(N * H * W, Cout)
    y = matmul_bias(cols, w, b, relu_in=relu_in, residual=res2d)
    return y.reshape(N, H, W, Cout)


# ----------------------------------------------------------------------------
# Model blocks (mirror ImpalaBlock / ResBlock, use_bn=False)
# ----------------------------------------------------------------------------
def res_block(x, p):
    # h = conv1(relu(x)) ;  out = conv2(relu(h)) + x  (ReLU + residual fused)
    h = conv3x3(x, p["c1"]["w"], p["c1"]["b"], relu_in=True)
    return conv3x3(h, p["c2"]["w"], p["c2"]["b"], relu_in=True, residual=x)


def impala_block(x, p):
    y = conv3x3(x, p["conv"]["w"], p["conv"]["b"])
    y = maxpool_3x3_s2_p1(y)
    y = res_block(y, p["res1"])
    y = res_block(y, p["res2"])
    return y


def tower_forward(x, tp):
    y = impala_block(x, tp["b1"])
    y = impala_block(y, tp["b2"])
    y = impala_block(y, tp["b3"])
    # final ReLU + fc are fused into the head kernel; flatten in NHWC order
    # (synthetic fc weights absorb the permutation vs torch's NCHW flatten)
    return y.reshape(y.shape[0], -1)


# ----------------------------------------------------------------------------
# Parameter construction (deterministic, synthetic) — im2col weight layout
# ----------------------------------------------------------------------------
def init_params(key, input_channels, action_dim, flatten_size, hidden=256):
    counter = [0]

    def nk():
        counter[0] += 1
        return jax.random.fold_in(key, counter[0])

    def dense(fan_in, shape, gain=1.0):
        return gain * jax.random.normal(nk(), shape, jnp.float32) / jnp.sqrt(fan_in)

    def conv(cin, cout):
        return {"w": dense(9 * cin, (9 * cin, cout)),
                "b": jnp.zeros((cout,), jnp.float32)}

    def resb(c):
        return {"c1": conv(c, c), "c2": conv(c, c)}

    def block(cin, cout):
        return {"conv": conv(cin, cout), "res1": resb(cout), "res2": resb(cout)}

    def tower_p(cin):
        return {"b1": block(cin, 16), "b2": block(16, 32), "b3": block(32, 32),
                "fc_w": dense(flatten_size, (flatten_size, hidden)),
                "fc_b": jnp.zeros((hidden,), jnp.float32)}

    return {
        "actor_tower": tower_p(input_channels),
        "critic_tower": tower_p(input_channels),
        # actor head with gain 0.01 (orthogonal_init(..., gain=0.01) analogue)
        "actor_w": dense(hidden, (hidden, action_dim), gain=0.01),
        "actor_b": jnp.zeros((action_dim,), jnp.float32),
        "critic_w": dense(hidden, (hidden, 1)),
        "critic_b": jnp.zeros((1,), jnp.float32),
    }


# ----------------------------------------------------------------------------
# Forward (mirrors SeparateImpalaCNN.forward with action=None)
# ----------------------------------------------------------------------------
def separate_impala_cnn_forward(params, x_nchw, gumbel_noise):
    x = jnp.transpose(x_nchw.astype(jnp.float32) / 255.0, (0, 2, 3, 1))   # NHWC
    a_flat = tower_forward(x, params["actor_tower"])     # (B, F)
    c_flat = tower_forward(x, params["critic_tower"])    # (B, F)
    slab = head_call(a_flat, c_flat, params, gumbel_noise)   # (B, 128) packed
    action = slab[:, 0].astype(jnp.int32)
    log_prob = slab[:, 1]
    value = slab[:, 2]
    entropy = slab[:, 3]
    return action, log_prob, value, entropy


# ----------------------------------------------------------------------------
if __name__ == "__main__":
    # Small config: 16x16 input -> spatial 16 -> 8 -> 4 -> 2 through the three
    # ImpalaBlocks, so flatten_size = 32 * 2 * 2 = 128.
    batch, input_channels, H, W = 2, 4, 16, 16
    action_dim = 6
    flatten_size = 32 * 2 * 2

    key = jax.random.PRNGKey(0)
    k_param, k_x, k_g = jax.random.split(key, 3)

    params = init_params(k_param, input_channels, action_dim, flatten_size)
    x = jax.random.uniform(k_x, (batch, input_channels, H, W),
                           jnp.float32, 0.0, 255.0)
    gumbel = jax.random.gumbel(k_g, (batch, action_dim), jnp.float32)

    fwd = jax.jit(separate_impala_cnn_forward)
    action, log_prob, value, entropy = fwd(params, x, gumbel)
    jax.block_until_ready((action, log_prob, value, entropy))

    assert action.shape == (batch,) and action.dtype == jnp.int32
    assert log_prob.shape == (batch,)
    assert value.shape == (batch,)
    assert entropy.shape == (batch,)
    assert bool(jnp.all((action >= 0) & (action < action_dim)))
    assert bool(jnp.all(jnp.isfinite(log_prob))) and bool(jnp.all(log_prob <= 0.0))
    assert bool(jnp.all(jnp.isfinite(value)))
    assert bool(jnp.all(entropy >= 0.0))
    print("KERNEL_OK")
</pallas_src>

<mosaic_0001>
module attributes {stable_mosaic.version = 11 : i64} {
  func.func @_mm_kernel(%arg0: i32, %arg1: memref<256x36xbf16, #tpu.memory_space<vmem>>, %arg2: memref<36x16xbf16, #tpu.memory_space<vmem>>, %arg3: memref<1x16xf32, #tpu.memory_space<vmem>>, %arg4: memref<256x16xf32, #tpu.memory_space<vmem>>) attributes {dimension_semantics = [#tpu.dimension_semantics<parallel>], iteration_bounds = array<i64: 2>, scalar_prefetch = 0 : i64, scratch_operands = 0 : i64, tpu.core_type = #tpu.core_type<tc>, window_params = [{transform_indices = @transform_0, window_bounds = array<i64: 256, 36>}, {pipeline_mode = #tpu.pipeline_mode<synchronous>, transform_indices = @transform_1, window_bounds = array<i64: 36, 16>}, {pipeline_mode = #tpu.pipeline_mode<synchronous>, transform_indices = @transform_2, window_bounds = array<i64: 1, 16>}, {transform_indices = @transform_3, window_bounds = array<i64: 256, 16>}]} {
    %c0 = arith.constant 0 : index
    %c0_0 = arith.constant 0 : index
    %0 = vector.load %arg1[%c0, %c0_0] : memref<256x36xbf16, #tpu.memory_space<vmem>>, vector<256x36xbf16>
    %c0_1 = arith.constant 0 : index
    %c0_2 = arith.constant 0 : index
    %1 = vector.load %arg2[%c0_1, %c0_2] : memref<36x16xbf16, #tpu.memory_space<vmem>>, vector<36x16xbf16>
    %cst = arith.constant dense<0.000000e+00> : vector<256x16xf32>
    %2 = tpu.matmul %0, %1, %cst {dimension_numbers = #tpu.dot_dimension_numbers<[1], [0], [0], [1], [0, 0, 1, 1], [], []>} : vector<256x36xbf16>, vector<36x16xbf16>, vector<256x16xf32> -> vector<256x16xf32>
    %c0_3 = arith.constant 0 : index
    %c0_4 = arith.constant 0 : index
    %3 = vector.load %arg3[%c0_3, %c0_4] : memref<1x16xf32, #tpu.memory_space<vmem>>, vector<1x16xf32>
    %4 = vector.broadcast %3 : vector<1x16xf32> to vector<256x16xf32>
    %5 = arith.addf %2, %4 : vector<256x16xf32>
    %c0_5 = arith.constant 0 : index
    %c0_6 = arith.constant 0 : index
    %6 = vector.load %arg4[%c0_5, %c0_6] : memref<256x16xf32, #tpu.memory_space<vmem>>, vector<256x16xf32>
    tpu.vector_store %arg4[%c0_5, %c0_6], %5 {strides = array<i32>} : memref<256x16xf32, #tpu.memory_space<vmem>>, vector<256x16xf32>,
    return
  }
  func.func @transform_0(%arg0: i32) -> (i32, i32) {
    %c0_i32 = arith.constant 0 : i32
    %c0_i32_0 = arith.constant 0 : i32
    return %arg0, %c0_i32 : i32, i32
  }
  func.func @transform_1(%arg0: i32) -> (i32, i32) {
    %c0_i32 = arith.constant 0 : i32
    %c0_i32_0 = arith.constant 0 : i32
    %c0_i32_1 = arith.constant 0 : i32
    return %c0_i32, %c0_i32_0 : i32, i32
  }
  func.func @transform_2(%arg0: i32) -> (i32, i32) {
    %c0_i32 = arith.constant 0 : i32
    %c0_i32_0 = arith.constant 0 : i32
    %c0_i32_1 = arith.constant 0 : i32
    return %c0_i32, %c0_i32_0 : i32, i32
  }
  func.func @transform_3(%arg0: i32) -> (i32, i32) {
    %c0_i32 = arith.constant 0 : i32
    %c0_i32_0 = arith.constant 0 : i32
    return %arg0, %c0_i32 : i32, i32
  }
}

module attributes {stable_mosaic.version = 11 : i64} {
  func.func @_mm_kernel(%arg0: i32, %arg1: memref<128x144xbf16, #tpu.memory_space<vmem>>, %arg2: memref<144x16xbf16, #tpu.memory_space<vmem>>, %arg3: memref<1x16xf32, #tpu.memory_space<vmem>>, %arg4: memref<128x16xf32, #tpu.memory_space<vmem>>) attributes {dimension_semantics = [#tpu.dimension_semantics<parallel>], iteration_bounds = array<i64: 1>, scalar_prefetch = 0 : i64, scratch_operands = 0 : i64, tpu.core_type = #tpu.core_type<tc>, window_params = [{transform_indices = @transform_0, window_bounds = array<i64: 128, 144>}, {pipeline_mode = #tpu.pipeline_mode<synchronous>, transform_indices = @transform_1, window_bounds = array<i64: 144, 16>}, {pipeline_mode = #tpu.pipeline_mode<synchronous>, transform_indices = @transform_2, window_bounds = array<i64: 1, 16>}, {transform_indices = @transform_3, window_bounds = array<i64: 128, 16>}]} {
    %c0 = arith.constant 0 : index
    %c0_0 = arith.constant 0 : index
    %0 = vector.load %arg1[%c0, %c0_0] : memref<128x144xbf16, #tpu.memory_space<vmem>>, vector<128x144xbf16>
    %cst = arith.constant 0.000000e+00 : bf16
    %1 = vector.broadcast %cst : bf16 to vector<128x144xbf16>
    %2 = arith.maximumf %0, %1 : vector<128x144xbf16>
    %c0_1 = arith.constant 0 : index
    %c0_2 = arith.constant 0 : index
    %3 = vector.load %arg2[%c0_1, %c0_2] : memref<144x16xbf16, #tpu.memory_space<vmem>>, vector<144x16xbf16>
    %cst_3 = arith.constant dense<0.000000e+00> : vector<128x16xf32>
    %4 = tpu.matmul %2, %3, %cst_3 {dimension_numbers = #tpu.dot_dimension_numbers<[1], [0], [0], [1], [0, 0, 1, 1], [], []>} : vector<128x144xbf16>, vector<144x16xbf16>, vector<128x16xf32> -> vector<128x16xf32>
    %c0_4 = arith.constant 0 : index
    %c0_5 = arith.constant 0 : index
    %5 = vector.load %arg3[%c0_4, %c0_5] : memref<1x16xf32, #tpu.memory_space<vmem>>, vector<1x16xf32>
    %6 = vector.broadcast %5 : vector<1x16xf32> to vector<128x16xf32>
    %7 = arith.addf %4, %6 : vector<128x16xf32>
    %c0_6 = arith.constant 0 : index
    %c0_7 = arith.constant 0 : index
    %8 = vector.load %arg4[%c0_6, %c0_7] : memref<128x16xf32, #tpu.memory_space<vmem>>, vector<128x16xf32>
    tpu.vector_store %arg4[%c0_6, %c0_7], %7 {strides = array<i32>} : memref<128x16xf32, #tpu.memory_space<vmem>>, vector<128x16xf32>,
    return
  }
  func.func @transform_0(%arg0: i32) -> (i32, i32) {
    %c0_i32 = arith.constant 0 : i32
    %c0_i32_0 = arith.constant 0 : i32
    return %arg0, %c0_i32 : i32, i32
  }
  func.func @transform_1(%arg0: i32) -> (i32, i32) {
    %c0_i32 = arith.constant 0 : i32
    %c0_i32_0 = arith.constant 0 : i32
    %c0_i32_1 = arith.constant 0 : i32
    return %c0_i32, %c0_i32_0 : i32, i32
  }
  func.func @transform_2(%arg0: i32) -> (i32, i32) {
    %c0_i32 = arith.constant 0 : i32
    %c0_i32_0 = arith.constant 0 : i32
    %c0_i32_1 = arith.constant 0 : i32
    return %c0_i32, %c0_i32_0 : i32, i32
  }
  func.func @transform_3(%arg0: i32) -> (i32, i32) {
    %c0_i32 = arith.constant 0 : i32
    %c0_i32_0 = arith.constant 0 : i32
    return %arg0, %c0_i32 : i32, i32
  }
}

module attributes {stable_mosaic.version = 11 : i64} {
  func.func @_mm_kernel(%arg0: i32, %arg1: memref<128x144xbf16, #tpu.memory_space<vmem>>, %arg2: memref<144x16xbf16, #tpu.memory_space<vmem>>, %arg3: memref<1x16xf32, #tpu.memory_space<vmem>>, %arg4: memref<128x16xf32, #tpu.memory_space<vmem>>, %arg5: memref<128x16xf32, #tpu.memory_space<vmem>>) attributes {dimension_semantics = [#tpu.dimension_semantics<parallel>], iteration_bounds = array<i64: 1>, scalar_prefetch = 0 : i64, scratch_operands = 0 : i64, tpu.core_type = #tpu.core_type<tc>, window_params = [{transform_indices = @transform_0, window_bounds = array<i64: 128, 144>}, {pipeline_mode = #tpu.pipeline_mode<synchronous>, transform_indices = @transform_1, window_bounds = array<i64: 144, 16>}, {pipeline_mode = #tpu.pipeline_mode<synchronous>, transform_indices = @transform_2, window_bounds = array<i64: 1, 16>}, {transform_indices = @transform_3, window_bounds = array<i64: 128, 16>}, {transform_indices = @transform_4, window_bounds = array<i64: 128, 16>}]} {
    %c0 = arith.constant 0 : index
    %c0_0 = arith.constant 0 : index
    %0 = vector.load %arg1[%c0, %c0_0] : memref<128x144xbf16, #tpu.memory_space<vmem>>, vector<128x144xbf16>
    %cst = arith.constant 0.000000e+00 : bf16
    %1 = vector.broadcast %cst : bf16 to vector<128x144xbf16>
    %2 = arith.maximumf %0, %1 : vector<128x144xbf16>
    %c0_1 = arith.constant 0 : index
    %c0_2 = arith.constant 0 : index
    %3 = vector.load %arg2[%c0_1, %c0_2] : memref<144x16xbf16, #tpu.memory_space<vmem>>, vector<144x16xbf16>
    %cst_3 = arith.constant dense<0.000000e+00> : vector<128x16xf32>
    %4 = tpu.matmul %2, %3, %cst_3 {dimension_numbers = #tpu.dot_dimension_numbers<[1], [0], [0], [1], [0, 0, 1, 1], [], []>} : vector<128x144xbf16>, vector<144x16xbf16>, vector<128x16xf32> -> vector<128x16xf32>
    %c0_4 = arith.constant 0 : index
    %c0_5 = arith.constant 0 : index
    %5 = vector.load %arg3[%c0_4, %c0_5] : memref<1x16xf32, #tpu.memory_space<vmem>>, vector<1x16xf32>
    %6 = vector.broadcast %5 : vector<1x16xf32> to vector<128x16xf32>
    %7 = arith.addf %4, %6 : vector<128x16xf32>
    %c0_6 = arith.constant 0 : index
    %c0_7 = arith.constant 0 : index
    %8 = vector.load %arg4[%c0_6, %c0_7] : memref<128x16xf32, #tpu.memory_space<vmem>>, vector<128x16xf32>
    %9 = arith.addf %7, %8 : vector<128x16xf32>
    %c0_8 = arith.constant 0 : index
    %c0_9 = arith.constant 0 : index
    %10 = vector.load %arg5[%c0_8, %c0_9] : memref<128x16xf32, #tpu.memory_space<vmem>>, vector<128x16xf32>
    tpu.vector_store %arg5[%c0_8, %c0_9], %9 {strides = array<i32>} : memref<128x16xf32, #tpu.memory_space<vmem>>, vector<128x16xf32>,
    return
  }
  func.func @transform_0(%arg0: i32) -> (i32, i32) {
    %c0_i32 = arith.constant 0 : i32
    %c0_i32_0 = arith.constant 0 : i32
    return %arg0, %c0_i32 : i32, i32
  }
  func.func @transform_1(%arg0: i32) -> (i32, i32) {
    %c0_i32 = arith.constant 0 : i32
    %c0_i32_0 = arith.constant 0 : i32
    %c0_i32_1 = arith.constant 0 : i32
    return %c0_i32, %c0_i32_0 : i32, i32
  }
  func.func @transform_2(%arg0: i32) -> (i32, i32) {
    %c0_i32 = arith.constant 0 : i32
    %c0_i32_0 = arith.constant 0 : i32
    %c0_i32_1 = arith.constant 0 : i32
    return %c0_i32, %c0_i32_0 : i32, i32
  }
  func.func @transform_3(%arg0: i32) -> (i32, i32) {
    %c0_i32 = arith.constant 0 : i32
    %c0_i32_0 = arith.constant 0 : i32
    return %arg0, %c0_i32 : i32, i32
  }
  func.func @transform_4(%arg0: i32) -> (i32, i32) {
    %c0_i32 = arith.constant 0 : i32
    %c0_i32_0 = arith.constant 0 : i32
    return %arg0, %c0_i32 : i32, i32
  }
}

module attributes {stable_mosaic.version = 11 : i64} {
  func.func @_mm_kernel(%arg0: i32, %arg1: memref<128x144xbf16, #tpu.memory_space<vmem>>, %arg2: memref<144x32xbf16, #tpu.memory_space<vmem>>, %arg3: memref<1x32xf32, #tpu.memory_space<vmem>>, %arg4: memref<128x32xf32, #tpu.memory_space<vmem>>) attributes {dimension_semantics = [#tpu.dimension_semantics<parallel>], iteration_bounds = array<i64: 1>, scalar_prefetch = 0 : i64, scratch_operands = 0 : i64, tpu.core_type = #tpu.core_type<tc>, window_params = [{transform_indices = @transform_0, window_bounds = array<i64: 128, 144>}, {pipeline_mode = #tpu.pipeline_mode<synchronous>, transform_indices = @transform_1, window_bounds = array<i64: 144, 32>}, {pipeline_mode = #tpu.pipeline_mode<synchronous>, transform_indices = @transform_2, window_bounds = array<i64: 1, 32>}, {transform_indices = @transform_3, window_bounds = array<i64: 128, 32>}]} {
    %c0 = arith.constant 0 : index
    %c0_0 = arith.constant 0 : index
    %0 = vector.load %arg1[%c0, %c0_0] : memref<128x144xbf16, #tpu.memory_space<vmem>>, vector<128x144xbf16>
    %c0_1 = arith.constant 0 : index
    %c0_2 = arith.constant 0 : index
    %1 = vector.load %arg2[%c0_1, %c0_2] : memref<144x32xbf16, #tpu.memory_space<vmem>>, vector<144x32xbf16>
    %cst = arith.constant dense<0.000000e+00> : vector<128x32xf32>
    %2 = tpu.matmul %0, %1, %cst {dimension_numbers = #tpu.dot_dimension_numbers<[1], [0], [0], [1], [0, 0, 1, 1], [], []>} : vector<128x144xbf16>, vector<144x32xbf16>, vector<128x32xf32> -> vector<128x32xf32>
    %c0_3 = arith.constant 0 : index
    %c0_4 = arith.constant 0 : index
    %3 = vector.load %arg3[%c0_3, %c0_4] : memref<1x32xf32, #tpu.memory_space<vmem>>, vector<1x32xf32>
    %4 = vector.broadcast %3 : vector<1x32xf32> to vector<128x32xf32>
    %5 = arith.addf %2, %4 : vector<128x32xf32>
    %c0_5 = arith.constant 0 : index
    %c0_6 = arith.constant 0 : index
    %6 = vector.load %arg4[%c0_5, %c0_6] : memref<128x32xf32, #tpu.memory_space<vmem>>, vector<128x32xf32>
    tpu.vector_store %arg4[%c0_5, %c0_6], %5 {strides = array<i32>} : memref<128x32xf32, #tpu.memory_space<vmem>>, vector<128x32xf32>,
    return
  }
  func.func @transform_0(%arg0: i32) -> (i32, i32) {
    %c0_i32 = arith.constant 0 : i32
    %c0_i32_0 = arith.constant 0 : i32
    return %arg0, %c0_i32 : i32, i32
  }
  func.func @transform_1(%arg0: i32) -> (i32, i32) {
    %c0_i32 = arith.constant 0 : i32
    %c0_i32_0 = arith.constant 0 : i32
    %c0_i32_1 = arith.constant 0 : i32
    return %c0_i32, %c0_i32_0 : i32, i32
  }
  func.func @transform_2(%arg0: i32) -> (i32, i32) {
    %c0_i32 = arith.constant 0 : i32
    %c0_i32_0 = arith.constant 0 : i32
    %c0_i32_1 = arith.constant 0 : i32
    return %c0_i32, %c0_i32_0 : i32, i32
  }
  func.func @transform_3(%arg0: i32) -> (i32, i32) {
    %c0_i32 = arith.constant 0 : i32
    %c0_i32_0 = arith.constant 0 : i32
    return %arg0, %c0_i32 : i32, i32
  }
}

module attributes {stable_mosaic.version = 11 : i64} {
  func.func @_mm_kernel(%arg0: i32, %arg1: memref<32x288xbf16, #tpu.memory_space<vmem>>, %arg2: memref<288x32xbf16, #tpu.memory_space<vmem>>, %arg3: memref<1x32xf32, #tpu.memory_space<vmem>>, %arg4: memref<32x32xf32, #tpu.memory_space<vmem>>) attributes {dimension_semantics = [#tpu.dimension_semantics<parallel>], iteration_bounds = array<i64: 1>, scalar_prefetch = 0 : i64, scratch_operands = 0 : i64, tpu.core_type = #tpu.core_type<tc>, window_params = [{transform_indices = @transform_0, window_bounds = array<i64: 32, 288>}, {pipeline_mode = #tpu.pipeline_mode<synchronous>, transform_indices = @transform_1, window_bounds = array<i64: 288, 32>}, {pipeline_mode = #tpu.pipeline_mode<synchronous>, transform_indices = @transform_2, window_bounds = array<i64: 1, 32>}, {transform_indices = @transform_3, window_bounds = array<i64: 32, 32>}]} {
    %c0 = arith.constant 0 : index
    %c0_0 = arith.constant 0 : index
    %0 = vector.load %arg1[%c0, %c0_0] : memref<32x288xbf16, #tpu.memory_space<vmem>>, vector<32x288xbf16>
    %cst = arith.constant 0.000000e+00 : bf16
    %1 = vector.broadcast %cst : bf16 to vector<32x288xbf16>
    %2 = arith.maximumf %0, %1 : vector<32x288xbf16>
    %c0_1 = arith.constant 0 : index
    %c0_2 = arith.constant 0 : index
    %3 = vector.load %arg2[%c0_1, %c0_2] : memref<288x32xbf16, #tpu.memory_space<vmem>>, vector<288x32xbf16>
    %cst_3 = arith.constant dense<0.000000e+00> : vector<32x32xf32>
    %4 = tpu.matmul %2, %3, %cst_3 {dimension_numbers = #tpu.dot_dimension_numbers<[1], [0], [0], [1], [0, 0, 1, 1], [], []>} : vector<32x288xbf16>, vector<288x32xbf16>, vector<32x32xf32> -> vector<32x32xf32>
    %c0_4 = arith.constant 0 : index
    %c0_5 = arith.constant 0 : index
    %5 = vector.load %arg3[%c0_4, %c0_5] : memref<1x32xf32, #tpu.memory_space<vmem>>, vector<1x32xf32>
    %6 = vector.broadcast %5 : vector<1x32xf32> to vector<32x32xf32>
    %7 = arith.addf %4, %6 : vector<32x32xf32>
    %c0_6 = arith.constant 0 : index
    %c0_7 = arith.constant 0 : index
    %8 = vector.load %arg4[%c0_6, %c0_7] : memref<32x32xf32, #tpu.memory_space<vmem>>, vector<32x32xf32>
    tpu.vector_store %arg4[%c0_6, %c0_7], %7 {strides = array<i32>} : memref<32x32xf32, #tpu.memory_space<vmem>>, vector<32x32xf32>,
    return
  }
  func.func @transform_0(%arg0: i32) -> (i32, i32) {
    %c0_i32 = arith.constant 0 : i32
    %c0_i32_0 = arith.constant 0 : i32
    return %arg0, %c0_i32 : i32, i32
  }
  func.func @transform_1(%arg0: i32) -> (i32, i32) {
    %c0_i32 = arith.constant 0 : i32
    %c0_i32_0 = arith.constant 0 : i32
    %c0_i32_1 = arith.constant 0 : i32
    return %c0_i32, %c0_i32_0 : i32, i32
  }
  func.func @transform_2(%arg0: i32) -> (i32, i32) {
    %c0_i32 = arith.constant 0 : i32
    %c0_i32_0 = arith.constant 0 : i32
    %c0_i32_1 = arith.constant 0 : i32
    return %c0_i32, %c0_i32_0 : i32, i32
  }
  func.func @transform_3(%arg0: i32) -> (i32, i32) {
    %c0_i32 = arith.constant 0 : i32
    %c0_i32_0 = arith.constant 0 : i32
    return %arg0, %c0_i32 : i32, i32
  }
}

module attributes {stable_mosaic.version = 11 : i64} {
  func.func @_mm_kernel(%arg0: i32, %arg1: memref<32x288xbf16, #tpu.memory_space<vmem>>, %arg2: memref<288x32xbf16, #tpu.memory_space<vmem>>, %arg3: memref<1x32xf32, #tpu.memory_space<vmem>>, %arg4: memref<32x32xf32, #tpu.memory_space<vmem>>) attributes {dimension_semantics = [#tpu.dimension_semantics<parallel>], iteration_bounds = array<i64: 1>, scalar_prefetch = 0 : i64, scratch_operands = 0 : i64, tpu.core_type = #tpu.core_type<tc>, window_params = [{transform_indices = @transform_0, window_bounds = array<i64: 32, 288>}, {pipeline_mode = #tpu.pipeline_mode<synchronous>, transform_indices = @transform_1, window_bounds = array<i64: 288, 32>}, {pipeline_mode = #tpu.pipeline_mode<synchronous>, transform_indices = @transform_2, window_bounds = array<i64: 1, 32>}, {transform_indices = @transform_3, window_bounds = array<i64: 32, 32>}]} {
    %c0 = arith.constant 0 : index
    %c0_0 = arith.constant 0 : index
    %0 = vector.load %arg1[%c0, %c0_0] : memref<32x288xbf16, #tpu.memory_space<vmem>>, vector<32x288xbf16>
    %c0_1 = arith.constant 0 : index
    %c0_2 = arith.constant 0 : index
    %1 = vector.load %arg2[%c0_1, %c0_2] : memref<288x32xbf16, #tpu.memory_space<vmem>>, vector<288x32xbf16>
    %cst = arith.constant dense<0.000000e+00> : vector<32x32xf32>
    %2 = tpu.matmul %0, %1, %cst {dimension_numbers = #tpu.dot_dimension_numbers<[1], [0], [0], [1], [0, 0, 1, 1], [], []>} : vector<32x288xbf16>, vector<288x32xbf16>, vector<32x32xf32> -> vector<32x32xf32>
    %c0_3 = arith.constant 0 : index
    %c0_4 = arith.constant 0 : index
    %3 = vector.load %arg3[%c0_3, %c0_4] : memref<1x32xf32, #tpu.memory_space<vmem>>, vector<1x32xf32>
    %4 = vector.broadcast %3 : vector<1x32xf32> to vector<32x32xf32>
    %5 = arith.addf %2, %4 : vector<32x32xf32>
    %c0_5 = arith.constant 0 : index
    %c0_6 = arith.constant 0 : index
    %6 = vector.load %arg4[%c0_5, %c0_6] : memref<32x32xf32, #tpu.memory_space<vmem>>, vector<32x32xf32>
    tpu.vector_store %arg4[%c0_5, %c0_6], %5 {strides = array<i32>} : memref<32x32xf32, #tpu.memory_space<vmem>>, vector<32x32xf32>,
    return
  }
  func.func @transform_0(%arg0: i32) -> (i32, i32) {
    %c0_i32 = arith.constant 0 : i32
    %c0_i32_0 = arith.constant 0 : i32
    return %arg0, %c0_i32 : i32, i32
  }
  func.func @transform_1(%arg0: i32) -> (i32, i32) {
    %c0_i32 = arith.constant 0 : i32
    %c0_i32_0 = arith.constant 0 : i32
    %c0_i32_1 = arith.constant 0 : i32
    return %c0_i32, %c0_i32_0 : i32, i32
  }
  func.func @transform_2(%arg0: i32) -> (i32, i32) {
    %c0_i32 = arith.constant 0 : i32
    %c0_i32_0 = arith.constant 0 : i32
    %c0_i32_1 = arith.constant 0 : i32
    return %c0_i32, %c0_i32_0 : i32, i32
  }
  func.func @transform_3(%arg0: i32) -> (i32, i32) {
    %c0_i32 = arith.constant 0 : i32
    %c0_i32_0 = arith.constant 0 : i32
    return %arg0, %c0_i32 : i32, i32
  }
}

module attributes {stable_mosaic.version = 11 : i64} {
  func.func @_mm_kernel(%arg0: i32, %arg1: memref<32x288xbf16, #tpu.memory_space<vmem>>, %arg2: memref<288x32xbf16, #tpu.memory_space<vmem>>, %arg3: memref<1x32xf32, #tpu.memory_space<vmem>>, %arg4: memref<32x32xf32, #tpu.memory_space<vmem>>, %arg5: memref<32x32xf32, #tpu.memory_space<vmem>>) attributes {dimension_semantics = [#tpu.dimension_semantics<parallel>], iteration_bounds = array<i64: 1>, scalar_prefetch = 0 : i64, scratch_operands = 0 : i64, tpu.core_type = #tpu.core_type<tc>, window_params = [{transform_indices = @transform_0, window_bounds = array<i64: 32, 288>}, {pipeline_mode = #tpu.pipeline_mode<synchronous>, transform_indices = @transform_1, window_bounds = array<i64: 288, 32>}, {pipeline_mode = #tpu.pipeline_mode<synchronous>, transform_indices = @transform_2, window_bounds = array<i64: 1, 32>}, {transform_indices = @transform_3, window_bounds = array<i64: 32, 32>}, {transform_indices = @transform_4, window_bounds = array<i64: 32, 32>}]} {
    %c0 = arith.constant 0 : index
    %c0_0 = arith.constant 0 : index
    %0 = vector.load %arg1[%c0, %c0_0] : memref<32x288xbf16, #tpu.memory_space<vmem>>, vector<32x288xbf16>
    %cst = arith.constant 0.000000e+00 : bf16
    %1 = vector.broadcast %cst : bf16 to vector<32x288xbf16>
    %2 = arith.maximumf %0, %1 : vector<32x288xbf16>
    %c0_1 = arith.constant 0 : index
    %c0_2 = arith.constant 0 : index
    %3 = vector.load %arg2[%c0_1, %c0_2] : memref<288x32xbf16, #tpu.memory_space<vmem>>, vector<288x32xbf16>
    %cst_3 = arith.constant dense<0.000000e+00> : vector<32x32xf32>
    %4 = tpu.matmul %2, %3, %cst_3 {dimension_numbers = #tpu.dot_dimension_numbers<[1], [0], [0], [1], [0, 0, 1, 1], [], []>} : vector<32x288xbf16>, vector<288x32xbf16>, vector<32x32xf32> -> vector<32x32xf32>
    %c0_4 = arith.constant 0 : index
    %c0_5 = arith.constant 0 : index
    %5 = vector.load %arg3[%c0_4, %c0_5] : memref<1x32xf32, #tpu.memory_space<vmem>>, vector<1x32xf32>
    %6 = vector.broadcast %5 : vector<1x32xf32> to vector<32x32xf32>
    %7 = arith.addf %4, %6 : vector<32x32xf32>
    %c0_6 = arith.constant 0 : index
    %c0_7 = arith.constant 0 : index
    %8 = vector.load %arg4[%c0_6, %c0_7] : memref<32x32xf32, #tpu.memory_space<vmem>>, vector<32x32xf32>
    %9 = arith.addf %7, %8 : vector<32x32xf32>
    %c0_8 = arith.constant 0 : index
    %c0_9 = arith.constant 0 : index
    %10 = vector.load %arg5[%c0_8, %c0_9] : memref<32x32xf32, #tpu.memory_space<vmem>>, vector<32x32xf32>
    tpu.vector_store %arg5[%c0_8, %c0_9], %9 {strides = array<i32>} : memref<32x32xf32, #tpu.memory_space<vmem>>, vector<32x32xf32>,
    return
  }
  func.func @transform_0(%arg0: i32) -> (i32, i32) {
    %c0_i32 = arith.constant 0 : i32
    %c0_i32_0 = arith.constant 0 : i32
    return %arg0, %c0_i32 : i32, i32
  }
  func.func @transform_1(%arg0: i32) -> (i32, i32) {
    %c0_i32 = arith.constant 0 : i32
    %c0_i32_0 = arith.constant 0 : i32
    %c0_i32_1 = arith.constant 0 : i32
    return %c0_i32, %c0_i32_0 : i32, i32
  }
  func.func @transform_2(%arg0: i32) -> (i32, i32) {
    %c0_i32 = arith.constant 0 : i32
    %c0_i32_0 = arith.constant 0 : i32
    %c0_i32_1 = arith.constant 0 : i32
    return %c0_i32, %c0_i32_0 : i32, i32
  }
  func.func @transform_3(%arg0: i32) -> (i32, i32) {
    %c0_i32 = arith.constant 0 : i32
    %c0_i32_0 = arith.constant 0 : i32
    return %arg0, %c0_i32 : i32, i32
  }
  func.func @transform_4(%arg0: i32) -> (i32, i32) {
    %c0_i32 = arith.constant 0 : i32
    %c0_i32_0 = arith.constant 0 : i32
    return %arg0, %c0_i32 : i32, i32
  }
}

module attributes {stable_mosaic.version = 11 : i64} {
  func.func @_mm_kernel(%arg0: i32, %arg1: memref<8x288xbf16, #tpu.memory_space<vmem>>, %arg2: memref<288x32xbf16, #tpu.memory_space<vmem>>, %arg3: memref<1x32xf32, #tpu.memory_space<vmem>>, %arg4: memref<8x32xf32, #tpu.memory_space<vmem>>) attributes {dimension_semantics = [#tpu.dimension_semantics<parallel>], iteration_bounds = array<i64: 1>, scalar_prefetch = 0 : i64, scratch_operands = 0 : i64, tpu.core_type = #tpu.core_type<tc>, window_params = [{transform_indices = @transform_0, window_bounds = array<i64: 8, 288>}, {pipeline_mode = #tpu.pipeline_mode<synchronous>, transform_indices = @transform_1, window_bounds = array<i64: 288, 32>}, {pipeline_mode = #tpu.pipeline_mode<synchronous>, transform_indices = @transform_2, window_bounds = array<i64: 1, 32>}, {transform_indices = @transform_3, window_bounds = array<i64: 8, 32>}]} {
    %c0 = arith.constant 0 : index
    %c0_0 = arith.constant 0 : index
    %0 = vector.load %arg1[%c0, %c0_0] : memref<8x288xbf16, #tpu.memory_space<vmem>>, vector<8x288xbf16>
    %cst = arith.constant 0.000000e+00 : bf16
    %1 = vector.broadcast %cst : bf16 to vector<8x288xbf16>
    %2 = arith.maximumf %0, %1 : vector<8x288xbf16>
    %c0_1 = arith.constant 0 : index
    %c0_2 = arith.constant 0 : index
    %3 = vector.load %arg2[%c0_1, %c0_2] : memref<288x32xbf16, #tpu.memory_space<vmem>>, vector<288x32xbf16>
    %cst_3 = arith.constant dense<0.000000e+00> : vector<8x32xf32>
    %4 = tpu.matmul %2, %3, %cst_3 {dimension_numbers = #tpu.dot_dimension_numbers<[1], [0], [0], [1], [0, 0, 1, 1], [], []>} : vector<8x288xbf16>, vector<288x32xbf16>, vector<8x32xf32> -> vector<8x32xf32>
    %c0_4 = arith.constant 0 : index
    %c0_5 = arith.constant 0 : index
    %5 = vector.load %arg3[%c0_4, %c0_5] : memref<1x32xf32, #tpu.memory_space<vmem>>, vector<1x32xf32>
    %6 = vector.broadcast %5 : vector<1x32xf32> to vector<8x32xf32>
    %7 = arith.addf %4, %6 : vector<8x32xf32>
    %c0_6 = arith.constant 0 : index
    %c0_7 = arith.constant 0 : index
    %8 = vector.load %arg4[%c0_6, %c0_7] : memref<8x32xf32, #tpu.memory_space<vmem>>, vector<8x32xf32>
    tpu.vector_store %arg4[%c0_6, %c0_7], %7 {strides = array<i32>} : memref<8x32xf32, #tpu.memory_space<vmem>>, vector<8x32xf32>,
    return
  }
  func.func @transform_0(%arg0: i32) -> (i32, i32) {
    %c0_i32 = arith.constant 0 : i32
    %c0_i32_0 = arith.constant 0 : i32
    return %arg0, %c0_i32 : i32, i32
  }
  func.func @transform_1(%arg0: i32) -> (i32, i32) {
    %c0_i32 = arith.constant 0 : i32
    %c0_i32_0 = arith.constant 0 : i32
    %c0_i32_1 = arith.constant 0 : i32
    return %c0_i32, %c0_i32_0 : i32, i32
  }
  func.func @transform_2(%arg0: i32) -> (i32, i32) {
    %c0_i32 = arith.constant 0 : i32
    %c0_i32_0 = arith.constant 0 : i32
    %c0_i32_1 = arith.constant 0 : i32
    return %c0_i32, %c0_i32_0 : i32, i32
  }
  func.func @transform_3(%arg0: i32) -> (i32, i32) {
    %c0_i32 = arith.constant 0 : i32
    %c0_i32_0 = arith.constant 0 : i32
    return %arg0, %c0_i32 : i32, i32
  }
}

module attributes {stable_mosaic.version = 11 : i64} {
  func.func @_mm_kernel(%arg0: i32, %arg1: memref<8x288xbf16, #tpu.memory_space<vmem>>, %arg2: memref<288x32xbf16, #tpu.memory_space<vmem>>, %arg3: memref<1x32xf32, #tpu.memory_space<vmem>>, %arg4: memref<8x32xf32, #tpu.memory_space<vmem>>, %arg5: memref<8x32xf32, #tpu.memory_space<vmem>>) attributes {dimension_semantics = [#tpu.dimension_semantics<parallel>], iteration_bounds = array<i64: 1>, scalar_prefetch = 0 : i64, scratch_operands = 0 : i64, tpu.core_type = #tpu.core_type<tc>, window_params = [{transform_indices = @transform_0, window_bounds = array<i64: 8, 288>}, {pipeline_mode = #tpu.pipeline_mode<synchronous>, transform_indices = @transform_1, window_bounds = array<i64: 288, 32>}, {pipeline_mode = #tpu.pipeline_mode<synchronous>, transform_indices = @transform_2, window_bounds = array<i64: 1, 32>}, {transform_indices = @transform_3, window_bounds = array<i64: 8, 32>}, {transform_indices = @transform_4, window_bounds = array<i64: 8, 32>}]} {
    %c0 = arith.constant 0 : index
    %c0_0 = arith.constant 0 : index
    %0 = vector.load %arg1[%c0, %c0_0] : memref<8x288xbf16, #tpu.memory_space<vmem>>, vector<8x288xbf16>
    %cst = arith.constant 0.000000e+00 : bf16
    %1 = vector.broadcast %cst : bf16 to vector<8x288xbf16>
    %2 = arith.maximumf %0, %1 : vector<8x288xbf16>
    %c0_1 = arith.constant 0 : index
    %c0_2 = arith.constant 0 : index
    %3 = vector.load %arg2[%c0_1, %c0_2] : memref<288x32xbf16, #tpu.memory_space<vmem>>, vector<288x32xbf16>
    %cst_3 = arith.constant dense<0.000000e+00> : vector<8x32xf32>
    %4 = tpu.matmul %2, %3, %cst_3 {dimension_numbers = #tpu.dot_dimension_numbers<[1], [0], [0], [1], [0, 0, 1, 1], [], []>} : vector<8x288xbf16>, vector<288x32xbf16>, vector<8x32xf32> -> vector<8x32xf32>
    %c0_4 = arith.constant 0 : index
    %c0_5 = arith.constant 0 : index
    %5 = vector.load %arg3[%c0_4, %c0_5] : memref<1x32xf32, #tpu.memory_space<vmem>>, vector<1x32xf32>
    %6 = vector.broadcast %5 : vector<1x32xf32> to vector<8x32xf32>
    %7 = arith.addf %4, %6 : vector<8x32xf32>
    %c0_6 = arith.constant 0 : index
    %c0_7 = arith.constant 0 : index
    %8 = vector.load %arg4[%c0_6, %c0_7] : memref<8x32xf32, #tpu.memory_space<vmem>>, vector<8x32xf32>
    %9 = arith.addf %7, %8 : vector<8x32xf32>
    %c0_8 = arith.constant 0 : index
    %c0_9 = arith.constant 0 : index
    %10 = vector.load %arg5[%c0_8, %c0_9] : memref<8x32xf32, #tpu.memory_space<vmem>>, vector<8x32xf32>
    tpu.vector_store %arg5[%c0_8, %c0_9], %9 {strides = array<i32>} : memref<8x32xf32, #tpu.memory_space<vmem>>, vector<8x32xf32>,
    return
  }
  func.func @transform_0(%arg0: i32) -> (i32, i32) {
    %c0_i32 = arith.constant 0 : i32
    %c0_i32_0 = arith.constant 0 : i32
    return %arg0, %c0_i32 : i32, i32
  }
  func.func @transform_1(%arg0: i32) -> (i32, i32) {
    %c0_i32 = arith.constant 0 : i32
    %c0_i32_0 = arith.constant 0 : i32
    %c0_i32_1 = arith.constant 0 : i32
    return %c0_i32, %c0_i32_0 : i32, i32
  }
  func.func @transform_2(%arg0: i32) -> (i32, i32) {
    %c0_i32 = arith.constant 0 : i32
    %c0_i32_0 = arith.constant 0 : i32
    %c0_i32_1 = arith.constant 0 : i32
    return %c0_i32, %c0_i32_0 : i32, i32
  }
  func.func @transform_3(%arg0: i32) -> (i32, i32) {
    %c0_i32 = arith.constant 0 : i32
    %c0_i32_0 = arith.constant 0 : i32
    return %arg0, %c0_i32 : i32, i32
  }
  func.func @transform_4(%arg0: i32) -> (i32, i32) {
    %c0_i32 = arith.constant 0 : i32
    %c0_i32_0 = arith.constant 0 : i32
    return %arg0, %c0_i32 : i32, i32
  }
}

module attributes {stable_mosaic.version = 11 : i64} {
  func.func @_head_kernel(%arg0: i32, %arg1: memref<2x128xf32, #tpu.memory_space<vmem>>, %arg2: memref<2x128xf32, #tpu.memory_space<vmem>>, %arg3: memref<128x256xbf16, #tpu.memory_space<vmem>>, %arg4: memref<1x256xf32, #tpu.memory_space<vmem>>, %arg5: memref<128x256xbf16, #tpu.memory_space<vmem>>, %arg6: memref<1x256xf32, #tpu.memory_space<vmem>>, %arg7: memref<256x6xbf16, #tpu.memory_space<vmem>>, %arg8: memref<1x6xf32, #tpu.memory_space<vmem>>, %arg9: memref<256x1xbf16, #tpu.memory_space<vmem>>, %arg10: memref<1x1xf32, #tpu.memory_space<vmem>>, %arg11: memref<2x6xf32, #tpu.memory_space<vmem>>, %arg12: memref<2x128xf32, #tpu.memory_space<vmem>>) attributes {dimension_semantics = [#tpu.dimension_semantics<arbitrary>], iteration_bounds = array<i64: 1>, scalar_prefetch = 0 : i64, scratch_operands = 0 : i64, tpu.core_type = #tpu.core_type<tc>, window_params = [{pipeline_mode = #tpu.pipeline_mode<synchronous>, transform_indices = @transform_0, window_bounds = array<i64: 2, 128>}, {pipeline_mode = #tpu.pipeline_mode<synchronous>, transform_indices = @transform_1, window_bounds = array<i64: 2, 128>}, {pipeline_mode = #tpu.pipeline_mode<synchronous>, transform_indices = @transform_2, window_bounds = array<i64: 128, 256>}, {pipeline_mode = #tpu.pipeline_mode<synchronous>, transform_indices = @transform_3, window_bounds = array<i64: 1, 256>}, {pipeline_mode = #tpu.pipeline_mode<synchronous>, transform_indices = @transform_4, window_bounds = array<i64: 128, 256>}, {pipeline_mode = #tpu.pipeline_mode<synchronous>, transform_indices = @transform_5, window_bounds = array<i64: 1, 256>}, {pipeline_mode = #tpu.pipeline_mode<synchronous>, transform_indices = @transform_6, window_bounds = array<i64: 256, 6>}, {pipeline_mode = #tpu.pipeline_mode<synchronous>, transform_indices = @transform_7, window_bounds = array<i64: 1, 6>}, {pipeline_mode = #tpu.pipeline_mode<synchronous>, transform_indices = @transform_8, window_bounds = array<i64: 256, 1>}, {pipeline_mode = #tpu.pipeline_mode<synchronous>, transform_indices = @transform_9, window_bounds = array<i64: 1, 1>}, {pipeline_mode = #tpu.pipeline_mode<synchronous>, transform_indices = @transform_10, window_bounds = array<i64: 2, 6>}, {pipeline_mode = #tpu.pipeline_mode<synchronous>, transform_indices = @transform_11, window_bounds = array<i64: 2, 128>}]} {
    %c0 = arith.constant 0 : index
    %c0_0 = arith.constant 0 : index
    %0 = vector.load %arg1[%c0, %c0_0] : memref<2x128xf32, #tpu.memory_space<vmem>>, vector<2x128xf32>
    %cst = arith.constant 0.000000e+00 : f32
    %1 = vector.broadcast %cst : f32 to vector<2x128xf32>
    %2 = arith.maximumf %0, %1 : vector<2x128xf32>
    %3 = arith.truncf %2 : vector<2x128xf32> to vector<2x128xbf16>
    %c0_1 = arith.constant 0 : index
    %c0_2 = arith.constant 0 : index
    %4 = vector.load %arg2[%c0_1, %c0_2] : memref<2x128xf32, #tpu.memory_space<vmem>>, vector<2x128xf32>
    %cst_3 = arith.constant 0.000000e+00 : f32
    %5 = vector.broadcast %cst_3 : f32 to vector<2x128xf32>
    %6 = arith.maximumf %4, %5 : vector<2x128xf32>
    %7 = arith.truncf %6 : vector<2x128xf32> to vector<2x128xbf16>
    %c0_4 = arith.constant 0 : index
    %c0_5 = arith.constant 0 : index
    %8 = vector.load %arg3[%c0_4, %c0_5] : memref<128x256xbf16, #tpu.memory_space<vmem>>, vector<128x256xbf16>
    %cst_6 = arith.constant dense<0.000000e+00> : vector<2x256xf32>
    %9 = tpu.matmul %3, %8, %cst_6 {dimension_numbers = #tpu.dot_dimension_numbers<[1], [0], [0], [1], [0, 0, 1, 1], [], []>} : vector<2x128xbf16>, vector<128x256xbf16>, vector<2x256xf32> -> vector<2x256xf32>
    %c0_7 = arith.constant 0 : index
    %c0_8 = arith.constant 0 : index
    %10 = vector.load %arg4[%c0_7, %c0_8] : memref<1x256xf32, #tpu.memory_space<vmem>>, vector<1x256xf32>
    %11 = vector.broadcast %10 : vector<1x256xf32> to vector<2x256xf32>
    %12 = arith.addf %9, %11 : vector<2x256xf32>
    %cst_9 = arith.constant 0.000000e+00 : f32
    %13 = vector.broadcast %cst_9 : f32 to vector<2x256xf32>
    %14 = arith.maximumf %12, %13 : vector<2x256xf32>
    %c0_10 = arith.constant 0 : index
    %c0_11 = arith.constant 0 : index
    %15 = vector.load %arg5[%c0_10, %c0_11] : memref<128x256xbf16, #tpu.memory_space<vmem>>, vector<128x256xbf16>
    %cst_12 = arith.constant dense<0.000000e+00> : vector<2x256xf32>
    %16 = tpu.matmul %7, %15, %cst_12 {dimension_numbers = #tpu.dot_dimension_numbers<[1], [0], [0], [1], [0, 0, 1, 1], [], []>} : vector<2x128xbf16>, vector<128x256xbf16>, vector<2x256xf32> -> vector<2x256xf32>
    %c0_13 = arith.constant 0 : index
    %c0_14 = arith.constant 0 : index
    %17 = vector.load %arg6[%c0_13, %c0_14] : memref<1x256xf32, #tpu.memory_space<vmem>>, vector<1x256xf32>
    %18 = vector.broadcast %17 : vector<1x256xf32> to vector<2x256xf32>
    %19 = arith.addf %16, %18 : vector<2x256xf32>
    %cst_15 = arith.constant 0.000000e+00 : f32
    %20 = vector.broadcast %cst_15 : f32 to vector<2x256xf32>
    %21 = arith.maximumf %19, %20 : vector<2x256xf32>
    %22 = arith.truncf %14 : vector<2x256xf32> to vector<2x256xbf16>
    %c0_16 = arith.constant 0 : index
    %c0_17 = arith.constant 0 : index
    %23 = vector.load %arg7[%c0_16, %c0_17] : memref<256x6xbf16, #tpu.memory_space<vmem>>, vector<256x6xbf16>
    %cst_18 = arith.constant dense<0.000000e+00> : vector<2x6xf32>
    %24 = tpu.matmul %22, %23, %cst_18 {dimension_numbers = #tpu.dot_dimension_numbers<[1], [0], [0], [1], [0, 0, 1, 1], [], []>} : vector<2x256xbf16>, vector<256x6xbf16>, vector<2x6xf32> -> vector<2x6xf32>
    %c0_19 = arith.constant 0 : index
    %c0_20 = arith.constant 0 : index
    %25 = vector.load %arg8[%c0_19, %c0_20] : memref<1x6xf32, #tpu.memory_space<vmem>>, vector<1x6xf32>
    %26 = vector.broadcast %25 : vector<1x6xf32> to vector<2x6xf32>
    %27 = arith.addf %24, %26 : vector<2x6xf32>
    %28 = arith.truncf %21 : vector<2x256xf32> to vector<2x256xbf16>
    %c0_21 = arith.constant 0 : index
    %c0_22 = arith.constant 0 : index
    %29 = vector.load %arg9[%c0_21, %c0_22] : memref<256x1xbf16, #tpu.memory_space<vmem>>, vector<256x1xbf16>
    %cst_23 = arith.constant dense<0.000000e+00> : vector<2x1xf32>
    %30 = tpu.matmul %28, %29, %cst_23 {dimension_numbers = #tpu.dot_dimension_numbers<[1], [0], [0], [1], [0, 0, 1, 1], [], []>} : vector<2x256xbf16>, vector<256x1xbf16>, vector<2x1xf32> -> vector<2x1xf32>
    %c0_24 = arith.constant 0 : index
    %c0_25 = arith.constant 0 : index
    %31 = vector.load %arg10[%c0_24, %c0_25] : memref<1x1xf32, #tpu.memory_space<vmem>>, vector<1x1xf32>
    %32 = vector.broadcast %31 : vector<1x1xf32> to vector<2x1xf32>
    %33 = arith.addf %30, %32 : vector<2x1xf32>
    %cst_26 = arith.constant dense<0xFF800000> : vector<2xf32>
    %34 = vector.multi_reduction <maximumf>, %27, %cst_26 [1] : vector<2x6xf32> to vector<2xf32>
    %35 = vector.shape_cast %34 : vector<2xf32> to vector<2x1xf32>
    %36 = vector.broadcast %35 : vector<2x1xf32> to vector<2x6xf32>
    %37 = arith.subf %27, %36 : vector<2x6xf32>
    %38 = math.exp %37 : vector<2x6xf32>
    %cst_27 = arith.constant dense<0.000000e+00> : vector<2xf32>
    %39 = vector.multi_reduction <add>, %38, %cst_27 [1] : vector<2x6xf32> to vector<2xf32>
    %40 = vector.shape_cast %39 : vector<2xf32> to vector<2x1xf32>
    %41 = math.log %40 : vector<2x1xf32>
    %42 = vector.broadcast %41 : vector<2x1xf32> to vector<2x6xf32>
    %43 = arith.subf %37, %42 : vector<2x6xf32>
    %44 = tpu.reciprocal %40 {approx = true} : vector<2x1xf32> -> vector<2x1xf32>
    %45 = vector.broadcast %44 : vector<2x1xf32> to vector<2x6xf32>
    %46 = arith.mulf %38, %45 : vector<2x6xf32>
    %47 = arith.mulf %46, %43 : vector<2x6xf32>
    %cst_28 = arith.constant dense<0.000000e+00> : vector<2xf32>
    %48 = vector.multi_reduction <add>, %47, %cst_28 [1] : vector<2x6xf32> to vector<2xf32>
    %49 = vector.shape_cast %48 : vector<2xf32> to vector<2x1xf32>
    %cst_29 = arith.constant 0.000000e+00 : f32
    %50 = vector.broadcast %cst_29 : f32 to vector<2x1xf32>
    %51 = arith.subf %50, %49 : vector<2x1xf32>
    %c0_30 = arith.constant 0 : index
    %c0_31 = arith.constant 0 : index
    %52 = vector.load %arg11[%c0_30, %c0_31] : memref<2x6xf32, #tpu.memory_space<vmem>>, vector<2x6xf32>
    %53 = arith.addf %27, %52 : vector<2x6xf32>
    %cst_32 = arith.constant dense<0xFF800000> : vector<2xf32>
    %54 = vector.multi_reduction <maximumf>, %53, %cst_32 [1] : vector<2x6xf32> to vector<2xf32>
    %55 = vector.shape_cast %54 : vector<2xf32> to vector<2x1xf32>
    %56 = tpu.iota {dimensions = array<i32: 1>} : vector<2x6xi32>
    %57 = vector.broadcast %55 : vector<2x1xf32> to vector<2x6xf32>
    %58 = arith.cmpf oge, %53, %57 : vector<2x6xf32>
    %c6_i32 = arith.constant 6 : i32
    %59 = vector.broadcast %c6_i32 : i32 to vector<2x6xi32>
    %60 = arith.select %58, %56, %59 : vector<2x6xi1>, vector<2x6xi32>
    %cst_33 = arith.constant dense<2147483647> : vector<2xi32>
    %61 = vector.multi_reduction <minsi>, %60, %cst_33 [1] : vector<2x6xi32> to vector<2xi32>
    %62 = vector.shape_cast %61 : vector<2xi32> to vector<2x1xi32>
    %63 = vector.broadcast %62 : vector<2x1xi32> to vector<2x6xi32>
    %64 = arith.cmpi eq, %56, %63 : vector<2x6xi32>
    %65 = arith.extui %64 : vector<2x6xi1> to vector<2x6xi32>
    %66 = arith.sitofp %65 : vector<2x6xi32> to vector<2x6xf32>
    %67 = arith.mulf %66, %43 : vector<2x6xf32>
    %cst_34 = arith.constant dense<0.000000e+00> : vector<2xf32>
    %68 = vector.multi_reduction <add>, %67, %cst_34 [1] : vector<2x6xf32> to vector<2xf32>
    %69 = vector.shape_cast %68 : vector<2xf32> to vector<2x1xf32>
    %70 = tpu.iota {dimensions = array<i32: 1>} : vector<2x128xi32>
    %c0_i32 = arith.constant 0 : i32
    %71 = vector.broadcast %c0_i32 : i32 to vector<2x128xi32>
    %72 = arith.cmpi eq, %70, %71 : vector<2x128xi32>
    %73 = arith.sitofp %62 : vector<2x1xi32> to vector<2x1xf32>
    %c1_i32 = arith.constant 1 : i32
    %74 = vector.broadcast %c1_i32 : i32 to vector<2x128xi32>
    %75 = arith.cmpi eq, %70, %74 : vector<2x128xi32>
    %c2_i32 = arith.constant 2 : i32
    %76 = vector.broadcast %c2_i32 : i32 to vector<2x128xi32>
    %77 = arith.cmpi eq, %70, %76 : vector<2x128xi32>
    %c3_i32 = arith.constant 3 : i32
    %78 = vector.broadcast %c3_i32 : i32 to vector<2x128xi32>
    %79 = arith.cmpi eq, %70, %78 : vector<2x128xi32>
    %cst_35 = arith.constant 0.000000e+00 : f32
    %80 = vector.shape_cast %51 : vector<2x1xf32> to vector<2x1xf32>
    %81 = vector.broadcast %80 : vector<2x1xf32> to vector<2x128xf32>
    %82 = vector.broadcast %cst_35 : f32 to vector<2x128xf32>
    %83 = arith.select %79, %81, %82 : vector<2x128xi1>, vector<2x128xf32>
    %84 = vector.shape_cast %33 : vector<2x1xf32> to vector<2x1xf32>
    %85 = vector.broadcast %84 : vector<2x1xf32> to vector<2x128xf32>
    %86 = arith.select %77, %85, %83 : vector<2x128xi1>, vector<2x128xf32>
    %87 = vector.shape_cast %69 : vector<2x1xf32> to vector<2x1xf32>
    %88 = vector.broadcast %87 : vector<2x1xf32> to vector<2x128xf32>
    %89 = arith.select %75, %88, %86 : vector<2x128xi1>, vector<2x128xf32>
    %90 = vector.shape_cast %73 : vector<2x1xf32> to vector<2x1xf32>
    %91 = vector.broadcast %90 : vector<2x1xf32> to vector<2x128xf32>
    %92 = arith.select %72, %91, %89 : vector<2x128xi1>, vector<2x128xf32>
    %c0_36 = arith.constant 0 : index
    %c0_37 = arith.constant 0 : index
    %93 = vector.load %arg12[%c0_36, %c0_37] : memref<2x128xf32, #tpu.memory_space<vmem>>, vector<2x128xf32>
    tpu.vector_store %arg12[%c0_36, %c0_37], %92 {strides = array<i32>} : memref<2x128xf32, #tpu.memory_space<vmem>>, vector<2x128xf32>,
    return
  }
  func.func @transform_0(%arg0: i32) -> (i32, i32) {
    %c0_i32 = arith.constant 0 : i32
    %c0_i32_0 = arith.constant 0 : i32
    %c0_i32_1 = arith.constant 0 : i32
    return %c0_i32, %c0_i32_0 : i32, i32
  }
  func.func @transform_1(%arg0: i32) -> (i32, i32) {
    %c0_i32 = arith.constant 0 : i32
    %c0_i32_0 = arith.constant 0 : i32
    %c0_i32_1 = arith.constant 0 : i32
    return %c0_i32, %c0_i32_0 : i32, i32
  }
  func.func @transform_2(%arg0: i32) -> (i32, i32) {
    %c0_i32 = arith.constant 0 : i32
    %c0_i32_0 = arith.constant 0 : i32
    %c0_i32_1 = arith.constant 0 : i32
    return %c0_i32, %c0_i32_0 : i32, i32
  }
  func.func @transform_3(%arg0: i32) -> (i32, i32) {
    %c0_i32 = arith.constant 0 : i32
    %c0_i32_0 = arith.constant 0 : i32
    %c0_i32_1 = arith.constant 0 : i32
    return %c0_i32, %c0_i32_0 : i32, i32
  }
  func.func @transform_4(%arg0: i32) -> (i32, i32) {
    %c0_i32 = arith.constant 0 : i32
    %c0_i32_0 = arith.constant 0 : i32
    %c0_i32_1 = arith.constant 0 : i32
    return %c0_i32, %c0_i32_0 : i32, i32
  }
  func.func @transform_5(%arg0: i32) -> (i32, i32) {
    %c0_i32 = arith.constant 0 : i32
    %c0_i32_0 = arith.constant 0 : i32
    %c0_i32_1 = arith.constant 0 : i32
    return %c0_i32, %c0_i32_0 : i32, i32
  }
  func.func @transform_6(%arg0: i32) -> (i32, i32) {
    %c0_i32 = arith.constant 0 : i32
    %c0_i32_0 = arith.constant 0 : i32
    %c0_i32_1 = arith.constant 0 : i32
    return %c0_i32, %c0_i32_0 : i32, i32
  }
  func.func @transform_7(%arg0: i32) -> (i32, i32) {
    %c0_i32 = arith.constant 0 : i32
    %c0_i32_0 = arith.constant 0 : i32
    %c0_i32_1 = arith.constant 0 : i32
    return %c0_i32, %c0_i32_0 : i32, i32
  }
  func.func @transform_8(%arg0: i32) -> (i32, i32) {
    %c0_i32 = arith.constant 0 : i32
    %c0_i32_0 = arith.constant 0 : i32
    %c0_i32_1 = arith.constant 0 : i32
    return %c0_i32, %c0_i32_0 : i32, i32
  }
  func.func @transform_9(%arg0: i32) -> (i32, i32) {
    %c0_i32 = arith.constant 0 : i32
    %c0_i32_0 = arith.constant 0 : i32
    %c0_i32_1 = arith.constant 0 : i32
    return %c0_i32, %c0_i32_0 : i32, i32
  }
  func.func @transform_10(%arg0: i32) -> (i32, i32) {
    %c0_i32 = arith.constant 0 : i32
    %c0_i32_0 = arith.constant 0 : i32
    %c0_i32_1 = arith.constant 0 : i32
    return %c0_i32, %c0_i32_0 : i32, i32
  }
  func.func @transform_11(%arg0: i32) -> (i32, i32) {
    %c0_i32 = arith.constant 0 : i32
    %c0_i32_0 = arith.constant 0 : i32
    %c0_i32_1 = arith.constant 0 : i32
    return %c0_i32, %c0_i32_0 : i32, i32
  }
}

</mosaic_0001>

<bundles_post_ra>
// kernel: separate_impala_cnn_forward.46
= control target key start
LH: loop header
LB: loop body
LE: loop exit
PB: predicated region body
PF: predicated region fallthrough
CT: control target
= control target key end

     0   :  { %s784_s12 = smov 0   ;;  %s951_s0 = inlined_call_operand.vmem [shape: bf16[512,36], index: 0, kind: input, shape index: {}]   ;;  %s952_s1 = inlined_call_operand.vmem [shape: bf16[36,16], index: 1, kind: input, shape index: {}]   ;;  %s953_s2 = inlined_call_operand.vmem [shape: f32[1,16], index: 2, kind: input, shape index: {}]   ;;  %s954_s3 = inlined_call_operand.vmem [shape: f32[512,16], index: 3, kind: output, shape index: {}]  }
   0x1 LB: > { %s617_s13 = sadd.s32 4294967295, %s762_s12   ;;  %p621_p0 = scmp.ge.s32.totalorder %s762_s12, 1  ;;  %s762_s12 = sphi %s784_s12, %s13_s12  }
   0x2   : > { %p138_p1 = scmp.lt.s32.totalorder %s762_s12, 3 }
   0x4   : > { %p139_p2 = pnand %p621_p0, %p138_p1 }
   0x5   : > { %s622_s18 = sshll.u32 (!%p139_p2), %s617_s13, 5 }
   0x6   : > { %142 = sbr.rel (%p139_p2) target bundleno = 250 (0xfa), region = 32  ;;  %p163_p3 = scmp.lt.s32.totalorder (!%p139_p2), %s622_s18, 63 }
   0xb   : > { %v737_v0 = vld [vmem:[%s952_s1 + $0x10] ss:$0 sps:$4 sm:$0x33]   ;;  %vm363_vm0 = vcmask 1041408   ;;  %v738_v1 = vld [vmem:[%s952_s1 + $0x8] sm:$0xff]   ;;  %v739_v3 = vld [vmem:[%s952_s1] sm:$0xff]  }
   0xc   : > { %727 = vmatprep.subr.msk.bf16.mxu0 %vm363_vm0, %v737_v0  ;;  %728 = vmatprep.subr.msk.bf16.mxu1 %vm363_vm0, %v737_v0  ;;  %v365_v2 = vsel %vm363_vm0, %v737_v0, 0  ;;  %s956_s18 = smov (!%p163_p3, %s622_s18), 63  ;;  %vm314_vm1 = vcmask 293888   ;;  %v845_v20 = vld [vmem:[%s953_s2] ss:$0 sm:$0xff]  ;;  %vm528_vm2 = vcmask 130048  }
   0xd   : > { %684 = vmatpush3.bf16.msra.mxu0 %v365_v2  ;;  %724 = vmatpush3.bf16.msra.mxu1 %v365_v2  ;;  %s623_s21 = sshll.u32 %s956_s18, 2  ;;  %s625_s25 = sshll.u32 %s956_s18, 3 }
   0xe   : > { %685 = vmatprep.subr.bf16.mxu0 %v738_v1  ;;  %722 = vmatprep.subr.bf16.mxu1 %v738_v1  ;;  %s807_s24 = scalar_lea.vmem %s951_s0, %s623_s21  ;;  %s850_s30 = scalar_lea.vmem %s954_s3, %s625_s25 }
   0xf   : > { %v740_v4 = vld [vmem:[%s807_s24] sm:$0xff]   ;;  %v742_v6 = vld [vmem:[%s807_s24 + $0x8] sm:$0xff]   ;;  %v744_v8 = vld [vmem:[%s807_s24 + $0x10] sm:$0xff]  }
  0x10   : > { %v741_v5 = vld [vmem:[%s807_s24 + $0x40] sm:$0xff]   ;;  %689 = vmatprep.mubr.msk.bf16.mxu0 %vm314_vm1, %v740_v4  ;;  %v743_v7 = vld [vmem:[%s807_s24 + $0x48] sm:$0xff]   ;;  %v745_v9 = vld [vmem:[%s807_s24 + $0x50] sm:$0xff]  }
  0x11   : > { %686 = vmatpush3.bf16.msra.mxu0 %v738_v1  ;;  %725 = vmatpush3.bf16.msra.mxu1 %v738_v1  ;;  %v746_v10 = vld [vmem:[%s807_s24 + $0x18] sm:$0xff]   ;;  %v748_v12 = vld [vmem:[%s807_s24 + $0x20] sm:$0xff]   ;;  %v750_v14 = vld [vmem:[%s807_s24 + $0x28] sm:$0xff]  }
  0x12   : > { %687 = vmatprep.subr.bf16.mxu0 %v739_v3  ;;  %723 = vmatprep.subr.bf16.mxu1 %v739_v3  ;;  %v747_v11 = vld [vmem:[%s807_s24 + $0x58] sm:$0xff]   ;;  %v749_v13 = vld [vmem:[%s807_s24 + $0x60] sm:$0xff]   ;;  %v751_v15 = vld [vmem:[%s807_s24 + $0x68] sm:$0xff]  }
  0x13   : > { %705 = vmatprep.mubr.msk.bf16.mxu1 %vm314_vm1, %v741_v5  ;;  %v752_v16 = vld [vmem:[%s807_s24 + $0x30] sm:$0xff]   ;;  %v754_v18 = vld [vmem:[%s807_s24 + $0x38] sm:$0xff]  }
  0x14   : > { %v753_v17 = vld [vmem:[%s807_s24 + $0x70] sm:$0xff]   ;;  %v755_v19 = vld [vmem:[%s807_s24 + $0x78] sm:$0xff]  }
  0x15   : > { %688 = vmatpush3.bf16.msra.mxu0 %v739_v3  ;;  %726 = vmatpush3.bf16.msra.mxu1 %v739_v3 }
  0x18   : > { %690 = vmatmul.mubr.msk.bf16.vlgmr.msra.gmra.mxu0 %vm314_vm1, %v742_v6  ;;  %706 = vmatmul.mubr.msk.bf16.vlgmr.msra.gmra.mxu1 %vm314_vm1, %v743_v7 }
  0x19   : > { %693 = vmatprep.mubr.msk.bf16.mxu0 %vm314_vm1, %v744_v8  ;;  %709 = vmatprep.mubr.msk.bf16.mxu1 %vm314_vm1, %v745_v9 }
  0x20   : > { %694 = vmatmul.mubr.msk.bf16.gmra.mxu0 %vm314_vm1, %v746_v10  ;;  %710 = vmatmul.mubr.msk.bf16.gmra.mxu1 %vm314_vm1, %v747_v11 }
  0x21   : > { %697 = vmatprep.mubr.msk.bf16.mxu0 %vm314_vm1, %v748_v12  ;;  %713 = vmatprep.mubr.msk.bf16.mxu1 %vm314_vm1, %v749_v13 }
  0x28   : > { %698 = vmatmul.mubr.msk.bf16.gmra.mxu0 %vm314_vm1, %v750_v14  ;;  %714 = vmatmul.mubr.msk.bf16.gmra.mxu1 %vm314_vm1, %v751_v15 }
  0x29   : > { %701 = vmatprep.mubr.msk.bf16.mxu0 %vm314_vm1, %v752_v16  ;;  %717 = vmatprep.mubr.msk.bf16.mxu1 %vm314_vm1, %v753_v17 }
  0x30   : > { %702 = vmatmul.mubr.msk.bf16.gmra.mxu0 %vm314_vm1, %v754_v18  ;;  %718 = vmatmul.mubr.msk.bf16.gmra.mxu1 %vm314_vm1, %v755_v19 }
  0xd8   : > { %v691_v21 = vpop.f32.mrf.mxu0  ;;  %v707_v22 = vpop.f32.mrf.mxu1 }
  0xd9   : > { %v410_v23 = vadd.f32 %v691_v21, %v845_v20  ;;  %v474_v24 = vadd.f32 %v707_v22, %v845_v20 }
  0xda   : > { %v401_v25 = vpop.f32.mrf.mxu0  ;;  %v465_v26 = vpop.f32.mrf.mxu1 }
  0xdb   : > { %531 = vst.msk [vmem:[%s850_s30 + $0x10] sm:$0xff] %vm528_vm2, %v410_v23  ;;  %547 = vst.msk [vmem:[%s850_s30 + $0x90] sm:$0xff] %vm528_vm2, %v474_v24  ;;  %v402_v27 = vadd.f32 %v845_v20, %v401_v25  ;;  %v466_v28 = vadd.f32 %v845_v20, %v465_v26 }
  0xdc   : > { %v692_v29 = vpop.f32.mrf.mxu0  ;;  %v708_v30 = vpop.f32.mrf.mxu1 }
  0xdd   : > { %529 = vst.msk [vmem:[%s850_s30] sm:$0xff] %vm528_vm2, %v402_v27  ;;  %545 = vst.msk [vmem:[%s850_s30 + $0x80] sm:$0xff] %vm528_vm2, %v466_v28  ;;  %v413_v31 = vadd.f32 %v692_v29, %v845_v20  ;;  %v477_v32 = vadd.f32 %v708_v30, %v845_v20 }
  0xde   : > { %v404_v33 = vpop.f32.mrf.mxu0  ;;  %v468_v34 = vpop.f32.mrf.mxu1 }
  0xdf   : > { %532 = vst.msk [vmem:[%s850_s30 + $0x18] sm:$0xff] %vm528_vm2, %v413_v31  ;;  %548 = vst.msk [vmem:[%s850_s30 + $0x98] sm:$0xff] %vm528_vm2, %v477_v32  ;;  %v405_v35 = vadd.f32 %v845_v20, %v404_v33  ;;  %v469_v36 = vadd.f32 %v845_v20, %v468_v34 }
  0xe0   : > { %v695_v37 = vpop.f32.mrf.mxu0  ;;  %v711_v38 = vpop.f32.mrf.mxu1 }
  0xe1   : > { %530 = vst.msk [vmem:[%s850_s30 + $0x8] sm:$0xff] %vm528_vm2, %v405_v35  ;;  %546 = vst.msk [vmem:[%s850_s30 + $0x88] sm:$0xff] %vm528_vm2, %v469_v36  ;;  %v426_v39 = vadd.f32 %v695_v37, %v845_v20  ;;  %v490_v40 = vadd.f32 %v711_v38, %v845_v20 }
  0xe2   : > { %v417_v41 = vpop.f32.mrf.mxu0  ;;  %v481_v42 = vpop.f32.mrf.mxu1 }
  0xe3   : > { %535 = vst.msk [vmem:[%s850_s30 + $0x30] sm:$0xff] %vm528_vm2, %v426_v39  ;;  %551 = vst.msk [vmem:[%s850_s30 + $0xb0] sm:$0xff] %vm528_vm2, %v490_v40  ;;  %v418_v43 = vadd.f32 %v845_v20, %v417_v41  ;;  %v482_v44 = vadd.f32 %v845_v20, %v481_v42 }
  0xe4   : > { %v696_v45 = vpop.f32.mrf.mxu0  ;;  %v712_v46 = vpop.f32.mrf.mxu1 }
  0xe5   : > { %533 = vst.msk [vmem:[%s850_s30 + $0x20] sm:$0xff] %vm528_vm2, %v418_v43  ;;  %549 = vst.msk [vmem:[%s850_s30 + $0xa0] sm:$0xff] %vm528_vm2, %v482_v44  ;;  %v429_v47 = vadd.f32 %v696_v45, %v845_v20  ;;  %v493_v48 = vadd.f32 %v712_v46, %v845_v20 }
  0xe6   : > { %v420_v49 = vpop.f32.mrf.mxu0  ;;  %v484_v50 = vpop.f32.mrf.mxu1 }
  0xe7   : > { %536 = vst.msk [vmem:[%s850_s30 + $0x38] sm:$0xff] %vm528_vm2, %v429_v47  ;;  %552 = vst.msk [vmem:[%s850_s30 + $0xb8] sm:$0xff] %vm528_vm2, %v493_v48  ;;  %v421_v51 = vadd.f32 %v845_v20, %v420_v49  ;;  %v485_v52 = vadd.f32 %v845_v20, %v484_v50 }
  0xe8   : > { %v699_v53 = vpop.f32.mrf.mxu0  ;;  %v715_v54 = vpop.f32.mrf.mxu1 }
  0xe9   : > { %534 = vst.msk [vmem:[%s850_s30 + $0x28] sm:$0xff] %vm528_vm2, %v421_v51  ;;  %550 = vst.msk [vmem:[%s850_s30 + $0xa8] sm:$0xff] %vm528_vm2, %v485_v52  ;;  %v442_v55 = vadd.f32 %v699_v53, %v845_v20  ;;  %v506_v56 = vadd.f32 %v715_v54, %v845_v20 }
  0xea   : > { %v433_v57 = vpop.f32.mrf.mxu0  ;;  %v497_v58 = vpop.f32.mrf.mxu1 }
  0xeb   : > { %539 = vst.msk [vmem:[%s850_s30 + $0x50] sm:$0xff] %vm528_vm2, %v442_v55  ;;  %555 = vst.msk [vmem:[%s850_s30 + $0xd0] sm:$0xff] %vm528_vm2, %v506_v56  ;;  %v434_v59 = vadd.f32 %v845_v20, %v433_v57  ;;  %v498_v60 = vadd.f32 %v845_v20, %v497_v58 }
  0xec   : > { %v700_v61 = vpop.f32.mrf.mxu0  ;;  %v716_v62 = vpop.f32.mrf.mxu1 }
  0xed   : > { %537 = vst.msk [vmem:[%s850_s30 + $0x40] sm:$0xff] %vm528_vm2, %v434_v59  ;;  %553 = vst.msk [vmem:[%s850_s30 + $0xc0] sm:$0xff] %vm528_vm2, %v498_v60  ;;  %v445_v63 = vadd.f32 %v700_v61, %v845_v20  ;;  %v509_v0 = vadd.f32 %v716_v62, %v845_v20 }
  0xee   : > { %v436_v1 = vpop.f32.mrf.mxu0  ;;  %v500_v2 = vpop.f32.mrf.mxu1 }
  0xef   : > { %540 = vst.msk [vmem:[%s850_s30 + $0x58] sm:$0xff] %vm528_vm2, %v445_v63  ;;  %556 = vst.msk [vmem:[%s850_s30 + $0xd8] sm:$0xff] %vm528_vm2, %v509_v0  ;;  %v437_v3 = vadd.f32 %v845_v20, %v436_v1  ;;  %v501_v4 = vadd.f32 %v845_v20, %v500_v2 }
  0xf0   : > { %v703_v5 = vpop.f32.mrf.mxu0  ;;  %v719_v6 = vpop.f32.mrf.mxu1 }
  0xf1   : > { %538 = vst.msk [vmem:[%s850_s30 + $0x48] sm:$0xff] %vm528_vm2, %v437_v3  ;;  %554 = vst.msk [vmem:[%s850_s30 + $0xc8] sm:$0xff] %vm528_vm2, %v501_v4  ;;  %v458_v7 = vadd.f32 %v703_v5, %v845_v20  ;;  %v522_v8 = vadd.f32 %v719_v6, %v845_v20 }
  0xf2   : > { %v449_v9 = vpop.f32.mrf.mxu0  ;;  %v513_v10 = vpop.f32.mrf.mxu1 }
  0xf3   : > { %543 = vst.msk [vmem:[%s850_s30 + $0x70] sm:$0xff] %vm528_vm2, %v458_v7  ;;  %559 = vst.msk [vmem:[%s850_s30 + $0xf0] sm:$0xff] %vm528_vm2, %v522_v8  ;;  %v450_v11 = vadd.f32 %v845_v20, %v449_v9  ;;  %v514_v12 = vadd.f32 %v845_v20, %v513_v10 }
  0xf4   : > { %v704_v13 = vpop.f32.mrf.mxu0  ;;  %v720_v14 = vpop.f32.mrf.mxu1 }
  0xf5   : > { %541 = vst.msk [vmem:[%s850_s30 + $0x60] sm:$0xff] %vm528_vm2, %v450_v11  ;;  %557 = vst.msk [vmem:[%s850_s30 + $0xe0] sm:$0xff] %vm528_vm2, %v514_v12  ;;  %v461_v15 = vadd.f32 %v704_v13, %v845_v20  ;;  %v525_v16 = vadd.f32 %v720_v14, %v845_v20 }
  0xf6   : > { %v452_v17 = vpop.f32.mrf.mxu0  ;;  %v516_v18 = vpop.f32.mrf.mxu1 }
  0xf7   : > { %544 = vst.msk [vmem:[%s850_s30 + $0x78] sm:$0xff] %vm528_vm2, %v461_v15  ;;  %560 = vst.msk [vmem:[%s850_s30 + $0xf8] sm:$0xff] %vm528_vm2, %v525_v16  ;;  %v453_v19 = vadd.f32 %v845_v20, %v452_v17  ;;  %v517_v21 = vadd.f32 %v845_v20, %v516_v18 }
  0xf9   : > { %542 = vst.msk [vmem:[%s850_s30 + $0x68] sm:$0xff] %vm528_vm2, %v453_v19  ;;  %558 = vst.msk [vmem:[%s850_s30 + $0xe8] sm:$0xff] %vm528_vm2, %v517_v21 }
  0xfa PF: > { %s13_s12 = sadd.s32 1, %s762_s12  }
  0xfb   : > { %p10_p4 = scmp.ge.s32.totalorder %s13_s12, 4  }
  0xfd   :  { %12 = sbr.rel (!%p10_p4) target bundleno = 1 (0x1), region = 62 }

// kernel: separate_impala_cnn_forward.47
= control target key start
LH: loop header
LB: loop body
LE: loop exit
PB: predicated region body
PF: predicated region fallthrough
CT: control target
= control target key end

     0   :  { %v402_v0 = vmov 0   ;;  %vm198_vm0 = vcmask 130048   ;;  %s607_s1 = inlined_call_operand.vmem [shape: bf16[144,16], index: 1, kind: input, shape index: {}]   ;;  %s608_s0 = inlined_call_operand.vmem [shape: bf16[128,144], index: 0, kind: input, shape index: {}]   ;;  %s609_s2 = inlined_call_operand.vmem [shape: f32[1,16], index: 2, kind: input, shape index: {}]   ;;  %s610_s3 = inlined_call_operand.vmem [shape: f32[128,16], index: 3, kind: output, shape index: {}]  }
   0x1   :  { %223 = vmatprep.subr.bf16.mxu0 %v402_v0  ;;  %374 = vmatprep.subr.bf16.mxu1 %v402_v0  ;;  %v393_v1 = vld [vmem:[%s607_s1 + $0x38] sm:$0xff]   ;;  %v394_v2 = vld [vmem:[%s607_s1 + $0x30] sm:$0xff]   ;;  %v395_v3 = vld [vmem:[%s607_s1 + $0x28] sm:$0xff]  }
   0x2   :  { %224 = vmatpush1.bf16.msra.mxu0 %v393_v1  ;;  %383 = vmatpush1.bf16.msra.mxu1 %v393_v1  ;;  %v15_v4 = vld [vmem:[%s608_s0] sm:$0xff]  ;;  %v16_v5 = vld [vmem:[%s608_s0 + $0x8] sm:$0xff]  ;;  %v397_v15 = vld [vmem:[%s607_s1 + $0x18] sm:$0xff]  }
   0x3   :  { %225 = vmatprep.subr.bf16.mxu0 %v402_v0  ;;  %375 = vmatprep.subr.bf16.mxu1 %v402_v0  ;;  %v23_v6 = vld [vmem:[%s608_s0 + $0x40] sm:$0xff]  ;;  %v31_v8 = vmax.bf16 %v402_v0, %v15_v4  ;;  %v32_v9 = vmax.bf16 %v402_v0, %v16_v5  ;;  %v24_v10 = vld [vmem:[%s608_s0 + $0x48] sm:$0xff]  ;;  %v398_v16 = vld [vmem:[%s607_s1 + $0x10] sm:$0xff]  }
   0x4   :  { %v396_v7 = vld [vmem:[%s607_s1 + $0x20] sm:$0xff]   ;;  %v39_v11 = vmax.bf16 %v402_v0, %v23_v6  ;;  %v40_v12 = vmax.bf16 %v402_v0, %v24_v10  ;;  %v399_v17 = vld [vmem:[%s607_s1 + $0x8] sm:$0xff]   ;;  %v17_v19 = vld [vmem:[%s608_s0 + $0x10] sm:$0xff] }
   0x5   :  { %v342_v13 = vcombine.high %v31_v8, %v32_v9  ;;  %v400_v18 = vld [vmem:[%s607_s1] sm:$0xff]   ;;  %v18_v20 = vld [vmem:[%s608_s0 + $0x18] sm:$0xff]  ;;  %v25_v21 = vld [vmem:[%s608_s0 + $0x50] sm:$0xff]  ;;  %v33_v23 = vmax.bf16 %v402_v0, %v17_v19  ;;  %v341_v28 = vcombine.low %v31_v8, %v32_v9 }
   0x6   :  { %226 = vmatpush1.bf16.msra.mxu0 %v394_v2  ;;  %384 = vmatpush1.bf16.msra.mxu1 %v394_v2  ;;  %v350_v14 = vcombine.high %v39_v11, %v40_v12  ;;  %v26_v22 = vld [vmem:[%s608_s0 + $0x58] sm:$0xff]  ;;  %v401_v24 = vld [vmem:[%s607_s1 + $0x40] sm:$0xff]   ;;  %v34_v25 = vmax.bf16 %v402_v0, %v18_v20  ;;  %v41_v26 = vmax.bf16 %v402_v0, %v25_v21  ;;  %v20_v33 = vld [vmem:[%s608_s0 + $0x28] sm:$0xff] }
   0x7   :  { %227 = vmatprep.subr.bf16.mxu0 %v402_v0  ;;  %376 = vmatprep.subr.bf16.mxu1 %v402_v0  ;;  %v42_v27 = vmax.bf16 %v402_v0, %v26_v22  ;;  %v349_v29 = vcombine.low %v39_v11, %v40_v12  ;;  %v19_v32 = vld [vmem:[%s608_s0 + $0x20] sm:$0xff]  ;;  %v28_v35 = vld [vmem:[%s608_s0 + $0x68] sm:$0xff]  ;;  %v36_v37 = vmax.bf16 %v402_v0, %v20_v33  ;;  %v21_v44 = vld [vmem:[%s608_s0 + $0x30] sm:$0xff] }
   0x8   :  { %366 = vmatprep.mubr.msk.bf16.mxu0 %vm198_vm0, %v342_v13  ;;  %370 = vmatprep.mubr.msk.bf16.mxu1 %vm198_vm0, %v350_v14  ;;  %v344_v30 = vcombine.high %v33_v23, %v34_v25  ;;  %v27_v34 = vld [vmem:[%s608_s0 + $0x60] sm:$0xff]  ;;  %v35_v36 = vmax.bf16 %v402_v0, %v19_v32  ;;  %v44_v39 = vmax.bf16 %v402_v0, %v28_v35  ;;  %v22_v45 = vld [vmem:[%s608_s0 + $0x38] sm:$0xff]  ;;  %v29_v46 = vld [vmem:[%s608_s0 + $0x70] sm:$0xff] }
   0x9   :  { %v352_v31 = vcombine.high %v41_v26, %v42_v27  ;;  %v43_v38 = vmax.bf16 %v402_v0, %v27_v34  ;;  %v343_v40 = vcombine.low %v33_v23, %v34_v25  ;;  %v351_v41 = vcombine.low %v41_v26, %v42_v27  ;;  %v30_v47 = vld [vmem:[%s608_s0 + $0x78] sm:$0xff]  ;;  %v340_v58 = vld [vmem:[%s609_s2] ss:$0 sm:$0xff] }
   0xa   :  { %228 = vmatpush1.bf16.msra.mxu0 %v395_v3  ;;  %385 = vmatpush1.bf16.msra.mxu1 %v395_v3  ;;  %v346_v42 = vcombine.high %v35_v36, %v36_v37  ;;  %v37_v48 = vmax.bf16 %v402_v0, %v21_v44  ;;  %v38_v49 = vmax.bf16 %v402_v0, %v22_v45 }
   0xb   :  { %229 = vmatprep.subr.bf16.mxu0 %v402_v0  ;;  %377 = vmatprep.subr.bf16.mxu1 %v402_v0  ;;  %v354_v43 = vcombine.high %v43_v38, %v44_v39  ;;  %v45_v50 = vmax.bf16 %v402_v0, %v29_v46  ;;  %v46_v51 = vmax.bf16 %v402_v0, %v30_v47 }
   0xc   :  { %v345_v52 = vcombine.low %v35_v36, %v36_v37  ;;  %v353_v53 = vcombine.low %v43_v38, %v44_v39  ;;  %v348_v54 = vcombine.high %v37_v48, %v38_v49  ;;  %v347_v56 = vcombine.low %v37_v48, %v38_v49 }
   0xd   :  { %v356_v55 = vcombine.high %v45_v50, %v46_v51  ;;  %v355_v57 = vcombine.low %v45_v50, %v46_v51 }
   0xe   :  { %230 = vmatpush1.bf16.msra.mxu0 %v396_v7  ;;  %386 = vmatpush1.bf16.msra.mxu1 %v396_v7 }
   0xf   :  { %231 = vmatprep.subr.bf16.mxu0 %v402_v0  ;;  %378 = vmatprep.subr.bf16.mxu1 %v402_v0 }
  0x12   :  { %232 = vmatpush1.bf16.msra.mxu0 %v397_v15  ;;  %387 = vmatpush1.bf16.msra.mxu1 %v397_v15 }
  0x13   :  { %233 = vmatprep.subr.bf16.mxu0 %v402_v0  ;;  %379 = vmatprep.subr.bf16.mxu1 %v402_v0 }
  0x16   :  { %234 = vmatpush1.bf16.msra.mxu0 %v398_v16  ;;  %388 = vmatpush1.bf16.msra.mxu1 %v398_v16 }
  0x17   :  { %235 = vmatprep.subr.bf16.mxu0 %v402_v0  ;;  %380 = vmatprep.subr.bf16.mxu1 %v402_v0 }
  0x1a   :  { %236 = vmatpush1.bf16.msra.mxu0 %v399_v17  ;;  %389 = vmatpush1.bf16.msra.mxu1 %v399_v17 }
  0x1b   :  { %237 = vmatprep.subr.bf16.mxu0 %v402_v0  ;;  %381 = vmatprep.subr.bf16.mxu1 %v402_v0 }
  0x1e   :  { %238 = vmatpush1.bf16.msra.mxu0 %v400_v18  ;;  %390 = vmatpush1.bf16.msra.mxu1 %v400_v18 }
  0x1f   :  { %253 = vmatprep.subr.bf16.mxu0 %v402_v0  ;;  %382 = vmatprep.subr.bf16.mxu1 %v402_v0 }
  0x22   :  { %254 = vmatpush2.bf16.msra.mxu0 %v401_v24  ;;  %391 = vmatpush2.bf16.msra.mxu1 %v401_v24 }
  0x25   :  { %256 = vmatmul.mubr.bf16.vlgmr.msra.gmra.mxu0 %v341_v28  ;;  %288 = vmatmul.mubr.bf16.vlgmr.msra.gmra.mxu1 %v349_v29 }
  0x26   :  { %367 = vmatprep.mubr.msk.bf16.mxu0 %vm198_vm0, %v344_v30  ;;  %371 = vmatprep.mubr.msk.bf16.mxu1 %vm198_vm0, %v352_v31 }
  0x2d   :  { %264 = vmatmul.mubr.bf16.gmra.mxu0 %v343_v40  ;;  %296 = vmatmul.mubr.bf16.gmra.mxu1 %v351_v41 }
  0x2e   :  { %368 = vmatprep.mubr.msk.bf16.mxu0 %vm198_vm0, %v346_v42  ;;  %372 = vmatprep.mubr.msk.bf16.mxu1 %vm198_vm0, %v354_v43 }
  0x35   :  { %272 = vmatmul.mubr.bf16.gmra.mxu0 %v345_v52  ;;  %304 = vmatmul.mubr.bf16.gmra.mxu1 %v353_v53 }
  0x36   :  { %369 = vmatprep.mubr.msk.bf16.mxu0 %vm198_vm0, %v348_v54  ;;  %373 = vmatprep.mubr.msk.bf16.mxu1 %vm198_vm0, %v356_v55 }
  0x3d   :  { %280 = vmatmul.mubr.bf16.gmra.mxu0 %v347_v56  ;;  %312 = vmatmul.mubr.bf16.gmra.mxu1 %v355_v57 }
  0xe5   :  { %v257_v59 = vpop.f32.mrf.mxu0  ;;  %v289_v60 = vpop.f32.mrf.mxu1 }
  0xe6   :  { %v258_v61 = vadd.f32 %v340_v58, %v257_v59  ;;  %v290_v62 = vadd.f32 %v340_v58, %v289_v60 }
  0xe7   :  { %v259_v63 = vpop.f32.mrf.mxu0  ;;  %v291_v0 = vpop.f32.mrf.mxu1 }
  0xe8   :  { %320 = vst.msk [vmem:[%s610_s3] sm:$0xff] %vm198_vm0, %v258_v61  ;;  %328 = vst.msk [vmem:[%s610_s3 + $0x40] sm:$0xff] %vm198_vm0, %v290_v62 }
  0xe9   :  { %v260_v1 = vpop.f32.mrf.mxu0  ;;  %v292_v2 = vpop.f32.mrf.mxu1 }
  0xea   :  { %v261_v3 = vadd.f32 %v340_v58, %v260_v1  ;;  %v293_v4 = vadd.f32 %v340_v58, %v292_v2 }
  0xeb   :  { %v262_v5 = vpop.f32.mrf.mxu0  ;;  %v294_v6 = vpop.f32.mrf.mxu1 }
  0xec   :  { %321 = vst.msk [vmem:[%s610_s3 + $0x8] sm:$0xff] %vm198_vm0, %v261_v3  ;;  %329 = vst.msk [vmem:[%s610_s3 + $0x48] sm:$0xff] %vm198_vm0, %v293_v4 }
  0xed   :  { %v265_v7 = vpop.f32.mrf.mxu0  ;;  %v297_v8 = vpop.f32.mrf.mxu1 }
  0xee   :  { %v266_v9 = vadd.f32 %v340_v58, %v265_v7  ;;  %v298_v10 = vadd.f32 %v340_v58, %v297_v8 }
  0xef   :  { %v267_v11 = vpop.f32.mrf.mxu0  ;;  %v299_v12 = vpop.f32.mrf.mxu1 }
  0xf0   :  { %322 = vst.msk [vmem:[%s610_s3 + $0x10] sm:$0xff] %vm198_vm0, %v266_v9  ;;  %330 = vst.msk [vmem:[%s610_s3 + $0x50] sm:$0xff] %vm198_vm0, %v298_v10 }
  0xf1   :  { %v268_v13 = vpop.f32.mrf.mxu0  ;;  %v300_v14 = vpop.f32.mrf.mxu1 }
  0xf2   :  { %v269_v15 = vadd.f32 %v340_v58, %v268_v13  ;;  %v301_v16 = vadd.f32 %v340_v58, %v300_v14 }
  0xf3   :  { %v270_v17 = vpop.f32.mrf.mxu0  ;;  %v302_v18 = vpop.f32.mrf.mxu1 }
  0xf4   :  { %323 = vst.msk [vmem:[%s610_s3 + $0x18] sm:$0xff] %vm198_vm0, %v269_v15  ;;  %331 = vst.msk [vmem:[%s610_s3 + $0x58] sm:$0xff] %vm198_vm0, %v301_v16 }
  0xf5   :  { %v273_v19 = vpop.f32.mrf.mxu0  ;;  %v305_v20 = vpop.f32.mrf.mxu1 }
  0xf6   :  { %v274_v21 = vadd.f32 %v340_v58, %v273_v19  ;;  %v306_v22 = vadd.f32 %v340_v58, %v305_v20 }
  0xf7   :  { %v275_v23 = vpop.f32.mrf.mxu0  ;;  %v307_v24 = vpop.f32.mrf.mxu1 }
  0xf8   :  { %324 = vst.msk [vmem:[%s610_s3 + $0x20] sm:$0xff] %vm198_vm0, %v274_v21  ;;  %332 = vst.msk [vmem:[%s610_s3 + $0x60] sm:$0xff] %vm198_vm0, %v306_v22 }
  0xf9   :  { %v276_v25 = vpop.f32.mrf.mxu0  ;;  %v308_v26 = vpop.f32.mrf.mxu1 }
  0xfa   :  { %v277_v27 = vadd.f32 %v340_v58, %v276_v25  ;;  %v309_v28 = vadd.f32 %v340_v58, %v308_v26 }
  0xfb   :  { %v278_v29 = vpop.f32.mrf.mxu0  ;;  %v310_v30 = vpop.f32.mrf.mxu1 }
  0xfc   :  { %325 = vst.msk [vmem:[%s610_s3 + $0x28] sm:$0xff] %vm198_vm0, %v277_v27  ;;  %333 = vst.msk [vmem:[%s610_s3 + $0x68] sm:$0xff] %vm198_vm0, %v309_v28 }
  0xfd   :  { %v281_v31 = vpop.f32.mrf.mxu0  ;;  %v313_v32 = vpop.f32.mrf.mxu1 }
  0xfe   :  { %v282_v33 = vadd.f32 %v340_v58, %v281_v31  ;;  %v314_v34 = vadd.f32 %v340_v58, %v313_v32 }
  0xff   :  { %v283_v35 = vpop.f32.mrf.mxu0  ;;  %v315_v36 = vpop.f32.mrf.mxu1 }
 0x100   :  { %326 = vst.msk [vmem:[%s610_s3 + $0x30] sm:$0xff] %vm198_vm0, %v282_v33  ;;  %334 = vst.msk [vmem:[%s610_s3 + $0x70] sm:$0xff] %vm198_vm0, %v314_v34 }
 0x101   :  { %v284_v37 = vpop.f32.mrf.mxu0  ;;  %v316_v38 = vpop.f32.mrf.mxu1 }
 0x102   :  { %v285_v39 = vadd.f32 %v340_v58, %v284_v37  ;;  %v317_v40 = vadd.f32 %v340_v58, %v316_v38 }
 0x103   :  { %v286_v41 = vpop.f32.mrf.mxu0  ;;  %v318_v42 = vpop.f32.mrf.mxu1 }
 0x104   :  { %327 = vst.msk [vmem:[%s610_s3 + $0x38] sm:$0xff] %vm198_vm0, %v285_v39  ;;  %335 = vst.msk [vmem:[%s610_s3 + $0x78] sm:$0xff] %vm198_vm0, %v317_v40 }

// kernel: separate_impala_cnn_forward.48
= control target key start
LH: loop header
LB: loop body
LE: loop exit
PB: predicated region body
PF: predicated region fallthrough
CT: control target
= control target key end

     0   :  { %v437_v0 = vmov 0   ;;  %vm201_vm0 = vcmask 130048   ;;  %s713_s1 = inlined_call_operand.vmem [shape: bf16[144,16], index: 1, kind: input, shape index: {}]   ;;  %s714_s0 = inlined_call_operand.vmem [shape: bf16[128,144], index: 0, kind: input, shape index: {}]   ;;  %s715_s2 = inlined_call_operand.vmem [shape: f32[1,16], index: 2, kind: input, shape index: {}]   ;;  %s716_s3 = inlined_call_operand.vmem [shape: f32[128,16], index: 3, kind: input, shape index: {}]   ;;  %s717_s4 = inlined_call_operand.vmem [shape: f32[128,16], index: 4, kind: output, shape index: {}]  }
   0x1   :  { %226 = vmatprep.subr.bf16.mxu0 %v437_v0  ;;  %409 = vmatprep.subr.bf16.mxu1 %v437_v0  ;;  %v428_v1 = vld [vmem:[%s713_s1 + $0x38] sm:$0xff]   ;;  %v429_v2 = vld [vmem:[%s713_s1 + $0x30] sm:$0xff]   ;;  %v430_v3 = vld [vmem:[%s713_s1 + $0x28] sm:$0xff]  }
   0x2   :  { %227 = vmatpush1.bf16.msra.mxu0 %v428_v1  ;;  %418 = vmatpush1.bf16.msra.mxu1 %v428_v1  ;;  %v18_v4 = vld [vmem:[%s714_s0] sm:$0xff]  ;;  %v19_v5 = vld [vmem:[%s714_s0 + $0x8] sm:$0xff]  ;;  %v432_v15 = vld [vmem:[%s713_s1 + $0x18] sm:$0xff]  }
   0x3   :  { %228 = vmatprep.subr.bf16.mxu0 %v437_v0  ;;  %410 = vmatprep.subr.bf16.mxu1 %v437_v0  ;;  %v26_v6 = vld [vmem:[%s714_s0 + $0x40] sm:$0xff]  ;;  %v34_v8 = vmax.bf16 %v437_v0, %v18_v4  ;;  %v35_v9 = vmax.bf16 %v437_v0, %v19_v5  ;;  %v27_v10 = vld [vmem:[%s714_s0 + $0x48] sm:$0xff]  ;;  %v433_v16 = vld [vmem:[%s713_s1 + $0x10] sm:$0xff]  }
   0x4   :  { %v431_v7 = vld [vmem:[%s713_s1 + $0x20] sm:$0xff]   ;;  %v42_v11 = vmax.bf16 %v437_v0, %v26_v6  ;;  %v43_v12 = vmax.bf16 %v437_v0, %v27_v10  ;;  %v434_v17 = vld [vmem:[%s713_s1 + $0x8] sm:$0xff]   ;;  %v20_v19 = vld [vmem:[%s714_s0 + $0x10] sm:$0xff] }
   0x5   :  { %v377_v13 = vcombine.high %v34_v8, %v35_v9  ;;  %v435_v18 = vld [vmem:[%s713_s1] sm:$0xff]   ;;  %v21_v20 = vld [vmem:[%s714_s0 + $0x18] sm:$0xff]  ;;  %v28_v21 = vld [vmem:[%s714_s0 + $0x50] sm:$0xff]  ;;  %v36_v23 = vmax.bf16 %v437_v0, %v20_v19  ;;  %v376_v28 = vcombine.low %v34_v8, %v35_v9 }
   0x6   :  { %229 = vmatpush1.bf16.msra.mxu0 %v429_v2  ;;  %419 = vmatpush1.bf16.msra.mxu1 %v429_v2  ;;  %v385_v14 = vcombine.high %v42_v11, %v43_v12  ;;  %v29_v22 = vld [vmem:[%s714_s0 + $0x58] sm:$0xff]  ;;  %v436_v24 = vld [vmem:[%s713_s1 + $0x40] sm:$0xff]   ;;  %v37_v25 = vmax.bf16 %v437_v0, %v21_v20  ;;  %v44_v26 = vmax.bf16 %v437_v0, %v28_v21  ;;  %v23_v33 = vld [vmem:[%s714_s0 + $0x28] sm:$0xff] }
   0x7   :  { %230 = vmatprep.subr.bf16.mxu0 %v437_v0  ;;  %411 = vmatprep.subr.bf16.mxu1 %v437_v0  ;;  %v45_v27 = vmax.bf16 %v437_v0, %v29_v22  ;;  %v384_v29 = vcombine.low %v42_v11, %v43_v12  ;;  %v22_v32 = vld [vmem:[%s714_s0 + $0x20] sm:$0xff]  ;;  %v31_v35 = vld [vmem:[%s714_s0 + $0x68] sm:$0xff]  ;;  %v39_v37 = vmax.bf16 %v437_v0, %v23_v33  ;;  %v24_v44 = vld [vmem:[%s714_s0 + $0x30] sm:$0xff] }
   0x8   :  { %401 = vmatprep.mubr.msk.bf16.mxu0 %vm201_vm0, %v377_v13  ;;  %405 = vmatprep.mubr.msk.bf16.mxu1 %vm201_vm0, %v385_v14  ;;  %v379_v30 = vcombine.high %v36_v23, %v37_v25  ;;  %v30_v34 = vld [vmem:[%s714_s0 + $0x60] sm:$0xff]  ;;  %v38_v36 = vmax.bf16 %v437_v0, %v22_v32  ;;  %v47_v39 = vmax.bf16 %v437_v0, %v31_v35  ;;  %v25_v45 = vld [vmem:[%s714_s0 + $0x38] sm:$0xff]  ;;  %v32_v46 = vld [vmem:[%s714_s0 + $0x70] sm:$0xff] }
   0x9   :  { %v387_v31 = vcombine.high %v44_v26, %v45_v27  ;;  %v46_v38 = vmax.bf16 %v437_v0, %v30_v34  ;;  %v378_v40 = vcombine.low %v36_v23, %v37_v25  ;;  %v386_v41 = vcombine.low %v44_v26, %v45_v27  ;;  %v33_v47 = vld [vmem:[%s714_s0 + $0x78] sm:$0xff]  ;;  %v583_v58 = vld [vmem:[%s715_s2] ss:$0 sm:$0xff]  ;;  %v324_v6 = vld [vmem:[%s716_s3 + $0x8] sm:$0xff] }
   0xa   :  { %231 = vmatpush1.bf16.msra.mxu0 %v430_v3  ;;  %420 = vmatpush1.bf16.msra.mxu1 %v430_v3  ;;  %v381_v42 = vcombine.high %v38_v36, %v39_v37  ;;  %v40_v48 = vmax.bf16 %v437_v0, %v24_v44  ;;  %v41_v49 = vmax.bf16 %v437_v0, %v25_v45  ;;  %v323_v60 = vld [vmem:[%s716_s3] sm:$0xff]  ;;  %v332_v8 = vld [vmem:[%s716_s3 + $0x48] sm:$0xff]  ;;  %v326_v26 = vld [vmem:[%s716_s3 + $0x18] sm:$0xff] }
   0xb   :  { %232 = vmatprep.subr.bf16.mxu0 %v437_v0  ;;  %412 = vmatprep.subr.bf16.mxu1 %v437_v0  ;;  %v389_v43 = vcombine.high %v46_v38, %v47_v39  ;;  %v48_v50 = vmax.bf16 %v437_v0, %v32_v46  ;;  %v49_v51 = vmax.bf16 %v437_v0, %v33_v47  ;;  %v331_v62 = vld [vmem:[%s716_s3 + $0x40] sm:$0xff]  ;;  %v328_v46 = vld [vmem:[%s716_s3 + $0x28] sm:$0xff] }
   0xc   :  { %v380_v52 = vcombine.low %v38_v36, %v39_v37  ;;  %v388_v53 = vcombine.low %v46_v38, %v47_v39  ;;  %v383_v54 = vcombine.high %v40_v48, %v41_v49  ;;  %v382_v56 = vcombine.low %v40_v48, %v41_v49  ;;  %v327_v36 = vld [vmem:[%s716_s3 + $0x20] sm:$0xff]  ;;  %v336_v48 = vld [vmem:[%s716_s3 + $0x68] sm:$0xff] }
   0xd   :  { %v391_v55 = vcombine.high %v48_v50, %v49_v51  ;;  %v390_v57 = vcombine.low %v48_v50, %v49_v51  ;;  %v335_v38 = vld [vmem:[%s716_s3 + $0x60] sm:$0xff] }
   0xe   :  { %233 = vmatpush1.bf16.msra.mxu0 %v431_v7  ;;  %421 = vmatpush1.bf16.msra.mxu1 %v431_v7 }
   0xf   :  { %234 = vmatprep.subr.bf16.mxu0 %v437_v0  ;;  %413 = vmatprep.subr.bf16.mxu1 %v437_v0 }
  0x12   :  { %235 = vmatpush1.bf16.msra.mxu0 %v432_v15  ;;  %422 = vmatpush1.bf16.msra.mxu1 %v432_v15 }
  0x13   :  { %236 = vmatprep.subr.bf16.mxu0 %v437_v0  ;;  %414 = vmatprep.subr.bf16.mxu1 %v437_v0 }
  0x16   :  { %237 = vmatpush1.bf16.msra.mxu0 %v433_v16  ;;  %423 = vmatpush1.bf16.msra.mxu1 %v433_v16  ;;  %v325_v16 = vld [vmem:[%s716_s3 + $0x10] sm:$0xff] }
  0x17   :  { %238 = vmatprep.subr.bf16.mxu0 %v437_v0  ;;  %415 = vmatprep.subr.bf16.mxu1 %v437_v0 }
  0x1a   :  { %239 = vmatpush1.bf16.msra.mxu0 %v434_v17  ;;  %424 = vmatpush1.bf16.msra.mxu1 %v434_v17 }
  0x1b   :  { %240 = vmatprep.subr.bf16.mxu0 %v437_v0  ;;  %416 = vmatprep.subr.bf16.mxu1 %v437_v0 }
  0x1e   :  { %241 = vmatpush1.bf16.msra.mxu0 %v435_v18  ;;  %425 = vmatpush1.bf16.msra.mxu1 %v435_v18  ;;  %v333_v18 = vld [vmem:[%s716_s3 + $0x50] sm:$0xff] }
  0x1f   :  { %256 = vmatprep.subr.bf16.mxu0 %v437_v0  ;;  %417 = vmatprep.subr.bf16.mxu1 %v437_v0 }
  0x22   :  { %257 = vmatpush2.bf16.msra.mxu0 %v436_v24  ;;  %426 = vmatpush2.bf16.msra.mxu1 %v436_v24 }
  0x25   :  { %259 = vmatmul.mubr.bf16.vlgmr.msra.gmra.mxu0 %v376_v28  ;;  %291 = vmatmul.mubr.bf16.vlgmr.msra.gmra.mxu1 %v384_v29  ;;  %v334_v28 = vld [vmem:[%s716_s3 + $0x58] sm:$0xff] }
  0x26   :  { %402 = vmatprep.mubr.msk.bf16.mxu0 %vm201_vm0, %v379_v30  ;;  %406 = vmatprep.mubr.msk.bf16.mxu1 %vm201_vm0, %v387_v31 }
  0x2d   :  { %267 = vmatmul.mubr.bf16.gmra.mxu0 %v378_v40  ;;  %299 = vmatmul.mubr.bf16.gmra.mxu1 %v386_v41 }
  0x2e   :  { %403 = vmatprep.mubr.msk.bf16.mxu0 %vm201_vm0, %v381_v42  ;;  %407 = vmatprep.mubr.msk.bf16.mxu1 %vm201_vm0, %v389_v43 }
  0x35   :  { %275 = vmatmul.mubr.bf16.gmra.mxu0 %v380_v52  ;;  %307 = vmatmul.mubr.bf16.gmra.mxu1 %v388_v53 }
  0x36   :  { %404 = vmatprep.mubr.msk.bf16.mxu0 %vm201_vm0, %v383_v54  ;;  %408 = vmatprep.mubr.msk.bf16.mxu1 %vm201_vm0, %v391_v55 }
  0x3d   :  { %283 = vmatmul.mubr.bf16.gmra.mxu0 %v382_v56  ;;  %315 = vmatmul.mubr.bf16.gmra.mxu1 %v390_v57  ;;  %v329_v56 = vld [vmem:[%s716_s3 + $0x30] sm:$0xff] }
  0xe5   :  { %v260_v59 = vpop.f32.mrf.mxu0  ;;  %v292_v61 = vpop.f32.mrf.mxu1 }
  0xe6   :  { %v261_v63 = vadd.f32 %v583_v58, %v260_v59  ;;  %v293_v0 = vadd.f32 %v583_v58, %v292_v61  ;;  %v337_v59 = vld [vmem:[%s716_s3 + $0x70] sm:$0xff] }
  0xe7   :  { %v262_v1 = vpop.f32.mrf.mxu0  ;;  %v294_v2 = vpop.f32.mrf.mxu1 }
  0xe8   :  { %v339_v3 = vadd.f32 %v323_v60, %v261_v63  ;;  %v347_v4 = vadd.f32 %v331_v62, %v293_v0 }
  0xe9   :  { %v263_v5 = vpop.f32.mrf.mxu0  ;;  %v295_v7 = vpop.f32.mrf.mxu1 }
  0xea   :  { %355 = vst.msk [vmem:[%s717_s4] sm:$0xff] %vm201_vm0, %v339_v3  ;;  %363 = vst.msk [vmem:[%s717_s4 + $0x40] sm:$0xff] %vm201_vm0, %v347_v4  ;;  %v264_v9 = vadd.f32 %v583_v58, %v263_v5  ;;  %v296_v10 = vadd.f32 %v583_v58, %v295_v7  ;;  %v330_v3 = vld [vmem:[%s716_s3 + $0x38] sm:$0xff] }
  0xeb   :  { %v265_v11 = vpop.f32.mrf.mxu0  ;;  %v297_v12 = vpop.f32.mrf.mxu1  ;;  %v338_v5 = vld [vmem:[%s716_s3 + $0x78] sm:$0xff] }
  0xec   :  { %v340_v13 = vadd.f32 %v324_v6, %v264_v9  ;;  %v348_v14 = vadd.f32 %v332_v8, %v296_v10 }
  0xed   :  { %v268_v15 = vpop.f32.mrf.mxu0  ;;  %v300_v17 = vpop.f32.mrf.mxu1 }
  0xee   :  { %356 = vst.msk [vmem:[%s717_s4 + $0x8] sm:$0xff] %vm201_vm0, %v340_v13  ;;  %364 = vst.msk [vmem:[%s717_s4 + $0x48] sm:$0xff] %vm201_vm0, %v348_v14  ;;  %v269_v19 = vadd.f32 %v583_v58, %v268_v15  ;;  %v301_v20 = vadd.f32 %v583_v58, %v300_v17 }
  0xef   :  { %v270_v21 = vpop.f32.mrf.mxu0  ;;  %v302_v22 = vpop.f32.mrf.mxu1 }
  0xf0   :  { %v341_v23 = vadd.f32 %v325_v16, %v269_v19  ;;  %v349_v24 = vadd.f32 %v333_v18, %v301_v20 }
  0xf1   :  { %v271_v25 = vpop.f32.mrf.mxu0  ;;  %v303_v27 = vpop.f32.mrf.mxu1 }
  0xf2   :  { %357 = vst.msk [vmem:[%s717_s4 + $0x10] sm:$0xff] %vm201_vm0, %v341_v23  ;;  %365 = vst.msk [vmem:[%s717_s4 + $0x50] sm:$0xff] %vm201_vm0, %v349_v24  ;;  %v272_v29 = vadd.f32 %v583_v58, %v271_v25  ;;  %v304_v30 = vadd.f32 %v583_v58, %v303_v27 }
  0xf3   :  { %v273_v31 = vpop.f32.mrf.mxu0  ;;  %v305_v32 = vpop.f32.mrf.mxu1 }
  0xf4   :  { %v342_v33 = vadd.f32 %v326_v26, %v272_v29  ;;  %v350_v34 = vadd.f32 %v334_v28, %v304_v30 }
  0xf5   :  { %v276_v35 = vpop.f32.mrf.mxu0  ;;  %v308_v37 = vpop.f32.mrf.mxu1 }
  0xf6   :  { %358 = vst.msk [vmem:[%s717_s4 + $0x18] sm:$0xff] %vm201_vm0, %v342_v33  ;;  %366 = vst.msk [vmem:[%s717_s4 + $0x58] sm:$0xff] %vm201_vm0, %v350_v34  ;;  %v277_v39 = vadd.f32 %v583_v58, %v276_v35  ;;  %v309_v40 = vadd.f32 %v583_v58, %v308_v37 }
  0xf7   :  { %v278_v41 = vpop.f32.mrf.mxu0  ;;  %v310_v42 = vpop.f32.mrf.mxu1 }
  0xf8   :  { %v343_v43 = vadd.f32 %v327_v36, %v277_v39  ;;  %v351_v44 = vadd.f32 %v335_v38, %v309_v40 }
  0xf9   :  { %v279_v45 = vpop.f32.mrf.mxu0  ;;  %v311_v47 = vpop.f32.mrf.mxu1 }
  0xfa   :  { %359 = vst.msk [vmem:[%s717_s4 + $0x20] sm:$0xff] %vm201_vm0, %v343_v43  ;;  %367 = vst.msk [vmem:[%s717_s4 + $0x60] sm:$0xff] %vm201_vm0, %v351_v44  ;;  %v280_v49 = vadd.f32 %v583_v58, %v279_v45  ;;  %v312_v50 = vadd.f32 %v583_v58, %v311_v47 }
  0xfb   :  { %v281_v51 = vpop.f32.mrf.mxu0  ;;  %v313_v52 = vpop.f32.mrf.mxu1 }
  0xfc   :  { %v344_v53 = vadd.f32 %v328_v46, %v280_v49  ;;  %v352_v54 = vadd.f32 %v336_v48, %v312_v50 }
  0xfd   :  { %v284_v55 = vpop.f32.mrf.mxu0  ;;  %v316_v57 = vpop.f32.mrf.mxu1 }
  0xfe   :  { %360 = vst.msk [vmem:[%s717_s4 + $0x28] sm:$0xff] %vm201_vm0, %v344_v53  ;;  %368 = vst.msk [vmem:[%s717_s4 + $0x68] sm:$0xff] %vm201_vm0, %v352_v54  ;;  %v285_v60 = vadd.f32 %v583_v58, %v284_v55  ;;  %v317_v61 = vadd.f32 %v583_v58, %v316_v57 }
  0xff   :  { %v286_v62 = vpop.f32.mrf.mxu0  ;;  %v318_v63 = vpop.f32.mrf.mxu1 }
 0x100   :  { %v345_v0 = vadd.f32 %v329_v56, %v285_v60  ;;  %v353_v1 = vadd.f32 %v337_v59, %v317_v61 }
 0x101   :  { %v287_v2 = vpop.f32.mrf.mxu0  ;;  %v319_v4 = vpop.f32.mrf.mxu1 }
 0x102   :  { %361 = vst.msk [vmem:[%s717_s4 + $0x30] sm:$0xff] %vm201_vm0, %v345_v0  ;;  %369 = vst.msk [vmem:[%s717_s4 + $0x70] sm:$0xff] %vm201_vm0, %v353_v1  ;;  %v288_v6 = vadd.f32 %v583_v58, %v287_v2  ;;  %v320_v7 = vadd.f32 %v583_v58, %v319_v4 }
 0x103   :  { %v289_v8 = vpop.f32.mrf.mxu0  ;;  %v321_v9 = vpop.f32.mrf.mxu1 }
 0x104   :  { %v346_v10 = vadd.f32 %v330_v3, %v288_v6  ;;  %v354_v11 = vadd.f32 %v338_v5, %v320_v7 }
 0x106   :  { %362 = vst.msk [vmem:[%s717_s4 + $0x38] sm:$0xff] %vm201_vm0, %v346_v10  ;;  %370 = vst.msk [vmem:[%s717_s4 + $0x78] sm:$0xff] %vm201_vm0, %v354_v11 }

// kernel: separate_impala_cnn_forward.51
= control target key start
LH: loop header
LB: loop body
LE: loop exit
PB: predicated region body
PF: predicated region fallthrough
CT: control target
= control target key end

     0   :  { %v411_v0 = vmov 0   ;;  %vm182_vm0 = vcmask 130048   ;;  %vm304_vm1 = vcmask 261120   ;;  %s582_s1 = inlined_call_operand.vmem [shape: bf16[144,32], index: 1, kind: input, shape index: {}]   ;;  %s583_s0 = inlined_call_operand.vmem [shape: bf16[128,144], index: 0, kind: input, shape index: {}]   ;;  %s584_s2 = inlined_call_operand.vmem [shape: f32[1,32], index: 2, kind: input, shape index: {}]   ;;  %s585_s3 = inlined_call_operand.vmem [shape: f32[128,32], index: 3, kind: output, shape index: {}]  }
   0x1   :  { %207 = vmatprep.subr.bf16.mxu0 %v411_v0  ;;  %359 = vmatprep.subr.bf16.mxu1 %v411_v0  ;;  %v378_v1 = vld [vmem:[%s582_s1 + $0x38] sm:$0xff]   ;;  %v379_v2 = vld [vmem:[%s582_s1 + $0x30] sm:$0xff]   ;;  %v380_v3 = vld [vmem:[%s582_s1 + $0x28] sm:$0xff]  }
   0x2   :  { %208 = vmatpush1.bf16.msra.mxu0 %v378_v1  ;;  %368 = vmatpush1.bf16.msra.mxu1 %v378_v1  ;;  %v381_v4 = vld [vmem:[%s582_s1 + $0x20] sm:$0xff]   ;;  %v382_v7 = vld [vmem:[%s582_s1 + $0x18] sm:$0xff]   ;;  %v383_v8 = vld [vmem:[%s582_s1 + $0x10] sm:$0xff]  }
   0x3   :  { %209 = vmatprep.subr.bf16.mxu0 %v411_v0  ;;  %360 = vmatprep.subr.bf16.mxu1 %v411_v0  ;;  %v389_v5 = vld [vmem:[%s583_s0 + $0x4] ss:$8 sps:$4 sm:$0xff]   ;;  %v387_v12 = vld [vmem:[%s583_s0] ss:$8 sps:$4 sm:$0xff]   ;;  %v393_v14 = vld [vmem:[%s583_s0 + $0x14] ss:$8 sps:$4 sm:$0xff]  }
   0x4   :  { %v392_v6 = vld [vmem:[%s583_s0 + $0x44] ss:$8 sps:$4 sm:$0xff]   ;;  %351 = vmatprep.mubr.msk.bf16.mxu0 %vm182_vm0, %v389_v5  ;;  %v390_v13 = vld [vmem:[%s583_s0 + $0x40] ss:$8 sps:$4 sm:$0xff]   ;;  %v395_v15 = vld [vmem:[%s583_s0 + $0x54] ss:$8 sps:$4 sm:$0xff]  }
   0x5   :  { %355 = vmatprep.mubr.msk.bf16.mxu1 %vm182_vm0, %v392_v6  ;;  %v384_v9 = vld [vmem:[%s582_s1 + $0x8] sm:$0xff]   ;;  %v385_v10 = vld [vmem:[%s582_s1] sm:$0xff]   ;;  %v397_v16 = vld [vmem:[%s583_s0 + $0x10] ss:$8 sps:$4 sm:$0xff]  }
   0x6   :  { %210 = vmatpush1.bf16.msra.mxu0 %v379_v2  ;;  %369 = vmatpush1.bf16.msra.mxu1 %v379_v2  ;;  %v386_v11 = vld [vmem:[%s582_s1 + $0x40] sm:$0xff]   ;;  %v398_v17 = vld [vmem:[%s583_s0 + $0x50] ss:$8 sps:$4 sm:$0xff]   ;;  %v405_v22 = vld [vmem:[%s583_s0 + $0x34] ss:$8 sps:$4 sm:$0xff]  }
   0x7   :  { %211 = vmatprep.subr.bf16.mxu0 %v411_v0  ;;  %361 = vmatprep.subr.bf16.mxu1 %v411_v0  ;;  %v399_v18 = vld [vmem:[%s583_s0 + $0x24] ss:$8 sps:$4 sm:$0xff]   ;;  %v403_v20 = vld [vmem:[%s583_s0 + $0x20] ss:$8 sps:$4 sm:$0xff]   ;;  %v407_v23 = vld [vmem:[%s583_s0 + $0x74] ss:$8 sps:$4 sm:$0xff]  }
   0x8   :  { %v401_v19 = vld [vmem:[%s583_s0 + $0x64] ss:$8 sps:$4 sm:$0xff]   ;;  %v404_v21 = vld [vmem:[%s583_s0 + $0x60] ss:$8 sps:$4 sm:$0xff]   ;;  %v409_v24 = vld [vmem:[%s583_s0 + $0x30] ss:$8 sps:$4 sm:$0xff]  }
   0x9   :  { %v410_v25 = vld [vmem:[%s583_s0 + $0x70] ss:$8 sps:$4 sm:$0xff]   ;;  %v325_v26 = vld [vmem:[%s584_s2] ss:$0 sm:$0xff] }
   0xa   :  { %212 = vmatpush1.bf16.msra.mxu0 %v380_v3  ;;  %370 = vmatpush1.bf16.msra.mxu1 %v380_v3 }
   0xb   :  { %213 = vmatprep.subr.bf16.mxu0 %v411_v0  ;;  %362 = vmatprep.subr.bf16.mxu1 %v411_v0 }
   0xe   :  { %214 = vmatpush1.bf16.msra.mxu0 %v381_v4  ;;  %371 = vmatpush1.bf16.msra.mxu1 %v381_v4 }
   0xf   :  { %215 = vmatprep.subr.bf16.mxu0 %v411_v0  ;;  %363 = vmatprep.subr.bf16.mxu1 %v411_v0 }
  0x12   :  { %216 = vmatpush1.bf16.msra.mxu0 %v382_v7  ;;  %372 = vmatpush1.bf16.msra.mxu1 %v382_v7 }
  0x13   :  { %217 = vmatprep.subr.bf16.mxu0 %v411_v0  ;;  %364 = vmatprep.subr.bf16.mxu1 %v411_v0 }
  0x16   :  { %218 = vmatpush1.bf16.msra.mxu0 %v383_v8  ;;  %373 = vmatpush1.bf16.msra.mxu1 %v383_v8 }
  0x17   :  { %219 = vmatprep.subr.bf16.mxu0 %v411_v0  ;;  %365 = vmatprep.subr.bf16.mxu1 %v411_v0 }
  0x1a   :  { %220 = vmatpush1.bf16.msra.mxu0 %v384_v9  ;;  %374 = vmatpush1.bf16.msra.mxu1 %v384_v9 }
  0x1b   :  { %221 = vmatprep.subr.bf16.mxu0 %v411_v0  ;;  %366 = vmatprep.subr.bf16.mxu1 %v411_v0 }
  0x1e   :  { %222 = vmatpush1.bf16.msra.mxu0 %v385_v10  ;;  %375 = vmatpush1.bf16.msra.mxu1 %v385_v10 }
  0x1f   :  { %237 = vmatprep.subr.bf16.mxu0 %v411_v0  ;;  %367 = vmatprep.subr.bf16.mxu1 %v411_v0 }
  0x22   :  { %238 = vmatpush2.bf16.msra.mxu0 %v386_v11  ;;  %376 = vmatpush2.bf16.msra.mxu1 %v386_v11 }
  0x25   :  { %240 = vmatmul.mubr.bf16.vlgmr.msra.gmra.mxu0 %v387_v12  ;;  %272 = vmatmul.mubr.bf16.vlgmr.msra.gmra.mxu1 %v390_v13 }
  0x26   :  { %352 = vmatprep.mubr.msk.bf16.mxu0 %vm182_vm0, %v393_v14  ;;  %356 = vmatprep.mubr.msk.bf16.mxu1 %vm182_vm0, %v395_v15 }
  0x2d   :  { %248 = vmatmul.mubr.bf16.gmra.mxu0 %v397_v16  ;;  %280 = vmatmul.mubr.bf16.gmra.mxu1 %v398_v17 }
  0x2e   :  { %353 = vmatprep.mubr.msk.bf16.mxu0 %vm182_vm0, %v399_v18  ;;  %357 = vmatprep.mubr.msk.bf16.mxu1 %vm182_vm0, %v401_v19 }
  0x35   :  { %256 = vmatmul.mubr.bf16.gmra.mxu0 %v403_v20  ;;  %288 = vmatmul.mubr.bf16.gmra.mxu1 %v404_v21 }
  0x36   :  { %354 = vmatprep.mubr.msk.bf16.mxu0 %vm182_vm0, %v405_v22  ;;  %358 = vmatprep.mubr.msk.bf16.mxu1 %vm182_vm0, %v407_v23 }
  0x3d   :  { %264 = vmatmul.mubr.bf16.gmra.mxu0 %v409_v24  ;;  %296 = vmatmul.mubr.bf16.gmra.mxu1 %v410_v25 }
  0xe5   :  { %v241_v27 = vpop.f32.mrf.mxu0  ;;  %v273_v28 = vpop.f32.mrf.mxu1 }
  0xe6   :  { %v242_v29 = vadd.f32 %v325_v26, %v241_v27  ;;  %v274_v30 = vadd.f32 %v325_v26, %v273_v28 }
  0xe7   :  { %v243_v31 = vpop.f32.mrf.mxu0  ;;  %v275_v32 = vpop.f32.mrf.mxu1 }
  0xe8   :  { %305 = vst.msk [vmem:[%s585_s3] sm:$0xff] %vm304_vm1, %v242_v29  ;;  %313 = vst.msk [vmem:[%s585_s3 + $0x40] sm:$0xff] %vm304_vm1, %v274_v30 }
  0xe9   :  { %v244_v33 = vpop.f32.mrf.mxu0  ;;  %v276_v34 = vpop.f32.mrf.mxu1 }
  0xea   :  { %v245_v35 = vadd.f32 %v325_v26, %v244_v33  ;;  %v277_v36 = vadd.f32 %v325_v26, %v276_v34 }
  0xeb   :  { %v246_v37 = vpop.f32.mrf.mxu0  ;;  %v278_v38 = vpop.f32.mrf.mxu1 }
  0xec   :  { %306 = vst.msk [vmem:[%s585_s3 + $0x8] sm:$0xff] %vm304_vm1, %v245_v35  ;;  %314 = vst.msk [vmem:[%s585_s3 + $0x48] sm:$0xff] %vm304_vm1, %v277_v36 }
  0xed   :  { %v249_v39 = vpop.f32.mrf.mxu0  ;;  %v281_v40 = vpop.f32.mrf.mxu1 }
  0xee   :  { %v250_v41 = vadd.f32 %v325_v26, %v249_v39  ;;  %v282_v42 = vadd.f32 %v325_v26, %v281_v40 }
  0xef   :  { %v251_v43 = vpop.f32.mrf.mxu0  ;;  %v283_v44 = vpop.f32.mrf.mxu1 }
  0xf0   :  { %307 = vst.msk [vmem:[%s585_s3 + $0x10] sm:$0xff] %vm304_vm1, %v250_v41  ;;  %315 = vst.msk [vmem:[%s585_s3 + $0x50] sm:$0xff] %vm304_vm1, %v282_v42 }
  0xf1   :  { %v252_v45 = vpop.f32.mrf.mxu0  ;;  %v284_v46 = vpop.f32.mrf.mxu1 }
  0xf2   :  { %v253_v47 = vadd.f32 %v325_v26, %v252_v45  ;;  %v285_v48 = vadd.f32 %v325_v26, %v284_v46 }
  0xf3   :  { %v254_v49 = vpop.f32.mrf.mxu0  ;;  %v286_v50 = vpop.f32.mrf.mxu1 }
  0xf4   :  { %308 = vst.msk [vmem:[%s585_s3 + $0x18] sm:$0xff] %vm304_vm1, %v253_v47  ;;  %316 = vst.msk [vmem:[%s585_s3 + $0x58] sm:$0xff] %vm304_vm1, %v285_v48 }
  0xf5   :  { %v257_v51 = vpop.f32.mrf.mxu0  ;;  %v289_v52 = vpop.f32.mrf.mxu1 }
  0xf6   :  { %v258_v53 = vadd.f32 %v325_v26, %v257_v51  ;;  %v290_v54 = vadd.f32 %v325_v26, %v289_v52 }
  0xf7   :  { %v259_v55 = vpop.f32.mrf.mxu0  ;;  %v291_v56 = vpop.f32.mrf.mxu1 }
  0xf8   :  { %309 = vst.msk [vmem:[%s585_s3 + $0x20] sm:$0xff] %vm304_vm1, %v258_v53  ;;  %317 = vst.msk [vmem:[%s585_s3 + $0x60] sm:$0xff] %vm304_vm1, %v290_v54 }
  0xf9   :  { %v260_v57 = vpop.f32.mrf.mxu0  ;;  %v292_v58 = vpop.f32.mrf.mxu1 }
  0xfa   :  { %v261_v59 = vadd.f32 %v325_v26, %v260_v57  ;;  %v293_v60 = vadd.f32 %v325_v26, %v292_v58 }
  0xfb   :  { %v262_v61 = vpop.f32.mrf.mxu0  ;;  %v294_v62 = vpop.f32.mrf.mxu1 }
  0xfc   :  { %310 = vst.msk [vmem:[%s585_s3 + $0x28] sm:$0xff] %vm304_vm1, %v261_v59  ;;  %318 = vst.msk [vmem:[%s585_s3 + $0x68] sm:$0xff] %vm304_vm1, %v293_v60 }
  0xfd   :  { %v265_v63 = vpop.f32.mrf.mxu0  ;;  %v297_v0 = vpop.f32.mrf.mxu1 }
  0xfe   :  { %v266_v1 = vadd.f32 %v325_v26, %v265_v63  ;;  %v298_v2 = vadd.f32 %v325_v26, %v297_v0 }
  0xff   :  { %v267_v3 = vpop.f32.mrf.mxu0  ;;  %v299_v4 = vpop.f32.mrf.mxu1 }
 0x100   :  { %311 = vst.msk [vmem:[%s585_s3 + $0x30] sm:$0xff] %vm304_vm1, %v266_v1  ;;  %319 = vst.msk [vmem:[%s585_s3 + $0x70] sm:$0xff] %vm304_vm1, %v298_v2 }
 0x101   :  { %v268_v5 = vpop.f32.mrf.mxu0  ;;  %v300_v6 = vpop.f32.mrf.mxu1 }
 0x102   :  { %v269_v7 = vadd.f32 %v325_v26, %v268_v5  ;;  %v301_v8 = vadd.f32 %v325_v26, %v300_v6 }
 0x103   :  { %v270_v9 = vpop.f32.mrf.mxu0  ;;  %v302_v10 = vpop.f32.mrf.mxu1 }
 0x104   :  { %312 = vst.msk [vmem:[%s585_s3 + $0x38] sm:$0xff] %vm304_vm1, %v269_v7  ;;  %320 = vst.msk [vmem:[%s585_s3 + $0x78] sm:$0xff] %vm304_vm1, %v301_v8 }

// kernel: separate_impala_cnn_forward.52
= control target key start
LH: loop header
LB: loop body
LE: loop exit
PB: predicated region body
PF: predicated region fallthrough
CT: control target
= control target key end

     0   :  { %v411_v15 = vmov 0   ;;  %vm212_vm0 = vcmask 261120   ;;  %s531_s1 = inlined_call_operand.vmem [shape: bf16[288,32], index: 1, kind: input, shape index: {}]   ;;  %s532_s0 = inlined_call_operand.vmem [shape: bf16[32,288], index: 0, kind: input, shape index: {}]   ;;  %s533_s2 = inlined_call_operand.vmem [shape: f32[1,32], index: 2, kind: input, shape index: {}]   ;;  %s534_s3 = inlined_call_operand.vmem [shape: f32[32,32], index: 3, kind: output, shape index: {}]  }
   0x1   :  { %v393_v0 = vld [vmem:[%s531_s1 + $0x78] sm:$0xff]   ;;  %v395_v2 = vld [vmem:[%s531_s1 + $0x70] sm:$0xff]   ;;  %v397_v4 = vld [vmem:[%s531_s1 + $0x68] sm:$0xff]  }
   0x2   :  { %v394_v1 = vld [vmem:[%s531_s1 + $0x38] sm:$0xff]   ;;  %352 = vmatprep.subr.bf16.mxu0 %v393_v0  ;;  %v396_v3 = vld [vmem:[%s531_s1 + $0x30] sm:$0xff]   ;;  %v398_v5 = vld [vmem:[%s531_s1 + $0x28] sm:$0xff]  }
   0x3   :  { %353 = vmatpush3.bf16.msra.mxu0 %v394_v1  ;;  %v399_v6 = vld [vmem:[%s531_s1 + $0x60] sm:$0xff]   ;;  %v401_v8 = vld [vmem:[%s531_s1 + $0x58] sm:$0xff]   ;;  %v408_v10 = vld [vmem:[%s531_s1 + $0x88] sm:$0xff]  }
   0x4   :  { %354 = vmatprep.subr.bf16.mxu0 %v395_v2  ;;  %v400_v7 = vld [vmem:[%s531_s1 + $0x20] sm:$0xff]   ;;  %v402_v9 = vld [vmem:[%s531_s1 + $0x18] sm:$0xff]   ;;  %v403_v11 = vld [vmem:[%s531_s1 + $0x50] sm:$0xff]   ;;  %384 = vmatprep.subr.bf16.mxu1 %v408_v10 }
   0x5   :  { %v404_v12 = vld [vmem:[%s531_s1 + $0x10] sm:$0xff]   ;;  %v15_v13 = vld [vmem:[%s532_s0] sm:$0xff]  ;;  %385 = vmatpush3.bf16.msra.mxu1 %v408_v10  ;;  %v16_v19 = vld [vmem:[%s532_s0 + $0x8] sm:$0xf] }
   0x6   :  { %v17_v14 = vld [vmem:[%s532_s0 + $0xc] sm:$0xff]  ;;  %v23_v16 = vmax.bf16 %v411_v15, %v15_v13  ;;  %v410_v18 = vld [vmem:[%s531_s1 + $0x80] sm:$0xff]   ;;  %v18_v20 = vld [vmem:[%s532_s0 + $0x14] sm:$0xf]  ;;  %v24_v21 = vmax.bf16 %v411_v15, %v16_v19 }
   0x7   :  { %355 = vmatpush3.bf16.msra.mxu0 %v396_v3  ;;  %v25_v17 = vmax.bf16 %v411_v15, %v17_v14  ;;  %v20_v22 = vld [vmem:[%s532_s0 + $0x20] sm:$0xf]  ;;  %v22_v23 = vld [vmem:[%s532_s0 + $0x2c] sm:$0xf]  ;;  %386 = vmatprep.subr.bf16.mxu1 %v410_v18  ;;  %v26_v26 = vmax.bf16 %v411_v15, %v18_v20  ;;  %v19_v33 = vld [vmem:[%s532_s0 + $0x18] sm:$0xff] }
   0x8   :  { %356 = vmatprep.subr.bf16.mxu0 %v397_v4  ;;  %v405_v24 = vld [vmem:[%s531_s1 + $0x48] sm:$0xff]   ;;  %v28_v27 = vmax.bf16 %v411_v15, %v20_v22  ;;  %v30_v28 = vmax.bf16 %v411_v15, %v22_v23  ;;  %v407_v32 = vld [vmem:[%s531_s1 + $0x40] sm:$0xff]   ;;  %v27_v36 = vmax.bf16 %v411_v15, %v19_v33 }
   0x9   :  { %v327_v25 = vcombine.high %v23_v16, %v25_v17  ;;  %387 = vmatpush3.bf16.msra.mxu1 %v410_v18  ;;  %v328_v29 = vcombine.low %v24_v21, %v26_v26  ;;  %v406_v30 = vld [vmem:[%s531_s1 + $0x8] sm:$0xff]   ;;  %v409_v35 = vld [vmem:[%s531_s1] sm:$0xff]   ;;  %v326_v38 = vcombine.low %v23_v16, %v25_v17 }
   0xa   :  { %v331_v31 = vcombine.low %v28_v27, %v30_v28  ;;  %v21_v34 = vld [vmem:[%s532_s0 + $0x24] sm:$0xff]  ;;  %v325_v45 = vld [vmem:[%s533_s2] ss:$0 sm:$0xff] }
   0xb   :  { %357 = vmatpush3.bf16.msra.mxu0 %v398_v5  ;;  %251 = vmatprep.mubr.bf16.mxu0 %v327_v25  ;;  %v29_v37 = vmax.bf16 %v411_v15, %v21_v34 }
   0xc   :  { %358 = vmatprep.subr.bf16.mxu0 %v399_v6  ;;  %388 = vmatprep.mubr.msk.bf16.mxu1 %vm212_vm0, %v328_v29 }
   0xd   :  { %389 = vmatmul.mubr.msk.bf16.vlgmr.msra.gmra.mxu1 %vm212_vm0, %v331_v31  ;;  %v330_v39 = vcombine.high %v27_v36, %v29_v37  ;;  %v329_v40 = vcombine.low %v27_v36, %v29_v37 }
   0xf   :  { %359 = vmatpush3.bf16.msra.mxu0 %v400_v7 }
  0x10   :  { %360 = vmatprep.subr.bf16.mxu0 %v401_v8 }
  0x13   :  { %361 = vmatpush3.bf16.msra.mxu0 %v402_v9 }
  0x14   :  { %362 = vmatprep.subr.bf16.mxu0 %v403_v11 }
  0x17   :  { %363 = vmatpush3.bf16.msra.mxu0 %v404_v12 }
  0x18   :  { %364 = vmatprep.subr.bf16.mxu0 %v405_v24 }
  0x1b   :  { %365 = vmatpush3.bf16.msra.mxu0 %v406_v30 }
  0x1c   :  { %366 = vmatprep.subr.bf16.mxu0 %v407_v32 }
  0x1f   :  { %367 = vmatpush3.bf16.msra.mxu0 %v409_v35 }
  0x22   :  { %252 = vmatmul.mubr.bf16.vlgmr.msra.gmra.mxu0 %v326_v38 }
  0x23   :  { %259 = vmatprep.mubr.bf16.mxu0 %v330_v39 }
  0x2a   :  { %260 = vmatmul.mubr.bf16.gmra.mxu0 %v329_v40 }
  0xcd   :  { %v390_v41 = vpop.f32.mrf.mxu1 }
  0xcf   :  { %v302_v43 = vpop.f32.mrf.mxu1 }
  0xd1   :  { %v391_v48 = vpop.f32.mrf.mxu1 }
  0xd3   :  { %v305_v54 = vpop.f32.mrf.mxu1 }
  0xe2   :  { %v368_v42 = vpop.f32.mrf.mxu0 }
  0xe4   :  { %v369_v44 = vpop.f32.mrf.mxu0 }
  0xe5   :  { %v370_v46 = vadd.f32 %v369_v44, %v368_v42 }
  0xe6   :  { %v371_v47 = vpop.f32.mrf.mxu0 }
  0xe7   :  { %v254_v49 = vadd.f32 %v370_v46, %v325_v45 }
  0xe8   :  { %v372_v50 = vpop.f32.mrf.mxu0 }
  0xe9   :  { %v373_v51 = vadd.f32 %v372_v50, %v371_v47  ;;  %v303_v52 = vadd.f32 %v302_v43, %v254_v49 }
  0xea   :  { %v374_v53 = vpop.f32.mrf.mxu0 }
  0xeb   :  { %317 = vst.msk [vmem:[%s534_s3] sm:$0xff] %vm212_vm0, %v303_v52  ;;  %v257_v55 = vadd.f32 %v373_v51, %v325_v45 }
  0xec   :  { %v375_v56 = vpop.f32.mrf.mxu0 }
  0xed   :  { %v376_v57 = vadd.f32 %v375_v56, %v374_v53  ;;  %v306_v58 = vadd.f32 %v305_v54, %v257_v55 }
  0xee   :  { %v377_v59 = vpop.f32.mrf.mxu0 }
  0xef   :  { %v262_v60 = vadd.f32 %v376_v57, %v325_v45  ;;  %318 = vst.msk [vmem:[%s534_s3 + $0x8] sm:$0xff] %vm212_vm0, %v306_v58 }
  0xf0   :  { %v378_v61 = vpop.f32.mrf.mxu0 }
  0xf1   :  { %v311_v62 = vadd.f32 %v390_v41, %v262_v60  ;;  %v379_v63 = vadd.f32 %v378_v61, %v377_v59 }
  0xf3   :  { %319 = vst.msk [vmem:[%s534_s3 + $0x10] sm:$0xff] %vm212_vm0, %v311_v62  ;;  %v265_v0 = vadd.f32 %v379_v63, %v325_v45 }
  0xf5   :  { %v314_v1 = vadd.f32 %v391_v48, %v265_v0 }
  0xf7   :  { %320 = vst.msk [vmem:[%s534_s3 + $0x18] sm:$0xff] %vm212_vm0, %v314_v1 }

// kernel: reverse.3
= control target key start
LH: loop header
LB: loop body
LE: loop exit
PB: predicated region body
PF: predicated region fallthrough
CT: control target
= control target key end

     0   :  { %s1593_s0 = inlined_call_operand.vmem [shape: bf16[3,3,32,288], index: 0, kind: input, shape index: {}]   ;;  %s1594_s1 = inlined_call_operand.vmem [shape: bf16[3,3,32,288], index: 1, kind: output, shape index: {}]  }
   0x1   :  { %v1115_v0 = vld [vmem:[%s1593_s0 + $0x180] sm:$0xff]   ;;  %v1116_v1 = vld [vmem:[%s1593_s0 + $0xf0] sm:$0xff]   ;;  %v1133_v18 = vld [vmem:[%s1593_s0 + $0x198] sm:$0xff]  }
   0x2   :  { %v1117_v2 = vld [vmem:[%s1593_s0 + $0x60] sm:$0xff]   ;;  %902 = vst [vmem:[%s1594_s1] sm:$0xff] %v1115_v0  ;;  %v1118_v3 = vld [vmem:[%s1593_s0 + $0x150] sm:$0xff]   ;;  %906 = vst [vmem:[%s1594_s1 + $0x90] sm:$0xff] %v1116_v1 }
   0x3   :  { %910 = vst [vmem:[%s1594_s1 + $0x120] sm:$0xff] %v1117_v2  ;;  %v1119_v4 = vld [vmem:[%s1593_s0 + $0xc0] sm:$0xff]   ;;  %v1120_v5 = vld [vmem:[%s1593_s0 + $0x30] sm:$0xff]   ;;  %914 = vst [vmem:[%s1594_s1 + $0x30] sm:$0xff] %v1118_v3 }
   0x4   :  { %v1121_v6 = vld [vmem:[%s1593_s0 + $0x120] sm:$0xff]   ;;  %918 = vst [vmem:[%s1594_s1 + $0xc0] sm:$0xff] %v1119_v4  ;;  %922 = vst [vmem:[%s1594_s1 + $0x150] sm:$0xff] %v1120_v5  ;;  %v1122_v7 = vld [vmem:[%s1593_s0 + $0x90] sm:$0xff]  }
   0x5   :  { %v1123_v8 = vld [vmem:[%s1593_s0] sm:$0xff]   ;;  %926 = vst [vmem:[%s1594_s1 + $0x60] sm:$0xff] %v1121_v6  ;;  %v1124_v9 = vld [vmem:[%s1593_s0 + $0x18c] sm:$0xff]   ;;  %930 = vst [vmem:[%s1594_s1 + $0xf0] sm:$0xff] %v1122_v7 }
   0x6   :  { %934 = vst [vmem:[%s1594_s1 + $0x180] sm:$0xff] %v1123_v8  ;;  %v1125_v10 = vld [vmem:[%s1593_s0 + $0xfc] sm:$0xff]   ;;  %v1126_v11 = vld [vmem:[%s1593_s0 + $0x6c] sm:$0xff]   ;;  %938 = vst [vmem:[%s1594_s1 + $0xc] sm:$0xff] %v1124_v9 }
   0x7   :  { %v1127_v12 = vld [vmem:[%s1593_s0 + $0x15c] sm:$0xff]   ;;  %942 = vst [vmem:[%s1594_s1 + $0x9c] sm:$0xff] %v1125_v10  ;;  %946 = vst [vmem:[%s1594_s1 + $0x12c] sm:$0xff] %v1126_v11  ;;  %v1128_v13 = vld [vmem:[%s1593_s0 + $0xcc] sm:$0xff]  }
   0x8   :  { %v1129_v14 = vld [vmem:[%s1593_s0 + $0x3c] sm:$0xff]   ;;  %950 = vst [vmem:[%s1594_s1 + $0x3c] sm:$0xff] %v1127_v12  ;;  %v1130_v15 = vld [vmem:[%s1593_s0 + $0x12c] sm:$0xff]   ;;  %954 = vst [vmem:[%s1594_s1 + $0xcc] sm:$0xff] %v1128_v13 }
   0x9   :  { %958 = vst [vmem:[%s1594_s1 + $0x15c] sm:$0xff] %v1129_v14  ;;  %v1131_v16 = vld [vmem:[%s1593_s0 + $0x9c] sm:$0xff]   ;;  %v1132_v17 = vld [vmem:[%s1593_s0 + $0xc] sm:$0xff]   ;;  %962 = vst [vmem:[%s1594_s1 + $0x6c] sm:$0xff] %v1130_v15 }
   0xa   :  { %966 = vst [vmem:[%s1594_s1 + $0xfc] sm:$0xff] %v1131_v16  ;;  %970 = vst [vmem:[%s1594_s1 + $0x18c] sm:$0xff] %v1132_v17  ;;  %v1134_v19 = vld [vmem:[%s1593_s0 + $0x108] sm:$0xff]   ;;  %v1135_v20 = vld [vmem:[%s1593_s0 + $0x78] sm:$0xff]  }
   0xb   :  { %974 = vst [vmem:[%s1594_s1 + $0x18] sm:$0xff] %v1133_v18  ;;  %v1136_v21 = vld [vmem:[%s1593_s0 + $0x168] sm:$0xff]   ;;  %978 = vst [vmem:[%s1594_s1 + $0xa8] sm:$0xff] %v1134_v19  ;;  %v1137_v22 = vld [vmem:[%s1593_s0 + $0xd8] sm:$0xff]  }
   0xc   :  { %982 = vst [vmem:[%s1594_s1 + $0x138] sm:$0xff] %v1135_v20  ;;  %v1138_v23 = vld [vmem:[%s1593_s0 + $0x48] sm:$0xff]   ;;  %986 = vst [vmem:[%s1594_s1 + $0x48] sm:$0xff] %v1136_v21  ;;  %v1139_v24 = vld [vmem:[%s1593_s0 + $0x138] sm:$0xff]  }
   0xd   :  { %990 = vst [vmem:[%s1594_s1 + $0xd8] sm:$0xff] %v1137_v22  ;;  %994 = vst [vmem:[%s1594_s1 + $0x168] sm:$0xff] %v1138_v23  ;;  %v1140_v25 = vld [vmem:[%s1593_s0 + $0xa8] sm:$0xff]   ;;  %v1141_v26 = vld [vmem:[%s1593_s0 + $0x18] sm:$0xff]  }
   0xe   :  { %998 = vst [vmem:[%s1594_s1 + $0x78] sm:$0xff] %v1139_v24  ;;  %v1142_v27 = vld [vmem:[%s1593_s0 + $0x1a4] sm:$0xff]   ;;  %1002 = vst [vmem:[%s1594_s1 + $0x108] sm:$0xff] %v1140_v25  ;;  %v1143_v28 = vld [vmem:[%s1593_s0 + $0x114] sm:$0xff]  }
   0xf   :  { %1006 = vst [vmem:[%s1594_s1 + $0x198] sm:$0xff] %v1141_v26  ;;  %v1144_v29 = vld [vmem:[%s1593_s0 + $0x84] sm:$0xff]   ;;  %1010 = vst [vmem:[%s1594_s1 + $0x24] sm:$0xff] %v1142_v27  ;;  %v1145_v30 = vld [vmem:[%s1593_s0 + $0x174] sm:$0xff]  }
  0x10   :  { %1014 = vst [vmem:[%s1594_s1 + $0xb4] sm:$0xff] %v1143_v28  ;;  %1018 = vst [vmem:[%s1594_s1 + $0x144] sm:$0xff] %v1144_v29  ;;  %v1146_v31 = vld [vmem:[%s1593_s0 + $0xe4] sm:$0xff]   ;;  %v1147_v32 = vld [vmem:[%s1593_s0 + $0x54] sm:$0xff]  }
  0x11   :  { %1022 = vst [vmem:[%s1594_s1 + $0x54] sm:$0xff] %v1145_v30  ;;  %v1148_v33 = vld [vmem:[%s1593_s0 + $0x144] sm:$0xff]   ;;  %1026 = vst [vmem:[%s1594_s1 + $0xe4] sm:$0xff] %v1146_v31  ;;  %v1149_v34 = vld [vmem:[%s1593_s0 + $0xb4] sm:$0xff]  }
  0x12   :  { %1030 = vst [vmem:[%s1594_s1 + $0x174] sm:$0xff] %v1147_v32  ;;  %v1150_v35 = vld [vmem:[%s1593_s0 + $0x24] sm:$0xff]   ;;  %1034 = vst [vmem:[%s1594_s1 + $0x84] sm:$0xff] %v1148_v33  ;;  %v1045_v37 = vld [vmem:[%s1593_s0 + $0xf8] sm:$0xf] }
  0x13   :  { %v1043_v36 = vld [vmem:[%s1593_s0 + $0x188] sm:$0xf]  ;;  %1038 = vst [vmem:[%s1594_s1 + $0x114] sm:$0xff] %v1149_v34  ;;  %1042 = vst [vmem:[%s1594_s1 + $0x1a4] sm:$0xff] %v1150_v35  ;;  %v1049_v39 = vld [vmem:[%s1593_s0 + $0x158] sm:$0xf] }
  0x14   :  { %v1047_v38 = vld [vmem:[%s1593_s0 + $0x68] sm:$0xf]  ;;  %1044 = vst [vmem:[%s1594_s1 + $0x8] sm:$0xf] %v1043_v36  ;;  %1046 = vst [vmem:[%s1594_s1 + $0x98] sm:$0xf] %v1045_v37 }
  0x15   :  { %1048 = vst [vmem:[%s1594_s1 + $0x128] sm:$0xf] %v1047_v38  ;;  %v1051_v40 = vld [vmem:[%s1593_s0 + $0xc8] sm:$0xf]  ;;  %v1053_v41 = vld [vmem:[%s1593_s0 + $0x38] sm:$0xf] }
  0x16   :  { %1050 = vst [vmem:[%s1594_s1 + $0x38] sm:$0xf] %v1049_v39  ;;  %1052 = vst [vmem:[%s1594_s1 + $0xc8] sm:$0xf] %v1051_v40  ;;  %v1055_v42 = vld [vmem:[%s1593_s0 + $0x128] sm:$0xf] }
  0x17   :  { %1054 = vst [vmem:[%s1594_s1 + $0x158] sm:$0xf] %v1053_v41  ;;  %v1057_v43 = vld [vmem:[%s1593_s0 + $0x98] sm:$0xf]  ;;  %v1059_v44 = vld [vmem:[%s1593_s0 + $0x8] sm:$0xf] }
  0x18   :  { %1056 = vst [vmem:[%s1594_s1 + $0x68] sm:$0xf] %v1055_v42  ;;  %1058 = vst [vmem:[%s1594_s1 + $0xf8] sm:$0xf] %v1057_v43  ;;  %v1061_v45 = vld [vmem:[%s1593_s0 + $0x194] sm:$0xf] }
  0x19   :  { %1060 = vst [vmem:[%s1594_s1 + $0x188] sm:$0xf] %v1059_v44  ;;  %v1063_v46 = vld [vmem:[%s1593_s0 + $0x104] sm:$0xf]  ;;  %v1065_v47 = vld [vmem:[%s1593_s0 + $0x74] sm:$0xf] }
  0x1a   :  { %1062 = vst [vmem:[%s1594_s1 + $0x14] sm:$0xf] %v1061_v45  ;;  %1064 = vst [vmem:[%s1594_s1 + $0xa4] sm:$0xf] %v1063_v46  ;;  %v1067_v48 = vld [vmem:[%s1593_s0 + $0x164] sm:$0xf] }
  0x1b   :  { %1066 = vst [vmem:[%s1594_s1 + $0x134] sm:$0xf] %v1065_v47  ;;  %v1069_v49 = vld [vmem:[%s1593_s0 + $0xd4] sm:$0xf]  ;;  %v1071_v50 = vld [vmem:[%s1593_s0 + $0x44] sm:$0xf] }
  0x1c   :  { %1068 = vst [vmem:[%s1594_s1 + $0x44] sm:$0xf] %v1067_v48  ;;  %1070 = vst [vmem:[%s1594_s1 + $0xd4] sm:$0xf] %v1069_v49  ;;  %v1073_v51 = vld [vmem:[%s1593_s0 + $0x134] sm:$0xf] }
  0x1d   :  { %1072 = vst [vmem:[%s1594_s1 + $0x164] sm:$0xf] %v1071_v50  ;;  %v1075_v52 = vld [vmem:[%s1593_s0 + $0xa4] sm:$0xf]  ;;  %v1077_v53 = vld [vmem:[%s1593_s0 + $0x14] sm:$0xf] }
  0x1e   :  { %1074 = vst [vmem:[%s1594_s1 + $0x74] sm:$0xf] %v1073_v51  ;;  %1076 = vst [vmem:[%s1594_s1 + $0x104] sm:$0xf] %v1075_v52  ;;  %v1079_v54 = vld [vmem:[%s1593_s0 + $0x1a0] sm:$0xf] }
  0x1f   :  { %1078 = vst [vmem:[%s1594_s1 + $0x194] sm:$0xf] %v1077_v53  ;;  %v1081_v55 = vld [vmem:[%s1593_s0 + $0x110] sm:$0xf]  ;;  %v1083_v56 = vld [vmem:[%s1593_s0 + $0x80] sm:$0xf] }
  0x20   :  { %1080 = vst [vmem:[%s1594_s1 + $0x20] sm:$0xf] %v1079_v54  ;;  %1082 = vst [vmem:[%s1594_s1 + $0xb0] sm:$0xf] %v1081_v55  ;;  %v1085_v57 = vld [vmem:[%s1593_s0 + $0x170] sm:$0xf] }
  0x21   :  { %1084 = vst [vmem:[%s1594_s1 + $0x140] sm:$0xf] %v1083_v56  ;;  %v1087_v58 = vld [vmem:[%s1593_s0 + $0xe0] sm:$0xf]  ;;  %v1089_v59 = vld [vmem:[%s1593_s0 + $0x50] sm:$0xf] }
  0x22   :  { %1086 = vst [vmem:[%s1594_s1 + $0x50] sm:$0xf] %v1085_v57  ;;  %1088 = vst [vmem:[%s1594_s1 + $0xe0] sm:$0xf] %v1087_v58  ;;  %v1091_v60 = vld [vmem:[%s1593_s0 + $0x140] sm:$0xf] }
  0x23   :  { %1090 = vst [vmem:[%s1594_s1 + $0x170] sm:$0xf] %v1089_v59  ;;  %v1093_v61 = vld [vmem:[%s1593_s0 + $0xb0] sm:$0xf]  ;;  %v1095_v62 = vld [vmem:[%s1593_s0 + $0x20] sm:$0xf] }
  0x24   :  { %1092 = vst [vmem:[%s1594_s1 + $0x80] sm:$0xf] %v1091_v60  ;;  %1094 = vst [vmem:[%s1594_s1 + $0x110] sm:$0xf] %v1093_v61  ;;  %v1097_v63 = vld [vmem:[%s1593_s0 + $0x1ac] sm:$0xf] }
  0x25   :  { %1096 = vst [vmem:[%s1594_s1 + $0x1a0] sm:$0xf] %v1095_v62  ;;  %v1099_v0 = vld [vmem:[%s1593_s0 + $0x11c] sm:$0xf]  ;;  %v1101_v1 = vld [vmem:[%s1593_s0 + $0x8c] sm:$0xf] }
  0x26   :  { %1098 = vst [vmem:[%s1594_s1 + $0x2c] sm:$0xf] %v1097_v63  ;;  %1100 = vst [vmem:[%s1594_s1 + $0xbc] sm:$0xf] %v1099_v0  ;;  %v1103_v2 = vld [vmem:[%s1593_s0 + $0x17c] sm:$0xf] }
  0x27   :  { %1102 = vst [vmem:[%s1594_s1 + $0x14c] sm:$0xf] %v1101_v1  ;;  %v1105_v3 = vld [vmem:[%s1593_s0 + $0xec] sm:$0xf]  ;;  %v1107_v4 = vld [vmem:[%s1593_s0 + $0x5c] sm:$0xf] }
  0x28   :  { %1104 = vst [vmem:[%s1594_s1 + $0x5c] sm:$0xf] %v1103_v2  ;;  %1106 = vst [vmem:[%s1594_s1 + $0xec] sm:$0xf] %v1105_v3  ;;  %v1109_v5 = vld [vmem:[%s1593_s0 + $0x14c] sm:$0xf] }
  0x29   :  { %1108 = vst [vmem:[%s1594_s1 + $0x17c] sm:$0xf] %v1107_v4  ;;  %v1111_v6 = vld [vmem:[%s1593_s0 + $0xbc] sm:$0xf]  ;;  %v1113_v7 = vld [vmem:[%s1593_s0 + $0x2c] sm:$0xf] }
  0x2a   :  { %1110 = vst [vmem:[%s1594_s1 + $0x8c] sm:$0xf] %v1109_v5  ;;  %1112 = vst [vmem:[%s1594_s1 + $0x11c] sm:$0xf] %v1111_v6 }
  0x2b   :  { %1114 = vst [vmem:[%s1594_s1 + $0x1ac] sm:$0xf] %v1113_v7 }

// kernel: separate_impala_cnn_forward.56
= control target key start
LH: loop header
LB: loop body
LE: loop exit
PB: predicated region body
PF: predicated region fallthrough
CT: control target
= control target key end

     0   :  { %vm204_vm0 = vcmask 261120   ;;  %s523_s1 = inlined_call_operand.vmem [shape: bf16[288,32], index: 1, kind: input, shape index: {}]   ;;  %s524_s0 = inlined_call_operand.vmem [shape: bf16[32,288], index: 0, kind: input, shape index: {}]   ;;  %s525_s2 = inlined_call_operand.vmem [shape: f32[1,32], index: 2, kind: input, shape index: {}]   ;;  %s526_s3 = inlined_call_operand.vmem [shape: f32[32,32], index: 3, kind: output, shape index: {}]  }
   0x1   :  { %v384_v0 = vld [vmem:[%s523_s1 + $0x78] sm:$0xff]   ;;  %v386_v2 = vld [vmem:[%s523_s1 + $0x70] sm:$0xff]   ;;  %v388_v4 = vld [vmem:[%s523_s1 + $0x68] sm:$0xff]  }
   0x2   :  { %v385_v1 = vld [vmem:[%s523_s1 + $0x38] sm:$0xff]   ;;  %344 = vmatprep.subr.bf16.mxu0 %v384_v0  ;;  %v387_v3 = vld [vmem:[%s523_s1 + $0x30] sm:$0xff]   ;;  %v389_v5 = vld [vmem:[%s523_s1 + $0x28] sm:$0xff]  }
   0x3   :  { %345 = vmatpush3.bf16.msra.mxu0 %v385_v1  ;;  %v390_v6 = vld [vmem:[%s523_s1 + $0x60] sm:$0xff]   ;;  %v392_v8 = vld [vmem:[%s523_s1 + $0x58] sm:$0xff]   ;;  %v399_v10 = vld [vmem:[%s523_s1 + $0x88] sm:$0xff]  }
   0x4   :  { %346 = vmatprep.subr.bf16.mxu0 %v386_v2  ;;  %v391_v7 = vld [vmem:[%s523_s1 + $0x20] sm:$0xff]   ;;  %v393_v9 = vld [vmem:[%s523_s1 + $0x18] sm:$0xff]   ;;  %v394_v11 = vld [vmem:[%s523_s1 + $0x50] sm:$0xff]   ;;  %376 = vmatprep.subr.bf16.mxu1 %v399_v10 }
   0x5   :  { %v395_v12 = vld [vmem:[%s523_s1 + $0x10] sm:$0xff]   ;;  %v396_v13 = vld [vmem:[%s523_s1 + $0x48] sm:$0xff]   ;;  %377 = vmatpush3.bf16.msra.mxu1 %v399_v10  ;;  %v404_v15 = vld [vmem:[%s523_s1 + $0x80] sm:$0xff]  }
   0x6   :  { %v403_v14 = vld [vmem:[%s524_s0 + $0x4] ss:$12 sps:$4 sm:$0xff]   ;;  %v405_v16 = vld [vmem:[%s524_s0 + $0x8] ss:$12 sps:$4 sm:$0xff]   ;;  %378 = vmatprep.subr.bf16.mxu1 %v404_v15  ;;  %v406_v17 = vld [vmem:[%s524_s0 + $0x20] ss:$12 sps:$4 sm:$0xff]  }
   0x7   :  { %347 = vmatpush3.bf16.msra.mxu0 %v387_v3  ;;  %243 = vmatprep.mubr.bf16.mxu0 %v403_v14  ;;  %v397_v18 = vld [vmem:[%s523_s1 + $0x8] sm:$0xff]   ;;  %v398_v19 = vld [vmem:[%s523_s1 + $0x40] sm:$0xff]  }
   0x8   :  { %348 = vmatprep.subr.bf16.mxu0 %v388_v4  ;;  %380 = vmatprep.mubr.msk.bf16.mxu1 %vm204_vm0, %v405_v16  ;;  %v400_v20 = vld [vmem:[%s523_s1] sm:$0xff]   ;;  %v407_v22 = vld [vmem:[%s524_s0 + $0x1c] ss:$12 sps:$4 sm:$0xff]  }
   0x9   :  { %379 = vmatpush3.bf16.msra.mxu1 %v404_v15  ;;  %v401_v21 = vld [vmem:[%s524_s0] ss:$12 sps:$4 sm:$0xff]   ;;  %v409_v23 = vld [vmem:[%s524_s0 + $0x18] ss:$12 sps:$4 sm:$0xff]  }
   0xa   :  { %v317_v28 = vld [vmem:[%s525_s2] ss:$0 sm:$0xff] }
   0xb   :  { %349 = vmatpush3.bf16.msra.mxu0 %v389_v5 }
   0xc   :  { %350 = vmatprep.subr.bf16.mxu0 %v390_v6  ;;  %381 = vmatmul.mubr.msk.bf16.vlgmr.msra.gmra.mxu1 %vm204_vm0, %v406_v17 }
   0xf   :  { %351 = vmatpush3.bf16.msra.mxu0 %v391_v7 }
  0x10   :  { %352 = vmatprep.subr.bf16.mxu0 %v392_v8 }
  0x13   :  { %353 = vmatpush3.bf16.msra.mxu0 %v393_v9 }
  0x14   :  { %354 = vmatprep.subr.bf16.mxu0 %v394_v11 }
  0x17   :  { %355 = vmatpush3.bf16.msra.mxu0 %v395_v12 }
  0x18   :  { %356 = vmatprep.subr.bf16.mxu0 %v396_v13 }
  0x1b   :  { %357 = vmatpush3.bf16.msra.mxu0 %v397_v18 }
  0x1c   :  { %358 = vmatprep.subr.bf16.mxu0 %v398_v19 }
  0x1f   :  { %359 = vmatpush3.bf16.msra.mxu0 %v400_v20 }
  0x22   :  { %244 = vmatmul.mubr.bf16.vlgmr.msra.gmra.mxu0 %v401_v21 }
  0x23   :  { %251 = vmatprep.mubr.bf16.mxu0 %v407_v22 }
  0x2a   :  { %252 = vmatmul.mubr.bf16.gmra.mxu0 %v409_v23 }
  0xcc   :  { %v382_v24 = vpop.f32.mrf.mxu1 }
  0xce   :  { %v294_v26 = vpop.f32.mrf.mxu1 }
  0xd0   :  { %v383_v31 = vpop.f32.mrf.mxu1 }
  0xd2   :  { %v297_v37 = vpop.f32.mrf.mxu1 }
  0xe2   :  { %v360_v25 = vpop.f32.mrf.mxu0 }
  0xe4   :  { %v361_v27 = vpop.f32.mrf.mxu0 }
  0xe5   :  { %v362_v29 = vadd.f32 %v361_v27, %v360_v25 }
  0xe6   :  { %v363_v30 = vpop.f32.mrf.mxu0 }
  0xe7   :  { %v246_v32 = vadd.f32 %v362_v29, %v317_v28 }
  0xe8   :  { %v364_v33 = vpop.f32.mrf.mxu0 }
  0xe9   :  { %v365_v34 = vadd.f32 %v364_v33, %v363_v30  ;;  %v295_v35 = vadd.f32 %v294_v26, %v246_v32 }
  0xea   :  { %v366_v36 = vpop.f32.mrf.mxu0 }
  0xeb   :  { %309 = vst.msk [vmem:[%s526_s3] sm:$0xff] %vm204_vm0, %v295_v35  ;;  %v249_v38 = vadd.f32 %v365_v34, %v317_v28 }
  0xec   :  { %v367_v39 = vpop.f32.mrf.mxu0 }
  0xed   :  { %v368_v40 = vadd.f32 %v367_v39, %v366_v36  ;;  %v298_v41 = vadd.f32 %v297_v37, %v249_v38 }
  0xee   :  { %v369_v42 = vpop.f32.mrf.mxu0 }
  0xef   :  { %v254_v43 = vadd.f32 %v368_v40, %v317_v28  ;;  %310 = vst.msk [vmem:[%s526_s3 + $0x8] sm:$0xff] %vm204_vm0, %v298_v41 }
  0xf0   :  { %v370_v44 = vpop.f32.mrf.mxu0 }
  0xf1   :  { %v303_v45 = vadd.f32 %v382_v24, %v254_v43  ;;  %v371_v46 = vadd.f32 %v370_v44, %v369_v42 }
  0xf3   :  { %311 = vst.msk [vmem:[%s526_s3 + $0x10] sm:$0xff] %vm204_vm0, %v303_v45  ;;  %v257_v47 = vadd.f32 %v371_v46, %v317_v28 }
  0xf5   :  { %v306_v48 = vadd.f32 %v383_v31, %v257_v47 }
  0xf7   :  { %312 = vst.msk [vmem:[%s526_s3 + $0x18] sm:$0xff] %vm204_vm0, %v306_v48 }

// kernel: separate_impala_cnn_forward.53
= control target key start
LH: loop header
LB: loop body
LE: loop exit
PB: predicated region body
PF: predicated region fallthrough
CT: control target
= control target key end

     0   :  { %v422_v15 = vmov 0   ;;  %vm215_vm0 = vcmask 261120   ;;  %s559_s1 = inlined_call_operand.vmem [shape: bf16[288,32], index: 1, kind: input, shape index: {}]   ;;  %s560_s0 = inlined_call_operand.vmem [shape: bf16[32,288], index: 0, kind: input, shape index: {}]   ;;  %s561_s2 = inlined_call_operand.vmem [shape: f32[1,32], index: 2, kind: input, shape index: {}]   ;;  %s562_s3 = inlined_call_operand.vmem [shape: f32[32,32], index: 3, kind: input, shape index: {}]   ;;  %s563_s4 = inlined_call_operand.vmem [shape: f32[32,32], index: 4, kind: output, shape index: {}]  }
   0x1   :  { %v404_v0 = vld [vmem:[%s559_s1 + $0x78] sm:$0xff]   ;;  %v406_v2 = vld [vmem:[%s559_s1 + $0x70] sm:$0xff]   ;;  %v408_v4 = vld [vmem:[%s559_s1 + $0x68] sm:$0xff]  }
   0x2   :  { %v405_v1 = vld [vmem:[%s559_s1 + $0x38] sm:$0xff]   ;;  %363 = vmatprep.subr.bf16.mxu0 %v404_v0  ;;  %v407_v3 = vld [vmem:[%s559_s1 + $0x30] sm:$0xff]   ;;  %v409_v5 = vld [vmem:[%s559_s1 + $0x28] sm:$0xff]  }
   0x3   :  { %364 = vmatpush3.bf16.msra.mxu0 %v405_v1  ;;  %v410_v6 = vld [vmem:[%s559_s1 + $0x60] sm:$0xff]   ;;  %v412_v8 = vld [vmem:[%s559_s1 + $0x58] sm:$0xff]   ;;  %v419_v10 = vld [vmem:[%s559_s1 + $0x88] sm:$0xff]  }
   0x4   :  { %365 = vmatprep.subr.bf16.mxu0 %v406_v2  ;;  %v411_v7 = vld [vmem:[%s559_s1 + $0x20] sm:$0xff]   ;;  %v413_v9 = vld [vmem:[%s559_s1 + $0x18] sm:$0xff]   ;;  %v414_v11 = vld [vmem:[%s559_s1 + $0x50] sm:$0xff]   ;;  %395 = vmatprep.subr.bf16.mxu1 %v419_v10 }
   0x5   :  { %v415_v12 = vld [vmem:[%s559_s1 + $0x10] sm:$0xff]   ;;  %v18_v13 = vld [vmem:[%s560_s0] sm:$0xff]  ;;  %396 = vmatpush3.bf16.msra.mxu1 %v419_v10  ;;  %v19_v19 = vld [vmem:[%s560_s0 + $0x8] sm:$0xf] }
   0x6   :  { %v20_v14 = vld [vmem:[%s560_s0 + $0xc] sm:$0xff]  ;;  %v26_v16 = vmax.bf16 %v422_v15, %v18_v13  ;;  %v421_v18 = vld [vmem:[%s559_s1 + $0x80] sm:$0xff]   ;;  %v21_v20 = vld [vmem:[%s560_s0 + $0x14] sm:$0xf]  ;;  %v27_v21 = vmax.bf16 %v422_v15, %v19_v19 }
   0x7   :  { %366 = vmatpush3.bf16.msra.mxu0 %v407_v3  ;;  %v28_v17 = vmax.bf16 %v422_v15, %v20_v14  ;;  %v23_v22 = vld [vmem:[%s560_s0 + $0x20] sm:$0xf]  ;;  %v25_v23 = vld [vmem:[%s560_s0 + $0x2c] sm:$0xf]  ;;  %397 = vmatprep.subr.bf16.mxu1 %v421_v18  ;;  %v29_v26 = vmax.bf16 %v422_v15, %v21_v20  ;;  %v22_v33 = vld [vmem:[%s560_s0 + $0x18] sm:$0xff] }
   0x8   :  { %367 = vmatprep.subr.bf16.mxu0 %v408_v4  ;;  %v416_v24 = vld [vmem:[%s559_s1 + $0x48] sm:$0xff]   ;;  %v31_v27 = vmax.bf16 %v422_v15, %v23_v22  ;;  %v33_v28 = vmax.bf16 %v422_v15, %v25_v23  ;;  %v418_v32 = vld [vmem:[%s559_s1 + $0x40] sm:$0xff]   ;;  %v30_v36 = vmax.bf16 %v422_v15, %v22_v33  ;;  %v322_v1 = vld [vmem:[%s562_s3 + $0x10] sm:$0xff] }
   0x9   :  { %v338_v25 = vcombine.high %v26_v16, %v28_v17  ;;  %398 = vmatpush3.bf16.msra.mxu1 %v421_v18  ;;  %v339_v29 = vcombine.low %v27_v21, %v29_v26  ;;  %v417_v30 = vld [vmem:[%s559_s1 + $0x8] sm:$0xff]   ;;  %v420_v35 = vld [vmem:[%s559_s1] sm:$0xff]   ;;  %v337_v38 = vcombine.low %v26_v16, %v28_v17 }
   0xa   :  { %v342_v31 = vcombine.low %v31_v27, %v33_v28  ;;  %v24_v34 = vld [vmem:[%s560_s0 + $0x24] sm:$0xff]  ;;  %v336_v45 = vld [vmem:[%s561_s2] ss:$0 sm:$0xff] }
   0xb   :  { %368 = vmatpush3.bf16.msra.mxu0 %v409_v5  ;;  %254 = vmatprep.mubr.bf16.mxu0 %v338_v25  ;;  %v32_v37 = vmax.bf16 %v422_v15, %v24_v34  ;;  %v320_v51 = vld [vmem:[%s562_s3] sm:$0xff]  ;;  %v321_v59 = vld [vmem:[%s562_s3 + $0x8] sm:$0xff] }
   0xc   :  { %369 = vmatprep.subr.bf16.mxu0 %v410_v6  ;;  %399 = vmatprep.mubr.msk.bf16.mxu1 %vm215_vm0, %v339_v29 }
   0xd   :  { %400 = vmatmul.mubr.msk.bf16.vlgmr.msra.gmra.mxu1 %vm215_vm0, %v342_v31  ;;  %v341_v39 = vcombine.high %v30_v36, %v32_v37  ;;  %v340_v40 = vcombine.low %v30_v36, %v32_v37 }
   0xf   :  { %370 = vmatpush3.bf16.msra.mxu0 %v411_v7  ;;  %v323_v7 = vld [vmem:[%s562_s3 + $0x18] sm:$0xff] }
  0x10   :  { %371 = vmatprep.subr.bf16.mxu0 %v412_v8 }
  0x13   :  { %372 = vmatpush3.bf16.msra.mxu0 %v413_v9 }
  0x14   :  { %373 = vmatprep.subr.bf16.mxu0 %v414_v11 }
  0x17   :  { %374 = vmatpush3.bf16.msra.mxu0 %v415_v12 }
  0x18   :  { %375 = vmatprep.subr.bf16.mxu0 %v416_v24 }
  0x1b   :  { %376 = vmatpush3.bf16.msra.mxu0 %v417_v30 }
  0x1c   :  { %377 = vmatprep.subr.bf16.mxu0 %v418_v32 }
  0x1f   :  { %378 = vmatpush3.bf16.msra.mxu0 %v420_v35 }
  0x22   :  { %255 = vmatmul.mubr.bf16.vlgmr.msra.gmra.mxu0 %v337_v38 }
  0x23   :  { %262 = vmatprep.mubr.bf16.mxu0 %v341_v39 }
  0x2a   :  { %263 = vmatmul.mubr.bf16.gmra.mxu0 %v340_v40 }
  0xcd   :  { %v401_v41 = vpop.f32.mrf.mxu1 }
  0xcf   :  { %v305_v43 = vpop.f32.mrf.mxu1 }
  0xd1   :  { %v402_v48 = vpop.f32.mrf.mxu1 }
  0xd3   :  { %v308_v55 = vpop.f32.mrf.mxu1 }
  0xe2   :  { %v379_v42 = vpop.f32.mrf.mxu0 }
  0xe4   :  { %v380_v44 = vpop.f32.mrf.mxu0 }
  0xe5   :  { %v381_v46 = vadd.f32 %v380_v44, %v379_v42 }
  0xe6   :  { %v382_v47 = vpop.f32.mrf.mxu0 }
  0xe7   :  { %v257_v49 = vadd.f32 %v381_v46, %v336_v45 }
  0xe8   :  { %v383_v50 = vpop.f32.mrf.mxu0 }
  0xe9   :  { %v384_v52 = vadd.f32 %v383_v50, %v382_v47  ;;  %v306_v53 = vadd.f32 %v305_v43, %v257_v49 }
  0xea   :  { %v385_v54 = vpop.f32.mrf.mxu0 }
  0xeb   :  { %v324_v56 = vadd.f32 %v320_v51, %v306_v53  ;;  %v260_v57 = vadd.f32 %v384_v52, %v336_v45 }
  0xec   :  { %v386_v58 = vpop.f32.mrf.mxu0 }
  0xed   :  { %328 = vst.msk [vmem:[%s563_s4] sm:$0xff] %vm215_vm0, %v324_v56  ;;  %v387_v60 = vadd.f32 %v386_v58, %v385_v54  ;;  %v309_v61 = vadd.f32 %v308_v55, %v260_v57 }
  0xee   :  { %v388_v62 = vpop.f32.mrf.mxu0 }
  0xef   :  { %v265_v63 = vadd.f32 %v387_v60, %v336_v45  ;;  %v325_v0 = vadd.f32 %v321_v59, %v309_v61 }
  0xf0   :  { %v389_v2 = vpop.f32.mrf.mxu0 }
  0xf1   :  { %v314_v3 = vadd.f32 %v401_v41, %v265_v63  ;;  %329 = vst.msk [vmem:[%s563_s4 + $0x8] sm:$0xff] %vm215_vm0, %v325_v0  ;;  %v390_v4 = vadd.f32 %v389_v2, %v388_v62 }
  0xf3   :  { %v326_v5 = vadd.f32 %v322_v1, %v314_v3  ;;  %v268_v6 = vadd.f32 %v390_v4, %v336_v45 }
  0xf5   :  { %330 = vst.msk [vmem:[%s563_s4 + $0x10] sm:$0xff] %vm215_vm0, %v326_v5  ;;  %v317_v8 = vadd.f32 %v402_v48, %v268_v6 }
  0xf7   :  { %v327_v9 = vadd.f32 %v323_v7, %v317_v8 }
  0xf9   :  { %331 = vst.msk [vmem:[%s563_s4 + $0x18] sm:$0xff] %vm215_vm0, %v327_v9 }

// kernel: separate_impala_cnn_forward.57
= control target key start
LH: loop header
LB: loop body
LE: loop exit
PB: predicated region body
PF: predicated region fallthrough
CT: control target
= control target key end

     0   :  { %v346_v1 = vmov 0.0   ;;  %vm347_vm0 = vmmov 0   ;;  %v348_v17 = vmov 0   ;;  %vm180_vm1 = vcmask 261120   ;;  %s437_s1 = inlined_call_operand.vmem [shape: bf16[288,32], index: 1, kind: input, shape index: {}]   ;;  %s438_s0 = inlined_call_operand.vmem [shape: bf16[8,288], index: 0, kind: input, shape index: {}]   ;;  %s439_s2 = inlined_call_operand.vmem [shape: f32[1,32], index: 2, kind: input, shape index: {}]   ;;  %s440_s3 = inlined_call_operand.vmem [shape: f32[8,32], index: 3, kind: output, shape index: {}]  }
   0x1   :  { %v328_v0 = vld [vmem:[%s437_s1 + $0x78] sm:$0xff]   ;;  %317 = vmatprep.subr.bf16.mxu1 %v346_v1  ;;  %321 = vmatprep.mubr.msk.bf16.mxu1 %vm347_vm0, %v346_v1  ;;  %v330_v3 = vld [vmem:[%s437_s1 + $0x70] sm:$0xff]   ;;  %v332_v5 = vld [vmem:[%s437_s1 + $0x68] sm:$0xff]  }
   0x2   :  { %v329_v2 = vld [vmem:[%s437_s1 + $0x38] sm:$0xff]   ;;  %292 = vmatprep.subr.bf16.mxu0 %v328_v0  ;;  %v331_v4 = vld [vmem:[%s437_s1 + $0x30] sm:$0xff]   ;;  %v333_v6 = vld [vmem:[%s437_s1 + $0x28] sm:$0xff]  }
   0x3   :  { %293 = vmatpush3.bf16.msra.mxu0 %v329_v2  ;;  %v334_v7 = vld [vmem:[%s437_s1 + $0x60] sm:$0xff]   ;;  %v336_v9 = vld [vmem:[%s437_s1 + $0x58] sm:$0xff]   ;;  %v340_v10 = vld [vmem:[%s437_s1 + $0x88] sm:$0xff]  }
   0x4   :  { %294 = vmatprep.subr.bf16.mxu0 %v330_v3  ;;  %v335_v8 = vld [vmem:[%s437_s1 + $0x20] sm:$0xff]   ;;  %v337_v11 = vld [vmem:[%s437_s1 + $0x18] sm:$0xff]   ;;  %318 = vmatpush3.bf16.msra.mxu1 %v340_v10  ;;  %v338_v13 = vld [vmem:[%s437_s1 + $0x50] sm:$0xff]  }
   0x5   :  { %319 = vmatprep.subr.bf16.mxu1 %v346_v1  ;;  %v343_v12 = vld [vmem:[%s437_s1 + $0x80] sm:$0xff]   ;;  %v16_v14 = vld [vmem:[%s438_s0 + $0x8] sm:$0xf]  ;;  %v339_v16 = vld [vmem:[%s437_s1 + $0x10] sm:$0xff]  }
   0x6   :  { %v15_v15 = vld [vmem:[%s438_s0] sm:$0xff]  ;;  %v18_v18 = vmax.bf16 %v348_v17, %v16_v14  ;;  %v341_v20 = vld [vmem:[%s437_s1 + $0x48] sm:$0xff]  }
   0x7   :  { %295 = vmatpush3.bf16.msra.mxu0 %v331_v4  ;;  %v17_v19 = vmax.bf16 %v348_v17, %v15_v15  ;;  %v342_v23 = vld [vmem:[%s437_s1 + $0x8] sm:$0xff]   ;;  %v344_v24 = vld [vmem:[%s437_s1 + $0x40] sm:$0xff]  }
   0x8   :  { %296 = vmatprep.subr.bf16.mxu0 %v332_v5  ;;  %320 = vmatpush3.bf16.msra.mxu1 %v343_v12  ;;  %v272_v21 = vcombine.low %v18_v18, %v18_v18  ;;  %v345_v25 = vld [vmem:[%s437_s1] sm:$0xff]  }
   0x9   :  { %v271_v22 = vcombine.high %v17_v19, %v17_v19  ;;  %v270_v26 = vcombine.low %v17_v19, %v17_v19  ;;  %v269_v32 = vld [vmem:[%s439_s2] ss:$0 sm:$0xff] }
   0xb   :  { %297 = vmatpush3.bf16.msra.mxu0 %v333_v6  ;;  %322 = vmatmul.mubr.msk.bf16.vlgmr.msra.gmra.mxu1 %vm180_vm1, %v272_v21 }
   0xc   :  { %298 = vmatprep.subr.bf16.mxu0 %v334_v7  ;;  %216 = vmatprep.mubr.bf16.mxu0 %v271_v22 }
   0xf   :  { %299 = vmatpush3.bf16.msra.mxu0 %v335_v8 }
  0x10   :  { %300 = vmatprep.subr.bf16.mxu0 %v336_v9 }
  0x13   :  { %301 = vmatpush3.bf16.msra.mxu0 %v337_v11 }
  0x14   :  { %302 = vmatprep.subr.bf16.mxu0 %v338_v13 }
  0x17   :  { %303 = vmatpush3.bf16.msra.mxu0 %v339_v16 }
  0x18   :  { %304 = vmatprep.subr.bf16.mxu0 %v341_v20 }
  0x1b   :  { %305 = vmatpush3.bf16.msra.mxu0 %v342_v23 }
  0x1c   :  { %306 = vmatprep.subr.bf16.mxu0 %v344_v24 }
  0x1f   :  { %307 = vmatpush3.bf16.msra.mxu0 %v345_v25 }
  0x22   :  { %217 = vmatmul.mubr.bf16.vlgmr.msra.gmra.mxu0 %v270_v26 }
  0xcb   :  { %v258_v27 = vpop.f32.mrf.mxu1 }
  0xcd   :  { %v323_v28 = vpop.f32.mrf.mxu1 }
  0xcf   :  { %v261_v29 = vpop.f32.mrf.mxu1 }
  0xd1   :  { %v324_v30 = vpop.f32.mrf.mxu1 }
  0xe2   :  { %v308_v31 = vpop.f32.mrf.mxu0 }
  0xe4   :  { %v309_v33 = vpop.f32.mrf.mxu0 }
  0xe5   :  { %v310_v34 = vadd.f32 %v309_v33, %v308_v31 }
  0xe6   :  { %v311_v35 = vpop.f32.mrf.mxu0 }
  0xe7   :  { %v219_v36 = vadd.f32 %v310_v34, %v269_v32 }
  0xe8   :  { %v312_v37 = vpop.f32.mrf.mxu0 }
  0xe9   :  { %v259_v38 = vadd.f32 %v258_v27, %v219_v36 }
  0xeb   :  { %264 = vst.msk [vmem:[%s440_s3] sm:$0xff] %vm180_vm1, %v259_v38 }

// kernel: separate_impala_cnn_forward.58
= control target key start
LH: loop header
LB: loop body
LE: loop exit
PB: predicated region body
PF: predicated region fallthrough
CT: control target
= control target key end

     0   :  { %v351_v1 = vmov 0.0   ;;  %vm352_vm0 = vmmov 0   ;;  %v353_v17 = vmov 0   ;;  %vm183_vm1 = vcmask 261120   ;;  %s450_s1 = inlined_call_operand.vmem [shape: bf16[288,32], index: 1, kind: input, shape index: {}]   ;;  %s451_s0 = inlined_call_operand.vmem [shape: bf16[8,288], index: 0, kind: input, shape index: {}]   ;;  %s452_s2 = inlined_call_operand.vmem [shape: f32[1,32], index: 2, kind: input, shape index: {}]   ;;  %s453_s3 = inlined_call_operand.vmem [shape: f32[8,32], index: 3, kind: input, shape index: {}]   ;;  %s454_s4 = inlined_call_operand.vmem [shape: f32[8,32], index: 4, kind: output, shape index: {}]  }
   0x1   :  { %v333_v0 = vld [vmem:[%s450_s1 + $0x78] sm:$0xff]   ;;  %322 = vmatprep.subr.bf16.mxu1 %v351_v1  ;;  %326 = vmatprep.mubr.msk.bf16.mxu1 %vm352_vm0, %v351_v1  ;;  %v335_v3 = vld [vmem:[%s450_s1 + $0x70] sm:$0xff]   ;;  %v337_v5 = vld [vmem:[%s450_s1 + $0x68] sm:$0xff]  }
   0x2   :  { %v334_v2 = vld [vmem:[%s450_s1 + $0x38] sm:$0xff]   ;;  %297 = vmatprep.subr.bf16.mxu0 %v333_v0  ;;  %v336_v4 = vld [vmem:[%s450_s1 + $0x30] sm:$0xff]   ;;  %v338_v6 = vld [vmem:[%s450_s1 + $0x28] sm:$0xff]  }
   0x3   :  { %298 = vmatpush3.bf16.msra.mxu0 %v334_v2  ;;  %v339_v7 = vld [vmem:[%s450_s1 + $0x60] sm:$0xff]   ;;  %v341_v9 = vld [vmem:[%s450_s1 + $0x58] sm:$0xff]   ;;  %v346_v10 = vld [vmem:[%s450_s1 + $0x88] sm:$0xff]  }
   0x4   :  { %299 = vmatprep.subr.bf16.mxu0 %v335_v3  ;;  %v340_v8 = vld [vmem:[%s450_s1 + $0x20] sm:$0xff]   ;;  %v342_v11 = vld [vmem:[%s450_s1 + $0x18] sm:$0xff]   ;;  %v343_v12 = vld [vmem:[%s450_s1 + $0x50] sm:$0xff]   ;;  %323 = vmatpush3.bf16.msra.mxu1 %v346_v10 }
   0x5   :  { %324 = vmatprep.subr.bf16.mxu1 %v351_v1  ;;  %v349_v13 = vld [vmem:[%s450_s1 + $0x80] sm:$0xff]   ;;  %v19_v15 = vld [vmem:[%s451_s0 + $0x8] sm:$0xf]  ;;  %v344_v16 = vld [vmem:[%s450_s1 + $0x10] sm:$0xff]  }
   0x6   :  { %v18_v14 = vld [vmem:[%s451_s0] sm:$0xff]  ;;  %v21_v19 = vmax.bf16 %v353_v17, %v19_v15  ;;  %v345_v20 = vld [vmem:[%s450_s1 + $0x48] sm:$0xff]  }
   0x7   :  { %300 = vmatpush3.bf16.msra.mxu0 %v336_v4  ;;  %v20_v18 = vmax.bf16 %v353_v17, %v18_v14  ;;  %v347_v23 = vld [vmem:[%s450_s1 + $0x8] sm:$0xff]   ;;  %v348_v24 = vld [vmem:[%s450_s1 + $0x40] sm:$0xff]  }
   0x8   :  { %301 = vmatprep.subr.bf16.mxu0 %v337_v5  ;;  %325 = vmatpush3.bf16.msra.mxu1 %v349_v13  ;;  %v277_v22 = vcombine.low %v21_v19, %v21_v19  ;;  %v350_v25 = vld [vmem:[%s450_s1] sm:$0xff]  }
   0x9   :  { %v276_v21 = vcombine.high %v20_v18, %v20_v18  ;;  %v275_v26 = vcombine.low %v20_v18, %v20_v18  ;;  %v274_v32 = vld [vmem:[%s452_s2] ss:$0 sm:$0xff] }
   0xa   :  { %v267_v37 = vld [vmem:[%s453_s3] sm:$0xff] }
   0xb   :  { %302 = vmatpush3.bf16.msra.mxu0 %v338_v6  ;;  %219 = vmatprep.mubr.bf16.mxu0 %v276_v21 }
   0xc   :  { %303 = vmatprep.subr.bf16.mxu0 %v339_v7  ;;  %327 = vmatmul.mubr.msk.bf16.vlgmr.msra.gmra.mxu1 %vm183_vm1, %v277_v22 }
   0xf   :  { %304 = vmatpush3.bf16.msra.mxu0 %v340_v8 }
  0x10   :  { %305 = vmatprep.subr.bf16.mxu0 %v341_v9 }
  0x13   :  { %306 = vmatpush3.bf16.msra.mxu0 %v342_v11 }
  0x14   :  { %307 = vmatprep.subr.bf16.mxu0 %v343_v12 }
  0x17   :  { %308 = vmatpush3.bf16.msra.mxu0 %v344_v16 }
  0x18   :  { %309 = vmatprep.subr.bf16.mxu0 %v345_v20 }
  0x1b   :  { %310 = vmatpush3.bf16.msra.mxu0 %v347_v23 }
  0x1c   :  { %311 = vmatprep.subr.bf16.mxu0 %v348_v24 }
  0x1f   :  { %312 = vmatpush3.bf16.msra.mxu0 %v350_v25 }
  0x22   :  { %220 = vmatmul.mubr.bf16.vlgmr.msra.gmra.mxu0 %v275_v26 }
  0xcc   :  { %v261_v27 = vpop.f32.mrf.mxu1 }
  0xce   :  { %v328_v28 = vpop.f32.mrf.mxu1 }
  0xd0   :  { %v264_v29 = vpop.f32.mrf.mxu1 }
  0xd2   :  { %v329_v30 = vpop.f32.mrf.mxu1 }
  0xe2   :  { %v313_v31 = vpop.f32.mrf.mxu0 }
  0xe4   :  { %v314_v33 = vpop.f32.mrf.mxu0 }
  0xe5   :  { %v315_v34 = vadd.f32 %v314_v33, %v313_v31 }
  0xe6   :  { %v316_v35 = vpop.f32.mrf.mxu0 }
  0xe7   :  { %v222_v36 = vadd.f32 %v315_v34, %v274_v32 }
  0xe8   :  { %v317_v38 = vpop.f32.mrf.mxu0 }
  0xe9   :  { %v262_v39 = vadd.f32 %v261_v27, %v222_v36 }
  0xeb   :  { %v268_v40 = vadd.f32 %v267_v37, %v262_v39 }
  0xed   :  { %269 = vst.msk [vmem:[%s454_s4] sm:$0xff] %vm183_vm1, %v268_v40 }

// kernel: separate_impala_cnn_forward.61
= control target key start
LH: loop header
LB: loop body
LE: loop exit
PB: predicated region body
PF: predicated region fallthrough
CT: control target
= control target key end

     0   :  { %v974_v1 = vmov 0   ;;  %v65_v55 = vlaneseq  ;;  %vm703_vm0 = vcmask 41984   ;;  %s1268_s2 = inlined_call_operand.vmem [shape: bf16[128,256], index: 2, kind: input, shape index: {}]   ;;  %s1269_s6 = inlined_call_operand.vmem [shape: bf16[256,6], index: 6, kind: input, shape index: {}]   ;;  %s1270_s0 = inlined_call_operand.vmem [shape: f32[2,128], index: 0, kind: input, shape index: {}]   ;;  %s1271_s4 = inlined_call_operand.vmem [shape: bf16[128,256], index: 4, kind: input, shape index: {}]   ;;  %s1272_s1 = inlined_call_operand.vmem [shape: f32[2,128], index: 1, kind: input, shape index: {}]   ;;  %s1273_s3 = inlined_call_operand.vmem [shape: f32[1,256], index: 3, kind: input, shape index: {}]   ;;  %s1274_s8 = inlined_call_operand.vmem [shape: bf16[256,1], index: 8, kind: input, shape index: {}]   ;;  %s1275_s5 = inlined_call_operand.vmem [shape: f32[1,256], index: 5, kind: input, shape index: {}]   ;;  %s1276_s7 = inlined_call_operand.vmem [shape: f32[1,6], index: 7, kind: input, shape index: {}]   ;;  %s1277_s10 = inlined_call_operand.vmem [shape: f32[2,6], index: 10, kind: input, shape index: {}]   ;;  %s1278_s9 = inlined_call_operand.<no memory space> [shape: f32[1,1], index: 9, kind: input, shape index: {}]   ;;  %s1279_s11 = inlined_call_operand.vmem [shape: f32[2,128], index: 11, kind: output, shape index: {}]  }
   0x1   :  { %v888_v0 = vld [vmem:[%s1268_s2 + $0x74] ss:$8 sps:$4 sm:$0xff]   ;;  %187 = vmatprep.mubr.bf16.mxu0 %v974_v1  ;;  %338 = vmatprep.mubr.bf16.mxu1 %v974_v1  ;;  %v890_v2 = vld [vmem:[%s1268_s2 + $0x70] ss:$8 sps:$4 sm:$0xff]   ;;  %v891_v3 = vld [vmem:[%s1268_s2 + $0x64] ss:$8 sps:$4 sm:$0xff]  }
   0x2   :  { %886 = vset.pattern.permute.xlu1 %v974_v1  ;;  %887 = vset.pattern.permute.xlu0 %v974_v1  ;;  %v893_v4 = vld [vmem:[%s1268_s2 + $0x60] ss:$8 sps:$4 sm:$0xff]   ;;  %v894_v5 = vld [vmem:[%s1268_s2 + $0x54] ss:$8 sps:$4 sm:$0xff]   ;;  %v896_v6 = vld [vmem:[%s1268_s2 + $0x50] ss:$8 sps:$4 sm:$0xff]  }
   0x3   :  { %155 = vmatprep.subr.bf16.mxu0 %v888_v0  ;;  %v897_v7 = vld [vmem:[%s1268_s2 + $0x44] ss:$8 sps:$4 sm:$0xff]   ;;  %v899_v8 = vld [vmem:[%s1268_s2 + $0x40] ss:$8 sps:$4 sm:$0xff]   ;;  %v900_v9 = vld [vmem:[%s1268_s2 + $0x34] ss:$8 sps:$4 sm:$0xff]  }
   0x4   :  { %156 = vmatpush1.bf16.msra.mxu0 %v890_v2  ;;  %v902_v10 = vld [vmem:[%s1268_s2 + $0x30] ss:$8 sps:$4 sm:$0xff]   ;;  %v903_v11 = vld [vmem:[%s1268_s2 + $0x24] ss:$8 sps:$4 sm:$0xff]   ;;  %v905_v12 = vld [vmem:[%s1268_s2 + $0x20] ss:$8 sps:$4 sm:$0xff]  }
   0x5   :  { %157 = vmatprep.subr.bf16.mxu0 %v891_v3  ;;  %v906_v13 = vld [vmem:[%s1268_s2 + $0x14] ss:$8 sps:$4 sm:$0xff]   ;;  %v908_v14 = vld [vmem:[%s1268_s2 + $0x10] ss:$8 sps:$4 sm:$0xff]   ;;  %v909_v15 = vld [vmem:[%s1268_s2 + $0x4] ss:$8 sps:$4 sm:$0xff]  }
   0x6   :  { %v41_v16 = vld [vmem:[%s1270_s0] sm:$0x3]  ;;  %v912_v19 = vld [vmem:[%s1269_s6 + $0x78] sm:$0xff]   ;;  %v914_v22 = vld [vmem:[%s1269_s6 + $0x70] sm:$0xff]   ;;  %v66_v56 = vshrl.u32 %v65_v55, 7 }
   0x7   :  { %v42_v17 = vmax.f32 %v41_v16, 0.0  ;;  %v911_v18 = vld [vmem:[%s1268_s2] ss:$8 sps:$4 sm:$0xff]   ;;  %v913_v21 = vld [vmem:[%s1269_s6 + $0x38] sm:$0xff]   ;;  %v915_v23 = vld [vmem:[%s1269_s6 + $0x30] sm:$0xff]  }
   0x8   :  { %158 = vmatpush1.bf16.msra.mxu0 %v893_v4  ;;  %v916_v24 = vld [vmem:[%s1269_s6 + $0x68] sm:$0xff]   ;;  %v918_v26 = vld [vmem:[%s1269_s6 + $0x60] sm:$0xff]   ;;  %v920_v28 = vld [vmem:[%s1269_s6 + $0x58] sm:$0xff]   ;;  %v67_v57 = vsub.s32 0, %v66_v56  ;;  %v71_v59 = vsub.s32 1, %v66_v56 }
   0x9   :  { %159 = vmatprep.subr.bf16.mxu0 %v894_v5  ;;  %v43_v20 = vpack.c.bf16 %v42_v17, %v42_v17  ;;  %v917_v25 = vld [vmem:[%s1269_s6 + $0x28] sm:$0xff]   ;;  %v919_v27 = vld [vmem:[%s1269_s6 + $0x20] sm:$0xff]   ;;  %v921_v29 = vld [vmem:[%s1269_s6 + $0x18] sm:$0xff]  }
   0xa   :  { %v922_v30 = vld [vmem:[%s1269_s6 + $0x50] sm:$0xff]   ;;  %v924_v32 = vld [vmem:[%s1269_s6 + $0x48] sm:$0xff]   ;;  %v926_v34 = vld [vmem:[%s1269_s6 + $0x40] sm:$0xff]  }
   0xb   :  { %v923_v31 = vld [vmem:[%s1269_s6 + $0x10] sm:$0xff]   ;;  %v925_v33 = vld [vmem:[%s1269_s6 + $0x8] sm:$0xff]   ;;  %v927_v35 = vld [vmem:[%s1269_s6] sm:$0xff]  }
   0xc   :  { %160 = vmatpush1.bf16.msra.mxu0 %v896_v6  ;;  %v928_v36 = vld [vmem:[%s1271_s4 + $0x74] ss:$8 sps:$4 sm:$0xff]   ;;  %v930_v37 = vld [vmem:[%s1271_s4 + $0x70] ss:$8 sps:$4 sm:$0xff]   ;;  %v931_v38 = vld [vmem:[%s1271_s4 + $0x64] ss:$8 sps:$4 sm:$0xff]  }
   0xd   :  { %161 = vmatprep.subr.bf16.mxu0 %v897_v7  ;;  %306 = vmatprep.subr.bf16.mxu1 %v928_v36  ;;  %v933_v39 = vld [vmem:[%s1271_s4 + $0x60] ss:$8 sps:$4 sm:$0xff]   ;;  %v934_v40 = vld [vmem:[%s1271_s4 + $0x54] ss:$8 sps:$4 sm:$0xff]   ;;  %v936_v41 = vld [vmem:[%s1271_s4 + $0x50] ss:$8 sps:$4 sm:$0xff]  }
   0xe   :  { %307 = vmatpush1.bf16.msra.mxu1 %v930_v37  ;;  %v937_v42 = vld [vmem:[%s1271_s4 + $0x44] ss:$8 sps:$4 sm:$0xff]   ;;  %v939_v43 = vld [vmem:[%s1271_s4 + $0x40] ss:$8 sps:$4 sm:$0xff]   ;;  %v940_v44 = vld [vmem:[%s1271_s4 + $0x34] ss:$8 sps:$4 sm:$0xff]  }
   0xf   :  { %308 = vmatprep.subr.bf16.mxu1 %v931_v38  ;;  %v942_v45 = vld [vmem:[%s1271_s4 + $0x30] ss:$8 sps:$4 sm:$0xff]   ;;  %v943_v46 = vld [vmem:[%s1271_s4 + $0x24] ss:$8 sps:$4 sm:$0xff]   ;;  %v945_v47 = vld [vmem:[%s1271_s4 + $0x20] ss:$8 sps:$4 sm:$0xff]  }
  0x10   :  { %162 = vmatpush1.bf16.msra.mxu0 %v899_v8  ;;  %v946_v48 = vld [vmem:[%s1271_s4 + $0x14] ss:$8 sps:$4 sm:$0xff]   ;;  %v948_v49 = vld [vmem:[%s1271_s4 + $0x10] ss:$8 sps:$4 sm:$0xff]   ;;  %v44_v50 = vld [vmem:[%s1272_s1] sm:$0x3] }
  0x11   :  { %163 = vmatprep.subr.bf16.mxu0 %v900_v9  ;;  %v949_v51 = vld [vmem:[%s1271_s4 + $0x4] ss:$8 sps:$4 sm:$0xff]   ;;  %v45_v52 = vmax.f32 %v44_v50, 0.0  ;;  %v951_v53 = vld [vmem:[%s1271_s4] ss:$8 sps:$4 sm:$0xff]   ;;  %v952_v8 = vld [vmem:[%s1274_s8 + $0x78] sm:$0xff]  }
  0x12   :  { %309 = vmatpush1.bf16.msra.mxu1 %v933_v39  ;;  %v63_v58 = vld [vmem:[%s1273_s3] sm:$0x3]  ;;  %v953_v9 = vld [vmem:[%s1274_s8 + $0x38] sm:$0xff]  }
  0x13   :  { %310 = vmatprep.subr.bf16.mxu1 %v934_v40  ;;  %v46_v54 = vpack.c.bf16 %v45_v52, %v45_v52  ;;  %v68_v60 = vrot.slane %v63_v58, %v67_v57  ;;  %v72_v61 = vrot.slane %v63_v58, %v71_v59  ;;  %v960_v16 = vld [vmem:[%s1274_s8 + $0x58] sm:$0xff]   ;;  %v805_v38 = vld [vmem:[%s1276_s7] ss:$0 sm:$0xff] }
  0x14   :  { %164 = vmatpush1.bf16.msra.mxu0 %v902_v10  ;;  %v954_v10 = vld [vmem:[%s1274_s8 + $0x70] sm:$0xff]   ;;  %v961_v17 = vld [vmem:[%s1274_s8 + $0x18] sm:$0xff]  }
  0x15   :  { %165 = vmatprep.subr.bf16.mxu0 %v903_v11  ;;  %v955_v11 = vld [vmem:[%s1274_s8 + $0x30] sm:$0xff]  }
  0x16   :  { %311 = vmatpush1.bf16.msra.mxu1 %v936_v41 }
  0x17   :  { %312 = vmatprep.subr.bf16.mxu1 %v937_v42  ;;  %v723_v42 = vld [vmem:[%s1277_s10] sm:$0x3] }
  0x18   :  { %166 = vmatpush1.bf16.msra.mxu0 %v905_v12  ;;  %v956_v12 = vld [vmem:[%s1274_s8 + $0x68] sm:$0xff]  }
  0x19   :  { %167 = vmatprep.subr.bf16.mxu0 %v906_v13  ;;  %v957_v13 = vld [vmem:[%s1274_s8 + $0x28] sm:$0xff]  }
  0x1a   :  { %313 = vmatpush1.bf16.msra.mxu1 %v939_v43 }
  0x1b   :  { %314 = vmatprep.subr.bf16.mxu1 %v940_v44 }
  0x1c   :  { %168 = vmatpush1.bf16.msra.mxu0 %v908_v14  ;;  %v958_v14 = vld [vmem:[%s1274_s8 + $0x60] sm:$0xff]  }
  0x1d   :  { %169 = vmatprep.subr.bf16.mxu0 %v909_v15  ;;  %v959_v15 = vld [vmem:[%s1274_s8 + $0x20] sm:$0xff]  }
  0x1e   :  { %315 = vmatpush1.bf16.msra.mxu1 %v942_v45 }
  0x1f   :  { %316 = vmatprep.subr.bf16.mxu1 %v943_v46 }
  0x20   :  { %170 = vmatpush1.bf16.msra.mxu0 %v911_v18  ;;  %v214_v18 = vld [vmem:[%s1275_s5] sm:$0x3] }
  0x21   :  { %840 = vmatprep.subr.bf16.mxu0 %v912_v19  ;;  %v962_v19 = vld [vmem:[%s1274_s8 + $0x50] sm:$0xff]  }
  0x22   :  { %317 = vmatpush1.bf16.msra.mxu1 %v945_v47 }
  0x23   :  { %188 = vmatmul.mubr.bf16.vlgmr.msra.gmra.mxu0 %v43_v20  ;;  %318 = vmatprep.subr.bf16.mxu1 %v946_v48  ;;  %v219_v20 = vrot.slane %v214_v18, %v67_v57  ;;  %v1250_v48 = vand.u32 127, %v65_v55  ;;  %v16_v55 = vstv %s1278_s9 }
  0x24   :  { %841 = vmatpush3.bf16.msra.mxu0 %v913_v21  ;;  %v963_v21 = vld [vmem:[%s1274_s8 + $0x10] sm:$0xff]   ;;  %17 = vst [vmem:[#allocation2] sm:$0x1] %v16_v55 }
  0x25   :  { %842 = vmatprep.subr.bf16.mxu0 %v914_v22  ;;  %v223_v22 = vrot.slane %v214_v18, %v71_v59  ;;  %vm758_vm4 = vcmp.eq.s32.totalorder %v1250_v48, 3  ;;  %vm757_vm5 = vcmp.eq.s32.totalorder %v1250_v48, 2  ;;  %vm756_vm6 = vcmp.eq.s32.totalorder %v1250_v48, 1 }
  0x26   :  { %319 = vmatpush1.bf16.msra.mxu1 %v948_v49  ;;  %vm754_vm7 = vcmp.eq.s32.totalorder %v1250_v48, 0 }
  0x27   :  { %320 = vmatprep.subr.bf16.mxu1 %v949_v51 }
  0x28   :  { %843 = vmatpush3.bf16.msra.mxu0 %v915_v23 }
  0x29   :  { %844 = vmatprep.subr.bf16.mxu0 %v916_v24  ;;  %v964_v24 = vld [vmem:[%s1274_s8 + $0x48] sm:$0xff]  }
  0x2a   :  { %321 = vmatpush1.bf16.msra.mxu1 %v951_v53 }
  0x2b   :  { %862 = vmatprep.subr.bf16.mxu1 %v952_v8 }
  0x2c   :  { %845 = vmatpush3.bf16.msra.mxu0 %v917_v25 }
  0x2d   :  { %846 = vmatprep.subr.bf16.mxu0 %v918_v26  ;;  %339 = vmatmul.mubr.bf16.vlgmr.msra.gmra.mxu1 %v46_v54 }
  0x2e   :  { %863 = vmatpush3.bf16.msra.mxu1 %v953_v9 }
  0x2f   :  { %864 = vmatprep.subr.bf16.mxu1 %v954_v10 }
  0x30   :  { %847 = vmatpush3.bf16.msra.mxu0 %v919_v27 }
  0x31   :  { %848 = vmatprep.subr.bf16.mxu0 %v920_v28  ;;  %v965_v28 = vld [vmem:[%s1274_s8 + $0x8] sm:$0xff]  }
  0x32   :  { %865 = vmatpush3.bf16.msra.mxu1 %v955_v11 }
  0x33   :  { %866 = vmatprep.subr.bf16.mxu1 %v956_v12 }
  0x34   :  { %849 = vmatpush3.bf16.msra.mxu0 %v921_v29  ;;  %v966_v29 = vld [vmem:[%s1274_s8 + $0x40] sm:$0xff]  }
  0x35   :  { %850 = vmatprep.subr.bf16.mxu0 %v922_v30 }
  0x36   :  { %867 = vmatpush3.bf16.msra.mxu1 %v957_v13  ;;  %v822_v13 = vld [vmem:[#allocation2] ss:$0 sm:$0xff] }
  0x37   :  { %868 = vmatprep.subr.bf16.mxu1 %v958_v14 }
  0x38   :  { %851 = vmatpush3.bf16.msra.mxu0 %v923_v31 }
  0x39   :  { %852 = vmatprep.subr.bf16.mxu0 %v924_v32 }
  0x3a   :  { %869 = vmatpush3.bf16.msra.mxu1 %v959_v15 }
  0x3b   :  { %870 = vmatprep.subr.bf16.mxu1 %v960_v16 }
  0x3c   :  { %853 = vmatpush3.bf16.msra.mxu0 %v925_v33 }
  0x3d   :  { %854 = vmatprep.subr.bf16.mxu0 %v926_v34 }
  0x3e   :  { %871 = vmatpush3.bf16.msra.mxu1 %v961_v17 }
  0x3f   :  { %872 = vmatprep.subr.bf16.mxu1 %v962_v19 }
  0x40   :  { %855 = vmatpush3.bf16.msra.mxu0 %v927_v35  ;;  %v967_v35 = vld [vmem:[%s1274_s8] sm:$0xff]  }
  0x42   :  { %873 = vmatpush3.bf16.msra.mxu1 %v963_v21 }
  0x43   :  { %874 = vmatprep.subr.bf16.mxu1 %v964_v24 }
  0x46   :  { %875 = vmatpush3.bf16.msra.mxu1 %v965_v28 }
  0x47   :  { %876 = vmatprep.subr.bf16.mxu1 %v966_v29 }
  0x4a   :  { %877 = vmatpush3.bf16.msra.mxu1 %v967_v35 }
  0xe3   :  { %v189_v62 = vpop.f32.mrf.mxu0 }
  0xe4   :  { %v190_v63 = vadd.f32 %v189_v62, %v68_v60 }
  0xe5   :  { %v191_v0 = vpop.f32.mrf.mxu0 }
  0xe6   :  { %v192_v1 = vadd.f32 %v191_v0, %v72_v61  ;;  %v196_v2 = vmax.f32 %v190_v63, 0.0 }
  0xe7   :  { %v193_v3 = vpop.f32.mrf.mxu0 }
  0xe8   :  { %v197_v4 = vmax.f32 %v192_v1, 0.0  ;;  %v349_v7 = vpack.c.bf16 %v196_v2, %v196_v2 }
  0xe9   :  { %v194_v5 = vpop.f32.mrf.mxu0 }
  0xea   :  { %v350_v6 = vpack.c.bf16 %v197_v4, %v197_v4 }
  0xec   :  { %518 = vmatprep.mubr.bf16.mxu0 %v350_v6 }
  0xed   :  { %519 = vmatmul.mubr.bf16.vlgmr.msra.gmra.mxu0 %v349_v7  ;;  %v340_v23 = vpop.f32.mrf.mxu1 }
  0xee   :  { %v341_v25 = vadd.f32 %v340_v23, %v219_v20  ;;  %v975_v20 = vmov 0.0  }
  0xef   :  { %v342_v26 = vpop.f32.mrf.mxu1 }
  0xf0   :  { %v343_v27 = vadd.f32 %v342_v26, %v223_v22  ;;  %v347_v32 = vmax.f32 %v341_v25, 0.0 }
  0xf1   :  { %v344_v30 = vpop.f32.mrf.mxu1 }
  0xf2   :  { %v348_v31 = vmax.f32 %v343_v27, 0.0  ;;  %v526_v36 = vpack.c.bf16 %v347_v32, %v347_v32 }
  0xf3   :  { %v345_v33 = vpop.f32.mrf.mxu1 }
  0xf4   :  { %v527_v34 = vpack.c.bf16 %v348_v31, %v348_v31 }
  0xf6   :  { %695 = vmatprep.mubr.bf16.mxu1 %v527_v34 }
  0xf7   :  { %696 = vmatmul.mubr.bf16.vlgmr.msra.gmra.mxu1 %v526_v36 }
 0x1ad   :  { %v856_v37 = vpop.f32.mrf.mxu0 }
 0x1af   :  { %v857_v39 = vpop.f32.mrf.mxu0 }
 0x1b0   :  { %v858_v40 = vadd.f32 %v857_v39, %v856_v37 }
 0x1b1   :  { %v859_v41 = vpop.f32.mrf.mxu0 }
 0x1b2   :  { %v521_v43 = vadd.f32 %v858_v40, %v805_v38 }
 0x1b3   :  { %v860_v44 = vpop.f32.mrf.mxu0 }
 0x1b4   :  { %v724_v45 = vadd.f32 %v723_v42, %v521_v43  ;;  %v704_v47 = vsel %vm703_vm0, %v521_v43, -inf }
 0x1b6   :  { %v725_v46 = vsel %vm703_vm0, %v724_v45, -inf }
 0x1b7   :  { %726 = vmax.xlane.f32.xlu0 %v725_v46  ;;  %v878_v60 = vpop.f32.mrf.mxu1 }
 0x1b9   :  { %v879_v61 = vpop.f32.mrf.mxu1 }
 0x1ba   :  { %v880_v62 = vadd.f32 %v879_v61, %v878_v60 }
 0x1bb   :  { %705 = vmax.xlane.f32.xlu0 %v704_v47  ;;  %v881_v63 = vpop.f32.mrf.mxu1 }
 0x1bc   :  { %v698_v14 = vadd.f32 %v880_v62, %v822_v13 }
 0x1bd   :  { %v882_v0 = vpop.f32.mrf.mxu1 }
 0x240   :  { %v727_v49 = vpop.xlane.xlu0 %726 }
 0x241   :  { %vm730_vm1 = vcmp.ge.f32.partialorder %v724_v45, %v727_v49 }
 0x242   :  { %v731_v50 = vsel %vm730_vm1, %v1250_v48, 6 }
 0x243   :  { %v732_v51 = vsel %vm703_vm0, %v731_v50, 2147483647 }
 0x244   :  { %v706_v52 = vpop.xlane.xlu0 %705  ;;  %v734_v53 = vshra.s32 %v732_v51, 16  ;;  %v733_v1 = vand.u32 65535, %v732_v51 }
 0x245   :  { %v707_v54 = vsub.f32 %v521_v43, %v706_v52 }
 0x246   :  { %v736_v56 = vcvt.s32.f32 %v734_v53  ;;  %v735_v3 = vcvt.s32.f32 %v733_v1 }
 0x247   :  { %v708_v57 = vmul.f32 1.442695, %v707_v54 }
 0x248   :  { %737 = vmin.xlane.f32.xlu1 %v736_v56 }
 0x249   :  { %968 = vpow2.f32 %v708_v57 }
 0x256   :  { %v969_v58 = vpop.eup %968 }
 0x257   :  { %v710_v59 = vsel %vm703_vm0, %v969_v58, 0.0 }
 0x258   :  { %711 = vadd.xlane.f32.xlu1 %v710_v59 }
 0x2d1   :  { %v738_v2 = vpop.xlane.xlu1 %737 }
 0x2d2   :  { %vm739_vm2 = vcmp.eq.f32.partialorder %v736_v56, %v738_v2  ;;  %v744_v15 = vcvt.f32.s32 %v738_v2 }
 0x2d3   :  { %v740_v4 = vsel %vm739_vm2, %v735_v3, inf }
 0x2d4   :  { %741 = vmin.xlane.f32.xlu0 %v740_v4  ;;  %v745_v17 = vshll.u32 %v744_v15, 16 }
 0x2e1   :  { %v712_v5 = vpop.xlane.xlu1 %711 }
 0x2e2   :  { %970 = vlog2.f32 %v712_v5 }
 0x2e3   :  { %972 = vrcp.f32 %v712_v5 }
 0x2ef   :  { %v971_v6 = vpop.eup %970 }
 0x2f0   :  { %v973_v7 = vpop.eup %972  ;;  %v714_v8 = vmul.f32 0.6931472, %v971_v6 }
 0x2f1   :  { %v717_v10 = vmul.f32 %v973_v7, %v969_v58 }
 0x2f2   :  { %v715_v9 = vsub.f32 %v707_v54, %v714_v8 }
 0x2f4   :  { %v718_v11 = vmul.f32 %v717_v10, %v715_v9 }
 0x2f6   :  { %v719_v12 = vsel %vm703_vm0, %v718_v11, 0.0 }
 0x2f7   :  { %720 = vadd.xlane.f32.xlu1 %v719_v12 }
 0x308   :  { %762 = vperm.xlu1 %886, %v698_v14  }
 0x35d   :  { %v742_v16 = vpop.xlane.xlu0 %741 }
 0x35e   :  { %v743_v18 = vcvt.f32.s32 %v742_v16 }
 0x360   :  { %v746_v19 = vadd.s32 %v745_v17, %v743_v18 }
 0x362   :  { %vm747_vm3 = vcmp.eq.s32.totalorder %v1250_v48, %v746_v19  ;;  %v755_v28 = vcvt.s32.f32 %v746_v19 }
 0x363   :  { %v839_v21 = vsel %vm747_vm3, 1.0, %v975_v20 }
 0x364   :  { %v750_v22 = vmul.f32 %v839_v21, %v715_v9 }
 0x366   :  { %v751_v23 = vsel %vm703_vm0, %v750_v22, 0.0 }
 0x367   :  { %752 = vadd.xlane.f32.xlu0 %v751_v23 }
 0x380   :  { %v721_v24 = vpop.xlane.xlu1 %720 }
 0x381   :  { %v722_v25 = vsub.f32 0.0, %v721_v24 }
 0x383   :  { %v759_v26 = vsel %vm758_vm4, %v722_v25, 0.0 }
 0x384   :  { %v763_v27 = vpop.permute.xlu1 %762 }
 0x385   :  { %v765_v29 = vsel %vm757_vm5, %v763_v27, %v759_v26 }
 0x3f0   :  { %v753_v30 = vpop.xlane.xlu0 %752 }
 0x3f1   :  { %v766_v31 = vsel %vm756_vm6, %v753_v30, %v765_v29 }
 0x3f2   :  { %v767_v32 = vsel %vm754_vm7, %v755_v28, %v766_v31 }
 0x3f3   :  { %768 = vst [vmem:[%s1279_s11] sm:$0x3] %v767_v32 }

</bundles_post_ra>
